<compile_context>
chip_gen: v7x
topology: tpu7x:2x2x1
jax: 0.10.0
libtpu: 0.0.40
codegen_flags: <defaults>
</compile_context>

<pallas_src>
import jax
import jax.numpy as jnp
from jax.experimental import pallas as pl
from jax.experimental.pallas import tpu as pltpu

_K = 5  # conv kernel size for both convs


def _submodel_kernel(x_ref, wb_ref, b1_ref, w2l_ref, b2_ref, o_ref):
    bsz = x_ref.shape[0]
    x = x_ref[...]                                                 # (B, 28, 28) f32

    # ---------------- stage 1: conv1 on the MXU ----------------
    # acc1[(b, oh), (ow%2)*120 + (ow//2)*10 + co] = conv1(x)[b, oh, ow, co] + bias
    acc1 = jnp.zeros((bsz * 24, 240), jnp.float32) + b1_ref[...]
    for kh in range(_K):
        xs = x[:, kh:kh + 24, :].reshape(bsz * 24, 28)             # rows = (b, oh)
        acc1 = acc1 + jnp.dot(xs, wb_ref[kh],
                              preferred_element_type=jnp.float32)

    # 2x2 max-pool + ReLU.
    # W-pool: parity-ordered columns -> one maximum of two contiguous lane slices.
    wpool1 = jnp.maximum(acc1[:, :120], acc1[:, 120:])             # (B*24, 120)
    r1 = wpool1.reshape(bsz, 24, 120)
    # H-pool: unrolled row-pair maxima, concat along the sublane axis.
    hp1 = jnp.concatenate(
        [jnp.maximum(r1[:, 2 * p:2 * p + 1, :], r1[:, 2 * p + 1:2 * p + 2, :])
         for p in range(12)], axis=1)                              # (B, 12, 120)
    y1 = jnp.maximum(hp1, 0.0)                                     # [b, h, w*10 + ci]

    # ---------------- stage 2: conv2 on the MXU ----------------
    # TODO(synk): Dropout2d is identity here (eval semantics); training-mode channel
    #             masking (pltpu.prng_*-based) is not implemented.
    acc2 = jnp.zeros((bsz * 8, 160), jnp.float32) + b2_ref[...]
    for kh in range(_K):
        for kw in range(_K):
            piece = y1[:, kh:kh + 8, 10 * kw:10 * kw + 80].reshape(bsz * 8, 80)
            acc2 = acc2 + jnp.dot(piece, w2l_ref[kh * _K + kw],
                                  preferred_element_type=jnp.float32)

    # 2x2 max-pool + ReLU.
    wpool2 = jnp.maximum(acc2[:, :80], acc2[:, 80:])               # (B*8, 80)
    r2 = wpool2.reshape(bsz, 8, 80)
    hp2 = jnp.concatenate(
        [jnp.maximum(r2[:, 2 * p:2 * p + 1, :], r2[:, 2 * p + 1:2 * p + 2, :])
         for p in range(4)], axis=1)                               # (B, 4, 80)
    o_ref[...] = jnp.maximum(hp2, 0.0)                             # [b, h, w*20 + co]


def _round_up(v, m):
    return (v + m - 1) // m * m


def _prepare_params(w1_oihw, b1, w2_oihw, b2):
    """Pack PyTorch conv parameters into MXU-friendly weight matrices."""
    f32 = jnp.float32

    # conv1 -> banded weight (5, 28, 240); output columns ordered (ow % 2, ow // 2, co).
    w1_t = jnp.transpose(w1_oihw.astype(f32), (2, 3, 0, 1)).reshape(_K, _K, 10)  # [kh, kw, co]
    wb = jnp.zeros((_K, 28, 2, 12, 10), f32)
    for ow in range(24):
        wb = wb.at[:, ow:ow + _K, ow % 2, ow // 2, :].set(w1_t)
    wb = wb.reshape(_K, 28, 240)
    b1t = jnp.tile(b1.astype(f32).reshape(1, 10), (1, 24))          # (1, 240)

    # conv2 -> 25 block-diagonal (80, 160) weights; output columns ordered (ow%2, ow//2, co).
    w2_t = jnp.transpose(w2_oihw.astype(f32), (2, 3, 1, 0)).reshape(_K * _K, 10, 20)  # [t, ci, co]
    w2l = jnp.zeros((_K * _K, 8, 10, 2, 4, 20), f32)
    for ow in range(8):
        w2l = w2l.at[:, ow, :, ow % 2, ow // 2, :].set(w2_t)
    w2l = w2l.reshape(_K * _K, 80, 160)
    b2t = jnp.tile(b2.astype(f32).reshape(1, 20), (1, 8))           # (1, 160)

    return wb, b1t, w2l, b2t


def submodel_forward(x_nchw, w1_oihw, b1, w2_oihw, b2, *, block_b=128):
    """x_nchw: (N, 1, 28, 28). Returns (N, 20, 4, 4) matching PyTorch Submodel (eval mode)."""
    n = x_nchw.shape[0]
    x = x_nchw.reshape(n, 28, 28).astype(jnp.float32)               # cin == 1
    wb, b1t, w2l, b2t = _prepare_params(w1_oihw, b1, w2_oihw, b2)

    blk = min(block_b, _round_up(n, 8))
    n_pad = _round_up(n, blk)
    if n_pad != n:
        x = jnp.pad(x, ((0, n_pad - n), (0, 0), (0, 0)))
    grid = (n_pad // blk,)

    out = pl.pallas_call(
        _submodel_kernel,
        out_shape=jax.ShapeDtypeStruct((n_pad, 4, 80), jnp.float32),
        grid_spec=pltpu.PrefetchScalarGridSpec(
            num_scalar_prefetch=0,
            grid=grid,
            in_specs=[
                pl.BlockSpec((blk, 28, 28), lambda i: (i, 0, 0)),
                pl.BlockSpec((_K, 28, 240), lambda i: (0, 0, 0)),
                pl.BlockSpec((1, 240), lambda i: (0, 0)),
                pl.BlockSpec((_K * _K, 80, 160), lambda i: (0, 0, 0)),
                pl.BlockSpec((1, 160), lambda i: (0, 0)),
            ],
            out_specs=pl.BlockSpec((blk, 4, 80), lambda i: (i, 0, 0)),
        ),
        compiler_params=pltpu.CompilerParams(
            dimension_semantics=("parallel",),
            vmem_limit_bytes=48 * 1024 * 1024,
        ),
    )(x, wb, b1t, w2l, b2t)

    out = out[:n].reshape(n, 4, 4, 20)           # [b, h, w, co]
    return jnp.transpose(out, (0, 3, 1, 2))      # NCHW: (N, 20, 4, 4)


def reference_forward(x_nchw, w1_oihw, b1, w2_oihw, b2):
    """Pure-JAX reference (eval-mode Submodel) for validation."""
    x = jnp.transpose(x_nchw, (0, 2, 3, 1))
    dn = ("NHWC", "HWIO", "NHWC")

    def stage(y, w_oihw, bias):
        w = jnp.transpose(w_oihw, (2, 3, 1, 0))
        y = jax.lax.conv_general_dilated(y, w, (1, 1), "VALID", dimension_numbers=dn)
        y = y + bias.reshape(1, 1, 1, -1)
        y = jax.lax.reduce_window(y, -jnp.inf, jax.lax.max,
                                  (1, 2, 2, 1), (1, 2, 2, 1), "VALID")
        return jnp.maximum(y, 0.0)

    y = stage(x, w1_oihw, b1)
    y = stage(y, w2_oihw, b2)
    return jnp.transpose(y, (0, 3, 1, 2))


if __name__ == "__main__":
    key = jax.random.PRNGKey(0)
    kx, k1, k2, k3, k4 = jax.random.split(key, 5)

    # MNIST-like input, consistent with the module (Conv2d(1, ...) + 5x5 kernels).
    x = jax.random.normal(kx, (2, 1, 28, 28), jnp.float32)

    # Deterministic synthetic parameters with PyTorch layouts (OIHW weights).
    w1 = jax.random.normal(k1, (10, 1, 5, 5), jnp.float32) * 0.1
    b1 = jax.random.normal(k2, (10,), jnp.float32) * 0.1
    w2 = jax.random.normal(k3, (20, 10, 5, 5), jnp.float32) * 0.1
    b2 = jax.random.normal(k4, (20,), jnp.float32) * 0.1

    out = jax.block_until_ready(jax.jit(submodel_forward)(x, w1, b1, w2, b2))
    ref = jax.block_until_ready(jax.jit(reference_forward)(x, w1, b1, w2, b2))

    assert out.shape == (2, 20, 4, 4), out.shape
    max_err = float(jnp.max(jnp.abs(out - ref)))
    if max_err > 1e-3:
        raise AssertionError(f"Pallas kernel mismatch vs reference: {max_err}")

    print("KERNEL_OK")
</pallas_src>

<mosaic_0001>
module attributes {stable_mosaic.version = 11 : i64} {
  func.func @_submodel_kernel(%arg0: i32, %arg1: memref<8x28x28xf32, #tpu.memory_space<vmem>>, %arg2: memref<5x28x240xf32, #tpu.memory_space<vmem>>, %arg3: memref<1x240xf32, #tpu.memory_space<vmem>>, %arg4: memref<25x80x160xf32, #tpu.memory_space<vmem>>, %arg5: memref<1x160xf32, #tpu.memory_space<vmem>>, %arg6: memref<8x4x80xf32, #tpu.memory_space<vmem>>) attributes {dimension_semantics = [#tpu.dimension_semantics<parallel>], iteration_bounds = array<i64: 1>, scalar_prefetch = 0 : i64, scratch_operands = 0 : i64, tpu.core_type = #tpu.core_type<tc>, window_params = [{transform_indices = @transform_0, window_bounds = array<i64: 8, 28, 28>}, {pipeline_mode = #tpu.pipeline_mode<synchronous>, transform_indices = @transform_1, window_bounds = array<i64: 5, 28, 240>}, {pipeline_mode = #tpu.pipeline_mode<synchronous>, transform_indices = @transform_2, window_bounds = array<i64: 1, 240>}, {pipeline_mode = #tpu.pipeline_mode<synchronous>, transform_indices = @transform_3, window_bounds = array<i64: 25, 80, 160>}, {pipeline_mode = #tpu.pipeline_mode<synchronous>, transform_indices = @transform_4, window_bounds = array<i64: 1, 160>}, {transform_indices = @transform_5, window_bounds = array<i64: 8, 4, 80>}]} {
    %c0 = arith.constant 0 : index
    %c0_0 = arith.constant 0 : index
    %c0_1 = arith.constant 0 : index
    %0 = vector.load %arg1[%c0, %c0_0, %c0_1] : memref<8x28x28xf32, #tpu.memory_space<vmem>>, vector<8x28x28xf32>
    %cst = arith.constant 0.000000e+00 : f32
    %1 = vector.broadcast %cst : f32 to vector<192x240xf32>
    %c0_2 = arith.constant 0 : index
    %c0_3 = arith.constant 0 : index
    %2 = vector.load %arg3[%c0_2, %c0_3] : memref<1x240xf32, #tpu.memory_space<vmem>>, vector<1x240xf32>
    %3 = vector.broadcast %2 : vector<1x240xf32> to vector<192x240xf32>
    %4 = arith.addf %1, %3 : vector<192x240xf32>
    %5 = vector.extract_strided_slice %0 {offsets = [0, 0, 0], sizes = [8, 24, 28], strides = [1, 1, 1]} : vector<8x28x28xf32> to vector<8x24x28xf32>
    %6 = vector.shape_cast %5 : vector<8x24x28xf32> to vector<192x28xf32>
    %c0_4 = arith.constant 0 : index
    %c0_5 = arith.constant 0 : index
    %c0_6 = arith.constant 0 : index
    %7 = vector.load %arg2[%c0_4, %c0_5, %c0_6] : memref<5x28x240xf32, #tpu.memory_space<vmem>>, vector<1x28x240xf32>
    %8 = vector.shape_cast %7 : vector<1x28x240xf32> to vector<28x240xf32>
    %cst_7 = arith.constant dense<0.000000e+00> : vector<192x240xf32>
    %9 = tpu.matmul %6, %8, %cst_7 {dimension_numbers = #tpu.dot_dimension_numbers<[1], [0], [0], [1], [0, 0, 1, 1], [], []>} : vector<192x28xf32>, vector<28x240xf32>, vector<192x240xf32> -> vector<192x240xf32>
    %10 = arith.addf %4, %9 : vector<192x240xf32>
    %11 = vector.extract_strided_slice %0 {offsets = [0, 1, 0], sizes = [8, 24, 28], strides = [1, 1, 1]} : vector<8x28x28xf32> to vector<8x24x28xf32>
    %12 = vector.shape_cast %11 : vector<8x24x28xf32> to vector<192x28xf32>
    %c1 = arith.constant 1 : index
    %c0_8 = arith.constant 0 : index
    %c0_9 = arith.constant 0 : index
    %13 = vector.load %arg2[%c1, %c0_8, %c0_9] : memref<5x28x240xf32, #tpu.memory_space<vmem>>, vector<1x28x240xf32>
    %14 = vector.shape_cast %13 : vector<1x28x240xf32> to vector<28x240xf32>
    %cst_10 = arith.constant dense<0.000000e+00> : vector<192x240xf32>
    %15 = tpu.matmul %12, %14, %cst_10 {dimension_numbers = #tpu.dot_dimension_numbers<[1], [0], [0], [1], [0, 0, 1, 1], [], []>} : vector<192x28xf32>, vector<28x240xf32>, vector<192x240xf32> -> vector<192x240xf32>
    %16 = arith.addf %10, %15 : vector<192x240xf32>
    %17 = vector.extract_strided_slice %0 {offsets = [0, 2, 0], sizes = [8, 24, 28], strides = [1, 1, 1]} : vector<8x28x28xf32> to vector<8x24x28xf32>
    %18 = vector.shape_cast %17 : vector<8x24x28xf32> to vector<192x28xf32>
    %c2 = arith.constant 2 : index
    %c0_11 = arith.constant 0 : index
    %c0_12 = arith.constant 0 : index
    %19 = vector.load %arg2[%c2, %c0_11, %c0_12] : memref<5x28x240xf32, #tpu.memory_space<vmem>>, vector<1x28x240xf32>
    %20 = vector.shape_cast %19 : vector<1x28x240xf32> to vector<28x240xf32>
    %cst_13 = arith.constant dense<0.000000e+00> : vector<192x240xf32>
    %21 = tpu.matmul %18, %20, %cst_13 {dimension_numbers = #tpu.dot_dimension_numbers<[1], [0], [0], [1], [0, 0, 1, 1], [], []>} : vector<192x28xf32>, vector<28x240xf32>, vector<192x240xf32> -> vector<192x240xf32>
    %22 = arith.addf %16, %21 : vector<192x240xf32>
    %23 = vector.extract_strided_slice %0 {offsets = [0, 3, 0], sizes = [8, 24, 28], strides = [1, 1, 1]} : vector<8x28x28xf32> to vector<8x24x28xf32>
    %24 = vector.shape_cast %23 : vector<8x24x28xf32> to vector<192x28xf32>
    %c3 = arith.constant 3 : index
    %c0_14 = arith.constant 0 : index
    %c0_15 = arith.constant 0 : index
    %25 = vector.load %arg2[%c3, %c0_14, %c0_15] : memref<5x28x240xf32, #tpu.memory_space<vmem>>, vector<1x28x240xf32>
    %26 = vector.shape_cast %25 : vector<1x28x240xf32> to vector<28x240xf32>
    %cst_16 = arith.constant dense<0.000000e+00> : vector<192x240xf32>
    %27 = tpu.matmul %24, %26, %cst_16 {dimension_numbers = #tpu.dot_dimension_numbers<[1], [0], [0], [1], [0, 0, 1, 1], [], []>} : vector<192x28xf32>, vector<28x240xf32>, vector<192x240xf32> -> vector<192x240xf32>
    %28 = arith.addf %22, %27 : vector<192x240xf32>
    %29 = vector.extract_strided_slice %0 {offsets = [0, 4, 0], sizes = [8, 24, 28], strides = [1, 1, 1]} : vector<8x28x28xf32> to vector<8x24x28xf32>
    %30 = vector.shape_cast %29 : vector<8x24x28xf32> to vector<192x28xf32>
    %c4 = arith.constant 4 : index
    %c0_17 = arith.constant 0 : index
    %c0_18 = arith.constant 0 : index
    %31 = vector.load %arg2[%c4, %c0_17, %c0_18] : memref<5x28x240xf32, #tpu.memory_space<vmem>>, vector<1x28x240xf32>
    %32 = vector.shape_cast %31 : vector<1x28x240xf32> to vector<28x240xf32>
    %cst_19 = arith.constant dense<0.000000e+00> : vector<192x240xf32>
    %33 = tpu.matmul %30, %32, %cst_19 {dimension_numbers = #tpu.dot_dimension_numbers<[1], [0], [0], [1], [0, 0, 1, 1], [], []>} : vector<192x28xf32>, vector<28x240xf32>, vector<192x240xf32> -> vector<192x240xf32>
    %34 = arith.addf %28, %33 : vector<192x240xf32>
    %35 = vector.extract_strided_slice %34 {offsets = [0, 0], sizes = [192, 120], strides = [1, 1]} : vector<192x240xf32> to vector<192x120xf32>
    %36 = vector.extract_strided_slice %34 {offsets = [0, 120], sizes = [192, 120], strides = [1, 1]} : vector<192x240xf32> to vector<192x120xf32>
    %37 = arith.maximumf %35, %36 : vector<192x120xf32>
    %38 = vector.shape_cast %37 : vector<192x120xf32> to vector<8x24x120xf32>
    %39 = vector.extract_strided_slice %38 {offsets = [0, 0, 0], sizes = [8, 1, 120], strides = [1, 1, 1]} : vector<8x24x120xf32> to vector<8x1x120xf32>
    %40 = vector.extract_strided_slice %38 {offsets = [0, 1, 0], sizes = [8, 1, 120], strides = [1, 1, 1]} : vector<8x24x120xf32> to vector<8x1x120xf32>
    %41 = arith.maximumf %39, %40 : vector<8x1x120xf32>
    %42 = vector.extract_strided_slice %38 {offsets = [0, 2, 0], sizes = [8, 1, 120], strides = [1, 1, 1]} : vector<8x24x120xf32> to vector<8x1x120xf32>
    %43 = vector.extract_strided_slice %38 {offsets = [0, 3, 0], sizes = [8, 1, 120], strides = [1, 1, 1]} : vector<8x24x120xf32> to vector<8x1x120xf32>
    %44 = arith.maximumf %42, %43 : vector<8x1x120xf32>
    %45 = vector.extract_strided_slice %38 {offsets = [0, 4, 0], sizes = [8, 1, 120], strides = [1, 1, 1]} : vector<8x24x120xf32> to vector<8x1x120xf32>
    %46 = vector.extract_strided_slice %38 {offsets = [0, 5, 0], sizes = [8, 1, 120], strides = [1, 1, 1]} : vector<8x24x120xf32> to vector<8x1x120xf32>
    %47 = arith.maximumf %45, %46 : vector<8x1x120xf32>
    %48 = vector.extract_strided_slice %38 {offsets = [0, 6, 0], sizes = [8, 1, 120], strides = [1, 1, 1]} : vector<8x24x120xf32> to vector<8x1x120xf32>
    %49 = vector.extract_strided_slice %38 {offsets = [0, 7, 0], sizes = [8, 1, 120], strides = [1, 1, 1]} : vector<8x24x120xf32> to vector<8x1x120xf32>
    %50 = arith.maximumf %48, %49 : vector<8x1x120xf32>
    %51 = vector.extract_strided_slice %38 {offsets = [0, 8, 0], sizes = [8, 1, 120], strides = [1, 1, 1]} : vector<8x24x120xf32> to vector<8x1x120xf32>
    %52 = vector.extract_strided_slice %38 {offsets = [0, 9, 0], sizes = [8, 1, 120], strides = [1, 1, 1]} : vector<8x24x120xf32> to vector<8x1x120xf32>
    %53 = arith.maximumf %51, %52 : vector<8x1x120xf32>
    %54 = vector.extract_strided_slice %38 {offsets = [0, 10, 0], sizes = [8, 1, 120], strides = [1, 1, 1]} : vector<8x24x120xf32> to vector<8x1x120xf32>
    %55 = vector.extract_strided_slice %38 {offsets = [0, 11, 0], sizes = [8, 1, 120], strides = [1, 1, 1]} : vector<8x24x120xf32> to vector<8x1x120xf32>
    %56 = arith.maximumf %54, %55 : vector<8x1x120xf32>
    %57 = vector.extract_strided_slice %38 {offsets = [0, 12, 0], sizes = [8, 1, 120], strides = [1, 1, 1]} : vector<8x24x120xf32> to vector<8x1x120xf32>
    %58 = vector.extract_strided_slice %38 {offsets = [0, 13, 0], sizes = [8, 1, 120], strides = [1, 1, 1]} : vector<8x24x120xf32> to vector<8x1x120xf32>
    %59 = arith.maximumf %57, %58 : vector<8x1x120xf32>
    %60 = vector.extract_strided_slice %38 {offsets = [0, 14, 0], sizes = [8, 1, 120], strides = [1, 1, 1]} : vector<8x24x120xf32> to vector<8x1x120xf32>
    %61 = vector.extract_strided_slice %38 {offsets = [0, 15, 0], sizes = [8, 1, 120], strides = [1, 1, 1]} : vector<8x24x120xf32> to vector<8x1x120xf32>
    %62 = arith.maximumf %60, %61 : vector<8x1x120xf32>
    %63 = vector.extract_strided_slice %38 {offsets = [0, 16, 0], sizes = [8, 1, 120], strides = [1, 1, 1]} : vector<8x24x120xf32> to vector<8x1x120xf32>
    %64 = vector.extract_strided_slice %38 {offsets = [0, 17, 0], sizes = [8, 1, 120], strides = [1, 1, 1]} : vector<8x24x120xf32> to vector<8x1x120xf32>
    %65 = arith.maximumf %63, %64 : vector<8x1x120xf32>
    %66 = vector.extract_strided_slice %38 {offsets = [0, 18, 0], sizes = [8, 1, 120], strides = [1, 1, 1]} : vector<8x24x120xf32> to vector<8x1x120xf32>
    %67 = vector.extract_strided_slice %38 {offsets = [0, 19, 0], sizes = [8, 1, 120], strides = [1, 1, 1]} : vector<8x24x120xf32> to vector<8x1x120xf32>
    %68 = arith.maximumf %66, %67 : vector<8x1x120xf32>
    %69 = vector.extract_strided_slice %38 {offsets = [0, 20, 0], sizes = [8, 1, 120], strides = [1, 1, 1]} : vector<8x24x120xf32> to vector<8x1x120xf32>
    %70 = vector.extract_strided_slice %38 {offsets = [0, 21, 0], sizes = [8, 1, 120], strides = [1, 1, 1]} : vector<8x24x120xf32> to vector<8x1x120xf32>
    %71 = arith.maximumf %69, %70 : vector<8x1x120xf32>
    %72 = vector.extract_strided_slice %38 {offsets = [0, 22, 0], sizes = [8, 1, 120], strides = [1, 1, 1]} : vector<8x24x120xf32> to vector<8x1x120xf32>
    %73 = vector.extract_strided_slice %38 {offsets = [0, 23, 0], sizes = [8, 1, 120], strides = [1, 1, 1]} : vector<8x24x120xf32> to vector<8x1x120xf32>
    %74 = arith.maximumf %72, %73 : vector<8x1x120xf32>
    %75 = tpu.concatenate %41, %44, %47, %50, %53, %56, %59, %62, %65, %68, %71, %74 in 1 : vector<8x1x120xf32>, vector<8x1x120xf32>, vector<8x1x120xf32>, vector<8x1x120xf32>, vector<8x1x120xf32>, vector<8x1x120xf32>, vector<8x1x120xf32>, vector<8x1x120xf32>, vector<8x1x120xf32>, vector<8x1x120xf32>, vector<8x1x120xf32>, vector<8x1x120xf32> -> vector<8x12x120xf32>
    %cst_20 = arith.constant 0.000000e+00 : f32
    %76 = vector.broadcast %cst_20 : f32 to vector<8x12x120xf32>
    %77 = arith.maximumf %75, %76 : vector<8x12x120xf32>
    %cst_21 = arith.constant 0.000000e+00 : f32
    %78 = vector.broadcast %cst_21 : f32 to vector<64x160xf32>
    %c0_22 = arith.constant 0 : index
    %c0_23 = arith.constant 0 : index
    %79 = vector.load %arg5[%c0_22, %c0_23] : memref<1x160xf32, #tpu.memory_space<vmem>>, vector<1x160xf32>
    %80 = vector.broadcast %79 : vector<1x160xf32> to vector<64x160xf32>
    %81 = arith.addf %78, %80 : vector<64x160xf32>
    %82 = vector.extract_strided_slice %77 {offsets = [0, 0, 0], sizes = [8, 8, 80], strides = [1, 1, 1]} : vector<8x12x120xf32> to vector<8x8x80xf32>
    %83 = vector.shape_cast %82 : vector<8x8x80xf32> to vector<64x80xf32>
    %c0_24 = arith.constant 0 : index
    %c0_25 = arith.constant 0 : index
    %c0_26 = arith.constant 0 : index
    %84 = vector.load %arg4[%c0_24, %c0_25, %c0_26] : memref<25x80x160xf32, #tpu.memory_space<vmem>>, vector<1x80x160xf32>
    %85 = vector.shape_cast %84 : vector<1x80x160xf32> to vector<80x160xf32>
    %cst_27 = arith.constant dense<0.000000e+00> : vector<64x160xf32>
    %86 = tpu.matmul %83, %85, %cst_27 {dimension_numbers = #tpu.dot_dimension_numbers<[1], [0], [0], [1], [0, 0, 1, 1], [], []>} : vector<64x80xf32>, vector<80x160xf32>, vector<64x160xf32> -> vector<64x160xf32>
    %87 = arith.addf %81, %86 : vector<64x160xf32>
    %88 = vector.extract_strided_slice %77 {offsets = [0, 0, 10], sizes = [8, 8, 80], strides = [1, 1, 1]} : vector<8x12x120xf32> to vector<8x8x80xf32>
    %89 = vector.shape_cast %88 : vector<8x8x80xf32> to vector<64x80xf32>
    %c1_28 = arith.constant 1 : index
    %c0_29 = arith.constant 0 : index
    %c0_30 = arith.constant 0 : index
    %90 = vector.load %arg4[%c1_28, %c0_29, %c0_30] : memref<25x80x160xf32, #tpu.memory_space<vmem>>, vector<1x80x160xf32>
    %91 = vector.shape_cast %90 : vector<1x80x160xf32> to vector<80x160xf32>
    %cst_31 = arith.constant dense<0.000000e+00> : vector<64x160xf32>
    %92 = tpu.matmul %89, %91, %cst_31 {dimension_numbers = #tpu.dot_dimension_numbers<[1], [0], [0], [1], [0, 0, 1, 1], [], []>} : vector<64x80xf32>, vector<80x160xf32>, vector<64x160xf32> -> vector<64x160xf32>
    %93 = arith.addf %87, %92 : vector<64x160xf32>
    %94 = vector.extract_strided_slice %77 {offsets = [0, 0, 20], sizes = [8, 8, 80], strides = [1, 1, 1]} : vector<8x12x120xf32> to vector<8x8x80xf32>
    %95 = vector.shape_cast %94 : vector<8x8x80xf32> to vector<64x80xf32>
    %c2_32 = arith.constant 2 : index
    %c0_33 = arith.constant 0 : index
    %c0_34 = arith.constant 0 : index
    %96 = vector.load %arg4[%c2_32, %c0_33, %c0_34] : memref<25x80x160xf32, #tpu.memory_space<vmem>>, vector<1x80x160xf32>
    %97 = vector.shape_cast %96 : vector<1x80x160xf32> to vector<80x160xf32>
    %cst_35 = arith.constant dense<0.000000e+00> : vector<64x160xf32>
    %98 = tpu.matmul %95, %97, %cst_35 {dimension_numbers = #tpu.dot_dimension_numbers<[1], [0], [0], [1], [0, 0, 1, 1], [], []>} : vector<64x80xf32>, vector<80x160xf32>, vector<64x160xf32> -> vector<64x160xf32>
    %99 = arith.addf %93, %98 : vector<64x160xf32>
    %100 = vector.extract_strided_slice %77 {offsets = [0, 0, 30], sizes = [8, 8, 80], strides = [1, 1, 1]} : vector<8x12x120xf32> to vector<8x8x80xf32>
    %101 = vector.shape_cast %100 : vector<8x8x80xf32> to vector<64x80xf32>
    %c3_36 = arith.constant 3 : index
    %c0_37 = arith.constant 0 : index
    %c0_38 = arith.constant 0 : index
    %102 = vector.load %arg4[%c3_36, %c0_37, %c0_38] : memref<25x80x160xf32, #tpu.memory_space<vmem>>, vector<1x80x160xf32>
    %103 = vector.shape_cast %102 : vector<1x80x160xf32> to vector<80x160xf32>
    %cst_39 = arith.constant dense<0.000000e+00> : vector<64x160xf32>
    %104 = tpu.matmul %101, %103, %cst_39 {dimension_numbers = #tpu.dot_dimension_numbers<[1], [0], [0], [1], [0, 0, 1, 1], [], []>} : vector<64x80xf32>, vector<80x160xf32>, vector<64x160xf32> -> vector<64x160xf32>
    %105 = arith.addf %99, %104 : vector<64x160xf32>
    %106 = vector.extract_strided_slice %77 {offsets = [0, 0, 40], sizes = [8, 8, 80], strides = [1, 1, 1]} : vector<8x12x120xf32> to vector<8x8x80xf32>
    %107 = vector.shape_cast %106 : vector<8x8x80xf32> to vector<64x80xf32>
    %c4_40 = arith.constant 4 : index
    %c0_41 = arith.constant 0 : index
    %c0_42 = arith.constant 0 : index
    %108 = vector.load %arg4[%c4_40, %c0_41, %c0_42] : memref<25x80x160xf32, #tpu.memory_space<vmem>>, vector<1x80x160xf32>
    %109 = vector.shape_cast %108 : vector<1x80x160xf32> to vector<80x160xf32>
    %cst_43 = arith.constant dense<0.000000e+00> : vector<64x160xf32>
    %110 = tpu.matmul %107, %109, %cst_43 {dimension_numbers = #tpu.dot_dimension_numbers<[1], [0], [0], [1], [0, 0, 1, 1], [], []>} : vector<64x80xf32>, vector<80x160xf32>, vector<64x160xf32> -> vector<64x160xf32>
    %111 = arith.addf %105, %110 : vector<64x160xf32>
    %112 = vector.extract_strided_slice %77 {offsets = [0, 1, 0], sizes = [8, 8, 80], strides = [1, 1, 1]} : vector<8x12x120xf32> to vector<8x8x80xf32>
    %113 = vector.shape_cast %112 : vector<8x8x80xf32> to vector<64x80xf32>
    %c5 = arith.constant 5 : index
    %c0_44 = arith.constant 0 : index
    %c0_45 = arith.constant 0 : index
    %114 = vector.load %arg4[%c5, %c0_44, %c0_45] : memref<25x80x160xf32, #tpu.memory_space<vmem>>, vector<1x80x160xf32>
    %115 = vector.shape_cast %114 : vector<1x80x160xf32> to vector<80x160xf32>
    %cst_46 = arith.constant dense<0.000000e+00> : vector<64x160xf32>
    %116 = tpu.matmul %113, %115, %cst_46 {dimension_numbers = #tpu.dot_dimension_numbers<[1], [0], [0], [1], [0, 0, 1, 1], [], []>} : vector<64x80xf32>, vector<80x160xf32>, vector<64x160xf32> -> vector<64x160xf32>
    %117 = arith.addf %111, %116 : vector<64x160xf32>
    %118 = vector.extract_strided_slice %77 {offsets = [0, 1, 10], sizes = [8, 8, 80], strides = [1, 1, 1]} : vector<8x12x120xf32> to vector<8x8x80xf32>
    %119 = vector.shape_cast %118 : vector<8x8x80xf32> to vector<64x80xf32>
    %c6 = arith.constant 6 : index
    %c0_47 = arith.constant 0 : index
    %c0_48 = arith.constant 0 : index
    %120 = vector.load %arg4[%c6, %c0_47, %c0_48] : memref<25x80x160xf32, #tpu.memory_space<vmem>>, vector<1x80x160xf32>
    %121 = vector.shape_cast %120 : vector<1x80x160xf32> to vector<80x160xf32>
    %cst_49 = arith.constant dense<0.000000e+00> : vector<64x160xf32>
    %122 = tpu.matmul %119, %121, %cst_49 {dimension_numbers = #tpu.dot_dimension_numbers<[1], [0], [0], [1], [0, 0, 1, 1], [], []>} : vector<64x80xf32>, vector<80x160xf32>, vector<64x160xf32> -> vector<64x160xf32>
    %123 = arith.addf %117, %122 : vector<64x160xf32>
    %124 = vector.extract_strided_slice %77 {offsets = [0, 1, 20], sizes = [8, 8, 80], strides = [1, 1, 1]} : vector<8x12x120xf32> to vector<8x8x80xf32>
    %125 = vector.shape_cast %124 : vector<8x8x80xf32> to vector<64x80xf32>
    %c7 = arith.constant 7 : index
    %c0_50 = arith.constant 0 : index
    %c0_51 = arith.constant 0 : index
    %126 = vector.load %arg4[%c7, %c0_50, %c0_51] : memref<25x80x160xf32, #tpu.memory_space<vmem>>, vector<1x80x160xf32>
    %127 = vector.shape_cast %126 : vector<1x80x160xf32> to vector<80x160xf32>
    %cst_52 = arith.constant dense<0.000000e+00> : vector<64x160xf32>
    %128 = tpu.matmul %125, %127, %cst_52 {dimension_numbers = #tpu.dot_dimension_numbers<[1], [0], [0], [1], [0, 0, 1, 1], [], []>} : vector<64x80xf32>, vector<80x160xf32>, vector<64x160xf32> -> vector<64x160xf32>
    %129 = arith.addf %123, %128 : vector<64x160xf32>
    %130 = vector.extract_strided_slice %77 {offsets = [0, 1, 30], sizes = [8, 8, 80], strides = [1, 1, 1]} : vector<8x12x120xf32> to vector<8x8x80xf32>
    %131 = vector.shape_cast %130 : vector<8x8x80xf32> to vector<64x80xf32>
    %c8 = arith.constant 8 : index
    %c0_53 = arith.constant 0 : index
    %c0_54 = arith.constant 0 : index
    %132 = vector.load %arg4[%c8, %c0_53, %c0_54] : memref<25x80x160xf32, #tpu.memory_space<vmem>>, vector<1x80x160xf32>
    %133 = vector.shape_cast %132 : vector<1x80x160xf32> to vector<80x160xf32>
    %cst_55 = arith.constant dense<0.000000e+00> : vector<64x160xf32>
    %134 = tpu.matmul %131, %133, %cst_55 {dimension_numbers = #tpu.dot_dimension_numbers<[1], [0], [0], [1], [0, 0, 1, 1], [], []>} : vector<64x80xf32>, vector<80x160xf32>, vector<64x160xf32> -> vector<64x160xf32>
    %135 = arith.addf %129, %134 : vector<64x160xf32>
    %136 = vector.extract_strided_slice %77 {offsets = [0, 1, 40], sizes = [8, 8, 80], strides = [1, 1, 1]} : vector<8x12x120xf32> to vector<8x8x80xf32>
    %137 = vector.shape_cast %136 : vector<8x8x80xf32> to vector<64x80xf32>
    %c9 = arith.constant 9 : index
    %c0_56 = arith.constant 0 : index
    %c0_57 = arith.constant 0 : index
    %138 = vector.load %arg4[%c9, %c0_56, %c0_57] : memref<25x80x160xf32, #tpu.memory_space<vmem>>, vector<1x80x160xf32>
    %139 = vector.shape_cast %138 : vector<1x80x160xf32> to vector<80x160xf32>
    %cst_58 = arith.constant dense<0.000000e+00> : vector<64x160xf32>
    %140 = tpu.matmul %137, %139, %cst_58 {dimension_numbers = #tpu.dot_dimension_numbers<[1], [0], [0], [1], [0, 0, 1, 1], [], []>} : vector<64x80xf32>, vector<80x160xf32>, vector<64x160xf32> -> vector<64x160xf32>
    %141 = arith.addf %135, %140 : vector<64x160xf32>
    %142 = vector.extract_strided_slice %77 {offsets = [0, 2, 0], sizes = [8, 8, 80], strides = [1, 1, 1]} : vector<8x12x120xf32> to vector<8x8x80xf32>
    %143 = vector.shape_cast %142 : vector<8x8x80xf32> to vector<64x80xf32>
    %c10 = arith.constant 10 : index
    %c0_59 = arith.constant 0 : index
    %c0_60 = arith.constant 0 : index
    %144 = vector.load %arg4[%c10, %c0_59, %c0_60] : memref<25x80x160xf32, #tpu.memory_space<vmem>>, vector<1x80x160xf32>
    %145 = vector.shape_cast %144 : vector<1x80x160xf32> to vector<80x160xf32>
    %cst_61 = arith.constant dense<0.000000e+00> : vector<64x160xf32>
    %146 = tpu.matmul %143, %145, %cst_61 {dimension_numbers = #tpu.dot_dimension_numbers<[1], [0], [0], [1], [0, 0, 1, 1], [], []>} : vector<64x80xf32>, vector<80x160xf32>, vector<64x160xf32> -> vector<64x160xf32>
    %147 = arith.addf %141, %146 : vector<64x160xf32>
    %148 = vector.extract_strided_slice %77 {offsets = [0, 2, 10], sizes = [8, 8, 80], strides = [1, 1, 1]} : vector<8x12x120xf32> to vector<8x8x80xf32>
    %149 = vector.shape_cast %148 : vector<8x8x80xf32> to vector<64x80xf32>
    %c11 = arith.constant 11 : index
    %c0_62 = arith.constant 0 : index
    %c0_63 = arith.constant 0 : index
    %150 = vector.load %arg4[%c11, %c0_62, %c0_63] : memref<25x80x160xf32, #tpu.memory_space<vmem>>, vector<1x80x160xf32>
    %151 = vector.shape_cast %150 : vector<1x80x160xf32> to vector<80x160xf32>
    %cst_64 = arith.constant dense<0.000000e+00> : vector<64x160xf32>
    %152 = tpu.matmul %149, %151, %cst_64 {dimension_numbers = #tpu.dot_dimension_numbers<[1], [0], [0], [1], [0, 0, 1, 1], [], []>} : vector<64x80xf32>, vector<80x160xf32>, vector<64x160xf32> -> vector<64x160xf32>
    %153 = arith.addf %147, %152 : vector<64x160xf32>
    %154 = vector.extract_strided_slice %77 {offsets = [0, 2, 20], sizes = [8, 8, 80], strides = [1, 1, 1]} : vector<8x12x120xf32> to vector<8x8x80xf32>
    %155 = vector.shape_cast %154 : vector<8x8x80xf32> to vector<64x80xf32>
    %c12 = arith.constant 12 : index
    %c0_65 = arith.constant 0 : index
    %c0_66 = arith.constant 0 : index
    %156 = vector.load %arg4[%c12, %c0_65, %c0_66] : memref<25x80x160xf32, #tpu.memory_space<vmem>>, vector<1x80x160xf32>
    %157 = vector.shape_cast %156 : vector<1x80x160xf32> to vector<80x160xf32>
    %cst_67 = arith.constant dense<0.000000e+00> : vector<64x160xf32>
    %158 = tpu.matmul %155, %157, %cst_67 {dimension_numbers = #tpu.dot_dimension_numbers<[1], [0], [0], [1], [0, 0, 1, 1], [], []>} : vector<64x80xf32>, vector<80x160xf32>, vector<64x160xf32> -> vector<64x160xf32>
    %159 = arith.addf %153, %158 : vector<64x160xf32>
    %160 = vector.extract_strided_slice %77 {offsets = [0, 2, 30], sizes = [8, 8, 80], strides = [1, 1, 1]} : vector<8x12x120xf32> to vector<8x8x80xf32>
    %161 = vector.shape_cast %160 : vector<8x8x80xf32> to vector<64x80xf32>
    %c13 = arith.constant 13 : index
    %c0_68 = arith.constant 0 : index
    %c0_69 = arith.constant 0 : index
    %162 = vector.load %arg4[%c13, %c0_68, %c0_69] : memref<25x80x160xf32, #tpu.memory_space<vmem>>, vector<1x80x160xf32>
    %163 = vector.shape_cast %162 : vector<1x80x160xf32> to vector<80x160xf32>
    %cst_70 = arith.constant dense<0.000000e+00> : vector<64x160xf32>
    %164 = tpu.matmul %161, %163, %cst_70 {dimension_numbers = #tpu.dot_dimension_numbers<[1], [0], [0], [1], [0, 0, 1, 1], [], []>} : vector<64x80xf32>, vector<80x160xf32>, vector<64x160xf32> -> vector<64x160xf32>
    %165 = arith.addf %159, %164 : vector<64x160xf32>
    %166 = vector.extract_strided_slice %77 {offsets = [0, 2, 40], sizes = [8, 8, 80], strides = [1, 1, 1]} : vector<8x12x120xf32> to vector<8x8x80xf32>
    %167 = vector.shape_cast %166 : vector<8x8x80xf32> to vector<64x80xf32>
    %c14 = arith.constant 14 : index
    %c0_71 = arith.constant 0 : index
    %c0_72 = arith.constant 0 : index
    %168 = vector.load %arg4[%c14, %c0_71, %c0_72] : memref<25x80x160xf32, #tpu.memory_space<vmem>>, vector<1x80x160xf32>
    %169 = vector.shape_cast %168 : vector<1x80x160xf32> to vector<80x160xf32>
    %cst_73 = arith.constant dense<0.000000e+00> : vector<64x160xf32>
    %170 = tpu.matmul %167, %169, %cst_73 {dimension_numbers = #tpu.dot_dimension_numbers<[1], [0], [0], [1], [0, 0, 1, 1], [], []>} : vector<64x80xf32>, vector<80x160xf32>, vector<64x160xf32> -> vector<64x160xf32>
    %171 = arith.addf %165, %170 : vector<64x160xf32>
    %172 = vector.extract_strided_slice %77 {offsets = [0, 3, 0], sizes = [8, 8, 80], strides = [1, 1, 1]} : vector<8x12x120xf32> to vector<8x8x80xf32>
    %173 = vector.shape_cast %172 : vector<8x8x80xf32> to vector<64x80xf32>
    %c15 = arith.constant 15 : index
    %c0_74 = arith.constant 0 : index
    %c0_75 = arith.constant 0 : index
    %174 = vector.load %arg4[%c15, %c0_74, %c0_75] : memref<25x80x160xf32, #tpu.memory_space<vmem>>, vector<1x80x160xf32>
    %175 = vector.shape_cast %174 : vector<1x80x160xf32> to vector<80x160xf32>
    %cst_76 = arith.constant dense<0.000000e+00> : vector<64x160xf32>
    %176 = tpu.matmul %173, %175, %cst_76 {dimension_numbers = #tpu.dot_dimension_numbers<[1], [0], [0], [1], [0, 0, 1, 1], [], []>} : vector<64x80xf32>, vector<80x160xf32>, vector<64x160xf32> -> vector<64x160xf32>
    %177 = arith.addf %171, %176 : vector<64x160xf32>
    %178 = vector.extract_strided_slice %77 {offsets = [0, 3, 10], sizes = [8, 8, 80], strides = [1, 1, 1]} : vector<8x12x120xf32> to vector<8x8x80xf32>
    %179 = vector.shape_cast %178 : vector<8x8x80xf32> to vector<64x80xf32>
    %c16 = arith.constant 16 : index
    %c0_77 = arith.constant 0 : index
    %c0_78 = arith.constant 0 : index
    %180 = vector.load %arg4[%c16, %c0_77, %c0_78] : memref<25x80x160xf32, #tpu.memory_space<vmem>>, vector<1x80x160xf32>
    %181 = vector.shape_cast %180 : vector<1x80x160xf32> to vector<80x160xf32>
    %cst_79 = arith.constant dense<0.000000e+00> : vector<64x160xf32>
    %182 = tpu.matmul %179, %181, %cst_79 {dimension_numbers = #tpu.dot_dimension_numbers<[1], [0], [0], [1], [0, 0, 1, 1], [], []>} : vector<64x80xf32>, vector<80x160xf32>, vector<64x160xf32> -> vector<64x160xf32>
    %183 = arith.addf %177, %182 : vector<64x160xf32>
    %184 = vector.extract_strided_slice %77 {offsets = [0, 3, 20], sizes = [8, 8, 80], strides = [1, 1, 1]} : vector<8x12x120xf32> to vector<8x8x80xf32>
    %185 = vector.shape_cast %184 : vector<8x8x80xf32> to vector<64x80xf32>
    %c17 = arith.constant 17 : index
    %c0_80 = arith.constant 0 : index
    %c0_81 = arith.constant 0 : index
    %186 = vector.load %arg4[%c17, %c0_80, %c0_81] : memref<25x80x160xf32, #tpu.memory_space<vmem>>, vector<1x80x160xf32>
    %187 = vector.shape_cast %186 : vector<1x80x160xf32> to vector<80x160xf32>
    %cst_82 = arith.constant dense<0.000000e+00> : vector<64x160xf32>
    %188 = tpu.matmul %185, %187, %cst_82 {dimension_numbers = #tpu.dot_dimension_numbers<[1], [0], [0], [1], [0, 0, 1, 1], [], []>} : vector<64x80xf32>, vector<80x160xf32>, vector<64x160xf32> -> vector<64x160xf32>
    %189 = arith.addf %183, %188 : vector<64x160xf32>
    %190 = vector.extract_strided_slice %77 {offsets = [0, 3, 30], sizes = [8, 8, 80], strides = [1, 1, 1]} : vector<8x12x120xf32> to vector<8x8x80xf32>
    %191 = vector.shape_cast %190 : vector<8x8x80xf32> to vector<64x80xf32>
    %c18 = arith.constant 18 : index
    %c0_83 = arith.constant 0 : index
    %c0_84 = arith.constant 0 : index
    %192 = vector.load %arg4[%c18, %c0_83, %c0_84] : memref<25x80x160xf32, #tpu.memory_space<vmem>>, vector<1x80x160xf32>
    %193 = vector.shape_cast %192 : vector<1x80x160xf32> to vector<80x160xf32>
    %cst_85 = arith.constant dense<0.000000e+00> : vector<64x160xf32>
    %194 = tpu.matmul %191, %193, %cst_85 {dimension_numbers = #tpu.dot_dimension_numbers<[1], [0], [0], [1], [0, 0, 1, 1], [], []>} : vector<64x80xf32>, vector<80x160xf32>, vector<64x160xf32> -> vector<64x160xf32>
    %195 = arith.addf %189, %194 : vector<64x160xf32>
    %196 = vector.extract_strided_slice %77 {offsets = [0, 3, 40], sizes = [8, 8, 80], strides = [1, 1, 1]} : vector<8x12x120xf32> to vector<8x8x80xf32>
    %197 = vector.shape_cast %196 : vector<8x8x80xf32> to vector<64x80xf32>
    %c19 = arith.constant 19 : index
    %c0_86 = arith.constant 0 : index
    %c0_87 = arith.constant 0 : index
    %198 = vector.load %arg4[%c19, %c0_86, %c0_87] : memref<25x80x160xf32, #tpu.memory_space<vmem>>, vector<1x80x160xf32>
    %199 = vector.shape_cast %198 : vector<1x80x160xf32> to vector<80x160xf32>
    %cst_88 = arith.constant dense<0.000000e+00> : vector<64x160xf32>
    %200 = tpu.matmul %197, %199, %cst_88 {dimension_numbers = #tpu.dot_dimension_numbers<[1], [0], [0], [1], [0, 0, 1, 1], [], []>} : vector<64x80xf32>, vector<80x160xf32>, vector<64x160xf32> -> vector<64x160xf32>
    %201 = arith.addf %195, %200 : vector<64x160xf32>
    %202 = vector.extract_strided_slice %77 {offsets = [0, 4, 0], sizes = [8, 8, 80], strides = [1, 1, 1]} : vector<8x12x120xf32> to vector<8x8x80xf32>
    %203 = vector.shape_cast %202 : vector<8x8x80xf32> to vector<64x80xf32>
    %c20 = arith.constant 20 : index
    %c0_89 = arith.constant 0 : index
    %c0_90 = arith.constant 0 : index
    %204 = vector.load %arg4[%c20, %c0_89, %c0_90] : memref<25x80x160xf32, #tpu.memory_space<vmem>>, vector<1x80x160xf32>
    %205 = vector.shape_cast %204 : vector<1x80x160xf32> to vector<80x160xf32>
    %cst_91 = arith.constant dense<0.000000e+00> : vector<64x160xf32>
    %206 = tpu.matmul %203, %205, %cst_91 {dimension_numbers = #tpu.dot_dimension_numbers<[1], [0], [0], [1], [0, 0, 1, 1], [], []>} : vector<64x80xf32>, vector<80x160xf32>, vector<64x160xf32> -> vector<64x160xf32>
    %207 = arith.addf %201, %206 : vector<64x160xf32>
    %208 = vector.extract_strided_slice %77 {offsets = [0, 4, 10], sizes = [8, 8, 80], strides = [1, 1, 1]} : vector<8x12x120xf32> to vector<8x8x80xf32>
    %209 = vector.shape_cast %208 : vector<8x8x80xf32> to vector<64x80xf32>
    %c21 = arith.constant 21 : index
    %c0_92 = arith.constant 0 : index
    %c0_93 = arith.constant 0 : index
    %210 = vector.load %arg4[%c21, %c0_92, %c0_93] : memref<25x80x160xf32, #tpu.memory_space<vmem>>, vector<1x80x160xf32>
    %211 = vector.shape_cast %210 : vector<1x80x160xf32> to vector<80x160xf32>
    %cst_94 = arith.constant dense<0.000000e+00> : vector<64x160xf32>
    %212 = tpu.matmul %209, %211, %cst_94 {dimension_numbers = #tpu.dot_dimension_numbers<[1], [0], [0], [1], [0, 0, 1, 1], [], []>} : vector<64x80xf32>, vector<80x160xf32>, vector<64x160xf32> -> vector<64x160xf32>
    %213 = arith.addf %207, %212 : vector<64x160xf32>
    %214 = vector.extract_strided_slice %77 {offsets = [0, 4, 20], sizes = [8, 8, 80], strides = [1, 1, 1]} : vector<8x12x120xf32> to vector<8x8x80xf32>
    %215 = vector.shape_cast %214 : vector<8x8x80xf32> to vector<64x80xf32>
    %c22 = arith.constant 22 : index
    %c0_95 = arith.constant 0 : index
    %c0_96 = arith.constant 0 : index
    %216 = vector.load %arg4[%c22, %c0_95, %c0_96] : memref<25x80x160xf32, #tpu.memory_space<vmem>>, vector<1x80x160xf32>
    %217 = vector.shape_cast %216 : vector<1x80x160xf32> to vector<80x160xf32>
    %cst_97 = arith.constant dense<0.000000e+00> : vector<64x160xf32>
    %218 = tpu.matmul %215, %217, %cst_97 {dimension_numbers = #tpu.dot_dimension_numbers<[1], [0], [0], [1], [0, 0, 1, 1], [], []>} : vector<64x80xf32>, vector<80x160xf32>, vector<64x160xf32> -> vector<64x160xf32>
    %219 = arith.addf %213, %218 : vector<64x160xf32>
    %220 = vector.extract_strided_slice %77 {offsets = [0, 4, 30], sizes = [8, 8, 80], strides = [1, 1, 1]} : vector<8x12x120xf32> to vector<8x8x80xf32>
    %221 = vector.shape_cast %220 : vector<8x8x80xf32> to vector<64x80xf32>
    %c23 = arith.constant 23 : index
    %c0_98 = arith.constant 0 : index
    %c0_99 = arith.constant 0 : index
    %222 = vector.load %arg4[%c23, %c0_98, %c0_99] : memref<25x80x160xf32, #tpu.memory_space<vmem>>, vector<1x80x160xf32>
    %223 = vector.shape_cast %222 : vector<1x80x160xf32> to vector<80x160xf32>
    %cst_100 = arith.constant dense<0.000000e+00> : vector<64x160xf32>
    %224 = tpu.matmul %221, %223, %cst_100 {dimension_numbers = #tpu.dot_dimension_numbers<[1], [0], [0], [1], [0, 0, 1, 1], [], []>} : vector<64x80xf32>, vector<80x160xf32>, vector<64x160xf32> -> vector<64x160xf32>
    %225 = arith.addf %219, %224 : vector<64x160xf32>
    %226 = vector.extract_strided_slice %77 {offsets = [0, 4, 40], sizes = [8, 8, 80], strides = [1, 1, 1]} : vector<8x12x120xf32> to vector<8x8x80xf32>
    %227 = vector.shape_cast %226 : vector<8x8x80xf32> to vector<64x80xf32>
    %c24 = arith.constant 24 : index
    %c0_101 = arith.constant 0 : index
    %c0_102 = arith.constant 0 : index
    %228 = vector.load %arg4[%c24, %c0_101, %c0_102] : memref<25x80x160xf32, #tpu.memory_space<vmem>>, vector<1x80x160xf32>
    %229 = vector.shape_cast %228 : vector<1x80x160xf32> to vector<80x160xf32>
    %cst_103 = arith.constant dense<0.000000e+00> : vector<64x160xf32>
    %230 = tpu.matmul %227, %229, %cst_103 {dimension_numbers = #tpu.dot_dimension_numbers<[1], [0], [0], [1], [0, 0, 1, 1], [], []>} : vector<64x80xf32>, vector<80x160xf32>, vector<64x160xf32> -> vector<64x160xf32>
    %231 = arith.addf %225, %230 : vector<64x160xf32>
    %232 = vector.extract_strided_slice %231 {offsets = [0, 0], sizes = [64, 80], strides = [1, 1]} : vector<64x160xf32> to vector<64x80xf32>
    %233 = vector.extract_strided_slice %231 {offsets = [0, 80], sizes = [64, 80], strides = [1, 1]} : vector<64x160xf32> to vector<64x80xf32>
    %234 = arith.maximumf %232, %233 : vector<64x80xf32>
    %235 = vector.shape_cast %234 : vector<64x80xf32> to vector<8x8x80xf32>
    %236 = vector.extract_strided_slice %235 {offsets = [0, 0, 0], sizes = [8, 1, 80], strides = [1, 1, 1]} : vector<8x8x80xf32> to vector<8x1x80xf32>
    %237 = vector.extract_strided_slice %235 {offsets = [0, 1, 0], sizes = [8, 1, 80], strides = [1, 1, 1]} : vector<8x8x80xf32> to vector<8x1x80xf32>
    %238 = arith.maximumf %236, %237 : vector<8x1x80xf32>
    %239 = vector.extract_strided_slice %235 {offsets = [0, 2, 0], sizes = [8, 1, 80], strides = [1, 1, 1]} : vector<8x8x80xf32> to vector<8x1x80xf32>
    %240 = vector.extract_strided_slice %235 {offsets = [0, 3, 0], sizes = [8, 1, 80], strides = [1, 1, 1]} : vector<8x8x80xf32> to vector<8x1x80xf32>
    %241 = arith.maximumf %239, %240 : vector<8x1x80xf32>
    %242 = vector.extract_strided_slice %235 {offsets = [0, 4, 0], sizes = [8, 1, 80], strides = [1, 1, 1]} : vector<8x8x80xf32> to vector<8x1x80xf32>
    %243 = vector.extract_strided_slice %235 {offsets = [0, 5, 0], sizes = [8, 1, 80], strides = [1, 1, 1]} : vector<8x8x80xf32> to vector<8x1x80xf32>
    %244 = arith.maximumf %242, %243 : vector<8x1x80xf32>
    %245 = vector.extract_strided_slice %235 {offsets = [0, 6, 0], sizes = [8, 1, 80], strides = [1, 1, 1]} : vector<8x8x80xf32> to vector<8x1x80xf32>
    %246 = vector.extract_strided_slice %235 {offsets = [0, 7, 0], sizes = [8, 1, 80], strides = [1, 1, 1]} : vector<8x8x80xf32> to vector<8x1x80xf32>
    %247 = arith.maximumf %245, %246 : vector<8x1x80xf32>
    %248 = tpu.concatenate %238, %241, %244, %247 in 1 : vector<8x1x80xf32>, vector<8x1x80xf32>, vector<8x1x80xf32>, vector<8x1x80xf32> -> vector<8x4x80xf32>
    %cst_104 = arith.constant 0.000000e+00 : f32
    %249 = vector.broadcast %cst_104 : f32 to vector<8x4x80xf32>
    %250 = arith.maximumf %248, %249 : vector<8x4x80xf32>
    %c0_105 = arith.constant 0 : index
    %c0_106 = arith.constant 0 : index
    %c0_107 = arith.constant 0 : index
    %251 = vector.load %arg6[%c0_105, %c0_106, %c0_107] : memref<8x4x80xf32, #tpu.memory_space<vmem>>, vector<8x4x80xf32>
    tpu.vector_store %arg6[%c0_105, %c0_106, %c0_107], %250 {strides = array<i32>} : memref<8x4x80xf32, #tpu.memory_space<vmem>>, vector<8x4x80xf32>,
    return
  }
  func.func @transform_0(%arg0: i32) -> (i32, i32, i32) {
    %c0_i32 = arith.constant 0 : i32
    %c0_i32_0 = arith.constant 0 : i32
    %c0_i32_1 = arith.constant 0 : i32
    return %arg0, %c0_i32, %c0_i32_0 : i32, i32, i32
  }
  func.func @transform_1(%arg0: i32) -> (i32, i32, i32) {
    %c0_i32 = arith.constant 0 : i32
    %c0_i32_0 = arith.constant 0 : i32
    %c0_i32_1 = arith.constant 0 : i32
    %c0_i32_2 = arith.constant 0 : i32
    return %c0_i32, %c0_i32_0, %c0_i32_1 : i32, i32, i32
  }
  func.func @transform_2(%arg0: i32) -> (i32, i32) {
    %c0_i32 = arith.constant 0 : i32
    %c0_i32_0 = arith.constant 0 : i32
    %c0_i32_1 = arith.constant 0 : i32
    return %c0_i32, %c0_i32_0 : i32, i32
  }
  func.func @transform_3(%arg0: i32) -> (i32, i32, i32) {
    %c0_i32 = arith.constant 0 : i32
    %c0_i32_0 = arith.constant 0 : i32
    %c0_i32_1 = arith.constant 0 : i32
    %c0_i32_2 = arith.constant 0 : i32
    return %c0_i32, %c0_i32_0, %c0_i32_1 : i32, i32, i32
  }
  func.func @transform_4(%arg0: i32) -> (i32, i32) {
    %c0_i32 = arith.constant 0 : i32
    %c0_i32_0 = arith.constant 0 : i32
    %c0_i32_1 = arith.constant 0 : i32
    return %c0_i32, %c0_i32_0 : i32, i32
  }
  func.func @transform_5(%arg0: i32) -> (i32, i32, i32) {
    %c0_i32 = arith.constant 0 : i32
    %c0_i32_0 = arith.constant 0 : i32
    %c0_i32_1 = arith.constant 0 : i32
    return %arg0, %c0_i32, %c0_i32_0 : i32, i32, i32
  }
}

</mosaic_0001>

<bundles_post_ra>
// kernel: submodel_forward.1
= control target key start
LH: loop header
LB: loop body
LE: loop exit
PB: predicated region body
PF: predicated region fallthrough
CT: control target
= control target key end

     0   :  { %vm147_vm0 = vcmask 1043456   ;;  %v13511_v3 = vmov 0.0   ;;  %vm9375_vm1 = vmmov 1   ;;  %vm419_vm3 = vcmask 1046528   ;;  %s9376_s9 = smov 8   ;;  %s9379_s27 = smov 98   ;;  %s13503_s1 = inlined_call_operand.vmem [shape: f32[5,28,240], index: 1, kind: input, shape index: {}]   ;;  %s13504_s0 = inlined_call_operand.vmem [shape: f32[8,28,28], index: 0, kind: input, shape index: {}]   ;;  %s13505_s3 = inlined_call_operand.vmem [shape: f32[25,80,160], index: 3, kind: input, shape index: {}]   ;;  %s13506_s2 = inlined_call_operand.vmem [shape: f32[1,240], index: 2, kind: input, shape index: {}]   ;;  %s13507_s4 = inlined_call_operand.vmem [shape: f32[1,160], index: 4, kind: input, shape index: {}]   ;;  %s13508_s5 = inlined_call_operand.vmem [shape: f32[8,4,80], index: 5, kind: output, shape index: {}]  }
   0x1   :  { %v67_v0 = vld [vmem:[%s13503_s1 + $0x8] sm:$0xff]  ;;  %v69_v1 = vld [vmem:[%s13503_s1 + $0x18] sm:$0xff]  ;;  %v66_v2 = vld [vmem:[%s13503_s1] sm:$0xff]  ;;  %218 = vmatprep.mubr.f32.mxu0 %v13511_v3  ;;  %3577 = vmatprep.mubr.f32.mxu1 %v13511_v3  ;;  %vm74_vm4 = vcmask 228352   ;;  %vm796_vm5 = vcmask 1045504   ;;  %vm1173_vm6 = vcmask 1044480  }
   0x2   :  { %v8166_v4 = vpack.c.bf16 %v69_v1, %v67_v0  ;;  %v68_v5 = vld [vmem:[%s13503_s1 + $0x10] sm:$0xff]  ;;  %v71_v6 = vld [vmem:[%s13503_s1 + $0x28] sm:$0xff]  ;;  %v73_v7 = vld [vmem:[%s13503_s1 + $0x38] sm:$0xf]  ;;  %vm2070_vm7 = vcmask 64512   ;;  %vm2423_vm8 = vcmask 1040384  }
   0x3   :  { %v8168_v8 = vpack.c.bf16 %v68_v5, %v66_v2  ;;  %v8170_v9 = vpack.c.bf16 %v73_v7, %v71_v6  ;;  %vm9433_vm2 = vmpackc.low %vm147_vm0, %vm9375_vm1  ;;  %v70_v11 = vld [vmem:[%s13503_s1 + $0x20] sm:$0xff]  ;;  %v72_v12 = vld [vmem:[%s13503_s1 + $0x30] sm:$0xf]  ;;  %vm2432_vm9 = vcmask 1041408   ;;  %vm2441_vm10 = vcmask 1042432   ;;  %s9380_s28 = smov 88  }
   0x4   :  { %8167 = vmatprep.subr.bf16.mxu0 %v8166_v4  ;;  %v9446_v13 = vld [vmem:[%s13504_s0] sm:$0xff]  ;;  %v7351_v14 = vld [vmem:[%s13503_s1 + $0x48] sm:$0xff]  ;;  %v7353_v15 = vld [vmem:[%s13503_s1 + $0x58] sm:$0xff]  ;;  %v8173_v16 = vpack.c.bf16 %v72_v12, %v70_v11  ;;  %vm2556_vm11 = vcmask 654336   ;;  %s9381_s23 = smov 48   ;;  %vm7166_vm12 = vcmask 392192  }
   0x5   :  { %8169 = vmatpush1.bf16.msra.mxu0 %v8168_v8  ;;  %v420_v17 = vrot.slane %v9446_v13, 1  ;;  %v8176_v18 = vpack.c.bf16 %v7353_v15, %v7351_v14  ;;  %v7350_v19 = vld [vmem:[%s13503_s1 + $0x40] sm:$0xff]  ;;  %v7352_v20 = vld [vmem:[%s13503_s1 + $0x50] sm:$0xff]  ;;  %v9466_v21 = vld [vmem:[%s13504_s0 + $0x8] sm:$0xff]  ;;  %v797_v48 = vrot.slane %v9446_v13, 2  ;;  %vm7311_vm13 = vcmask 650240  }
   0x6   :  { %8172 = vmatprep.subr.msk.bf16.mxu0 %vm9433_vm2, %v8170_v9  ;;  %v421_v22 = vrot.slane %v9466_v21, 1  ;;  %v8178_v23 = vpack.c.bf16 %v7352_v20, %v7350_v19  ;;  %v7355_v25 = vld [vmem:[%s13503_s1 + $0x68] sm:$0xff]  ;;  %v7357_v26 = vld [vmem:[%s13503_s1 + $0x78] sm:$0xf]  ;;  %v7354_v28 = vld [vmem:[%s13503_s1 + $0x60] sm:$0xff]  ;;  %v798_v49 = vrot.slane %v9466_v21, 2 }
   0x7   :  { %v8180_v27 = vpack.c.bf16 %v7357_v26, %v7355_v25  ;;  %v7356_v29 = vld [vmem:[%s13503_s1 + $0x70] sm:$0xf]  ;;  %v7385_v31 = vld [vmem:[%s13503_s1 + $0x88] sm:$0xff]  ;;  %v7387_v32 = vld [vmem:[%s13503_s1 + $0x98] sm:$0xff] }
   0x8   :  { %v9474_v24 = vsel %vm419_vm3, %v420_v17, %v421_v22  ;;  %v8183_v30 = vpack.c.bf16 %v7356_v29, %v7354_v28  ;;  %v8186_v33 = vpack.c.bf16 %v7387_v32, %v7385_v31  ;;  %v9505_v34 = vld [vmem:[%s13504_s0 + $0x10] sm:$0xff]  ;;  %v9515_v35 = vld [vmem:[%s13504_s0 + $0x20] sm:$0xff]  ;;  %v9523_v36 = vld [vmem:[%s13504_s0 + $0x28] sm:$0xff]  ;;  %v9626_v51 = vsel %vm796_vm5, %v797_v48, %v798_v49 }
   0x9   :  { %8175 = vmatpush1.bf16.msk.msra.mxu0 %vm9433_vm2, %v8173_v16  ;;  %v9531_v37 = vld [vmem:[%s13504_s0 + $0x30] sm:$0xff]  ;;  %v9539_v38 = vld [vmem:[%s13504_s0 + $0x40] sm:$0xff]  ;;  %v9547_v39 = vld [vmem:[%s13504_s0 + $0x48] sm:$0xff]  ;;  %v423_v0 = vrot.slane %v9505_v34, 1  ;;  %v427_v15 = vrot.slane %v9515_v35, 1  ;;  %v428_v16 = vrot.slane %v9523_v36, 1 }
   0xa   :  { %8177 = vmatprep.subr.bf16.mxu0 %v8176_v18  ;;  %v9555_v40 = vld [vmem:[%s13504_s0 + $0x50] sm:$0xff]  ;;  %v9563_v41 = vld [vmem:[%s13504_s0 + $0x60] sm:$0xff]  ;;  %v9571_v42 = vld [vmem:[%s13504_s0 + $0x68] sm:$0xff]  ;;  %v430_v18 = vrot.slane %v9531_v37, 1  ;;  %v435_v25 = vrot.slane %v9547_v39, 1 }
   0xb   :  { %v9579_v43 = vld [vmem:[%s13504_s0 + $0x70] sm:$0xff]  ;;  %v9587_v44 = vld [vmem:[%s13504_s0 + $0x80] sm:$0xff]  ;;  %v9595_v45 = vld [vmem:[%s13504_s0 + $0x88] sm:$0xff]  ;;  %v424_v8 = vsel %vm419_vm3, %v421_v22, %v423_v0  ;;  %v429_v17 = vsel %vm419_vm3, %v427_v15, %v428_v16  ;;  %v441_v32 = vrot.slane %v9563_v41, 1 }
   0xc   :  { %7326 = vmatmul.mubr.msk.f32.vlgmr.msra.gmra.mrb[0].mxu0 %vm74_vm4, %v9446_v13  ;;  %v9603_v46 = vld [vmem:[%s13504_s0 + $0x90] sm:$0xff]  ;;  %v9611_v47 = vld [vmem:[%s13504_s0 + $0xa0] sm:$0xff]  ;;  %v9621_v50 = vld [vmem:[%s13504_s0 + $0xa8] sm:$0xff]  ;;  %v431_v20 = vsel %vm419_vm3, %v428_v16, %v430_v18  ;;  %v1174_v16 = vrot.slane %v9446_v13, 3 }
   0xd   :  { %8179 = vmatpush1.bf16.msra.mxu0 %v8178_v23  ;;  %224 = vmatprep.mubr.f32.mxu0 %v13511_v3  ;;  %v9634_v52 = vld [vmem:[%s13504_s0 + $0xb0] sm:$0xff]  ;;  %v9642_v53 = vld [vmem:[%s13504_s0 + $0xc0] sm:$0xff]  ;;  %v9650_v54 = vld [vmem:[%s13504_s0 + $0xc8] sm:$0xff] }
   0xe   :  { %8182 = vmatprep.subr.msk.bf16.mxu0 %vm9433_vm2, %v8180_v27  ;;  %v9658_v55 = vld [vmem:[%s13504_s0 + $0xd0] sm:$0xff]  ;;  %v9666_v56 = vld [vmem:[%s13504_s0 + $0xe0] sm:$0xff]  ;;  %v9674_v57 = vld [vmem:[%s13504_s0 + $0xe8] sm:$0xff]  ;;  %v437_v27 = vrot.slane %v9555_v40, 1  ;;  %v458_v15 = vrot.slane %v9634_v52, 1 }
   0xf   :  { %v9682_v58 = vld [vmem:[%s13504_s0 + $0xf0] sm:$0xff]  ;;  %v7384_v59 = vld [vmem:[%s13503_s1 + $0x80] sm:$0xff]  ;;  %v7389_v61 = vld [vmem:[%s13503_s1 + $0xa8] sm:$0xff] }
  0x10   :  { %7327 = vmatmul.mubr.msk.f32.gmra.mrb[2].mxu0 %vm74_vm4, %v9466_v21  ;;  %v7386_v60 = vld [vmem:[%s13503_s1 + $0x90] sm:$0xff]  ;;  %v7391_v62 = vld [vmem:[%s13503_s1 + $0xb8] sm:$0xf]  ;;  %v7388_v4 = vld [vmem:[%s13503_s1 + $0xa0] sm:$0xff]  ;;  %v438_v29 = vsel %vm419_vm3, %v435_v25, %v437_v27 }
  0x11   :  { %230 = vmatprep.mubr.f32.mxu0 %v13511_v3  ;;  %8185 = vmatpush1.bf16.msk.msra.mxu0 %vm9433_vm2, %v8183_v30  ;;  %v8188_v63 = vpack.c.bf16 %v7386_v60, %v7384_v59  ;;  %v9703_v1 = vld [vmem:[%s13504_s0 + $0x18] sm:$0xf]  ;;  %v8190_v2 = vpack.c.bf16 %v7391_v62, %v7389_v61  ;;  %v7390_v5 = vld [vmem:[%s13503_s1 + $0xb0] sm:$0xf]  ;;  %v7419_v6 = vld [vmem:[%s13503_s1 + $0xc8] sm:$0xff]  ;;  %v444_v59 = vrot.slane %v9579_v43, 1 }
  0x12   :  { %8187 = vmatprep.subr.bf16.mxu0 %v8186_v33  ;;  %v7421_v7 = vld [vmem:[%s13503_s1 + $0xd8] sm:$0xff]  ;;  %v425_v9 = vrot.slane %v9703_v1, 1  ;;  %v8193_v11 = vpack.c.bf16 %v7390_v5, %v7388_v4  ;;  %v442_v33 = vrot.slane %v9571_v42, 1  ;;  %v451_v5 = vrot.slane %v9603_v46, 1 }
  0x13   :  { %v8196_v12 = vpack.c.bf16 %v7421_v7, %v7419_v6  ;;  %v9740_v19 = vld [vmem:[%s13504_s0 + $0x38] sm:$0xf] }
  0x14   :  { %7328 = vmatmul.mubr.msk.f32.gmra.mrb[4].mxu0 %vm74_vm4, %v9505_v34  ;;  %v426_v14 = vsel %vm419_vm3, %v423_v0, %v425_v9  ;;  %v432_v22 = vrot.slane %v9740_v19, 1  ;;  %v9758_v28 = vld [vmem:[%s13504_s0 + $0x58] sm:$0xf]  ;;  %v443_v48 = vsel %vm419_vm3, %v441_v32, %v442_v33  ;;  %v445_v61 = vsel %vm419_vm3, %v442_v33, %v444_v59 }
  0x15   :  { %236 = vmatprep.mubr.f32.mxu0 %v13511_v3  ;;  %v439_v30 = vrot.slane %v9758_v28, 1  ;;  %v9776_v60 = vld [vmem:[%s13504_s0 + $0x78] sm:$0xf]  ;;  %v448_v0 = vrot.slane %v9587_v44, 1 }
  0x16   :  { %v433_v23 = vsel %vm419_vm3, %v430_v18, %v432_v22  ;;  %v446_v62 = vrot.slane %v9776_v60, 1  ;;  %v9794_v6 = vld [vmem:[%s13504_s0 + $0x98] sm:$0xf] }
  0x17   :  { %v440_v31 = vsel %vm419_vm3, %v437_v27, %v439_v30  ;;  %v9814_v18 = vld [vmem:[%s13504_s0 + $0xb8] sm:$0xf] }
  0x18   :  { %7329 = vmatmul.mubr.msk.f32.gmra.mrb[6].mxu0 %vm74_vm4, %v9515_v35  ;;  %v460_v22 = vrot.slane %v9814_v18, 1  ;;  %v9837_v30 = vld [vmem:[%s13504_s0 + $0xd8] sm:$0xf] }
  0x19   :  { %242 = vmatprep.mubr.f32.mxu0 %v13511_v3  ;;  %v467_v32 = vrot.slane %v9837_v30, 1 }
  0x1c   :  { %7330 = vmatmul.mubr.msk.f32.gmra.mrb[8].mxu0 %vm74_vm4, %v9523_v36 }
  0x1d   :  { %248 = vmatprep.mubr.f32.mxu0 %v13511_v3 }
  0x20   :  { %7331 = vmatmul.mubr.msk.f32.gmra.mrb[10].mxu0 %vm74_vm4, %v9531_v37 }
  0x21   :  { %254 = vmatprep.mubr.f32.mxu0 %v13511_v3 }
  0x24   :  { %7332 = vmatmul.mubr.msk.f32.gmra.mrb[12].mxu0 %vm74_vm4, %v9539_v38 }
  0x25   :  { %260 = vmatprep.mubr.f32.mxu0 %v13511_v3 }
  0x28   :  { %7333 = vmatmul.mubr.msk.f32.gmra.mrb[14].mxu0 %vm74_vm4, %v9547_v39 }
  0x29   :  { %266 = vmatprep.mubr.f32.mxu0 %v13511_v3 }
  0x2c   :  { %7334 = vmatmul.mubr.msk.f32.gmra.mrb[16].mxu0 %vm74_vm4, %v9555_v40 }
  0x2d   :  { %272 = vmatprep.mubr.f32.mxu0 %v13511_v3 }
  0x30   :  { %7335 = vmatmul.mubr.msk.f32.gmra.mrb[18].mxu0 %vm74_vm4, %v9563_v41 }
  0x31   :  { %278 = vmatprep.mubr.f32.mxu0 %v13511_v3 }
  0x34   :  { %7336 = vmatmul.mubr.msk.f32.gmra.mrb[20].mxu0 %vm74_vm4, %v9571_v42 }
  0x35   :  { %284 = vmatprep.mubr.f32.mxu0 %v13511_v3 }
  0x38   :  { %7337 = vmatmul.mubr.msk.f32.gmra.mrb[22].mxu0 %vm74_vm4, %v9579_v43 }
  0x39   :  { %290 = vmatprep.mubr.f32.mxu0 %v13511_v3 }
  0x3c   :  { %7338 = vmatmul.mubr.msk.f32.gmra.mrb[24].mxu0 %vm74_vm4, %v9587_v44 }
  0x3d   :  { %296 = vmatprep.mubr.f32.mxu0 %v13511_v3 }
  0x40   :  { %7339 = vmatmul.mubr.msk.f32.gmra.mrb[26].mxu0 %vm74_vm4, %v9595_v45 }
  0x41   :  { %302 = vmatprep.mubr.f32.mxu0 %v13511_v3 }
  0x44   :  { %7340 = vmatmul.mubr.msk.f32.gmra.mrb[28].mxu0 %vm74_vm4, %v9603_v46 }
  0x45   :  { %308 = vmatprep.mubr.f32.mxu0 %v13511_v3 }
  0x48   :  { %7341 = vmatmul.mubr.msk.f32.gmra.mrb[30].mxu0 %vm74_vm4, %v9611_v47 }
  0x49   :  { %314 = vmatprep.mubr.f32.mxu0 %v13511_v3 }
  0x4c   :  { %7342 = vmatmul.mubr.msk.f32.gmra.mrb[32].mxu0 %vm74_vm4, %v9621_v50 }
  0x4d   :  { %320 = vmatprep.mubr.f32.mxu0 %v13511_v3 }
  0x50   :  { %7343 = vmatmul.mubr.msk.f32.gmra.mrb[34].mxu0 %vm74_vm4, %v9634_v52 }
  0x51   :  { %326 = vmatprep.mubr.f32.mxu0 %v13511_v3 }
  0x54   :  { %7344 = vmatmul.mubr.msk.f32.gmra.mrb[36].mxu0 %vm74_vm4, %v9642_v53 }
  0x55   :  { %332 = vmatprep.mubr.f32.mxu0 %v13511_v3 }
  0x58   :  { %7345 = vmatmul.mubr.msk.f32.gmra.mrb[38].mxu0 %vm74_vm4, %v9650_v54 }
  0x59   :  { %338 = vmatprep.mubr.f32.mxu0 %v13511_v3 }
  0x5c   :  { %7346 = vmatmul.mubr.msk.f32.gmra.mrb[40].mxu0 %vm74_vm4, %v9658_v55 }
  0x5d   :  { %344 = vmatprep.mubr.f32.mxu0 %v13511_v3 }
  0x60   :  { %7347 = vmatmul.mubr.msk.f32.gmra.mrb[42].mxu0 %vm74_vm4, %v9666_v56 }
  0x61   :  { %350 = vmatprep.mubr.f32.mxu0 %v13511_v3 }
  0x64   :  { %7348 = vmatmul.mubr.msk.f32.gmra.mrb[44].mxu0 %vm74_vm4, %v9674_v57 }
  0x65   :  { %356 = vmatprep.mubr.f32.mxu0 %v13511_v3 }
  0x68   :  { %7349 = vmatmul.mubr.msk.f32.gmra.mrb[46].mxu0 %vm74_vm4, %v9682_v58 }
  0x69   :  { %603 = vmatprep.mubr.f32.mxu0 %v13511_v3 }
  0x6c   :  { %7360 = vmatmul.mubr.msk.f32.vlgmr.msra.gmra.mrb[0].mxu0 %vm74_vm4, %v9474_v24  ;;  %v434_v24 = vrot.slane %v9539_v38, 1 }
  0x6d   :  { %8189 = vmatpush1.bf16.msra.mxu0 %v8188_v63  ;;  %609 = vmatprep.mubr.f32.mxu0 %v13511_v3  ;;  %v447_v63 = vsel %vm419_vm3, %v444_v59, %v446_v62  ;;  %v470_v59 = vrot.slane %v9674_v57, 1  ;;  %v472_v62 = vrot.slane %v9682_v58, 1 }
  0x6e   :  { %8192 = vmatprep.subr.msk.bf16.mxu0 %vm9433_vm2, %v8190_v2  ;;  %v436_v26 = vsel %vm419_vm3, %v434_v24, %v435_v25  ;;  %v449_v2 = vrot.slane %v9595_v45, 1  ;;  %v461_v24 = vsel %vm419_vm3, %v458_v15, %v460_v22  ;;  %v462_v25 = vrot.slane %v9642_v53, 1  ;;  %v7455_v22 = vld [vmem:[%s13503_s1 + $0x118] sm:$0xff] }
  0x70   :  { %7361 = vmatmul.mubr.msk.f32.gmra.mrb[2].mxu0 %vm74_vm4, %v424_v8  ;;  %v450_v4 = vsel %vm419_vm3, %v448_v0, %v449_v2  ;;  %v452_v7 = vsel %vm419_vm3, %v449_v2, %v451_v5  ;;  %v453_v8 = vrot.slane %v9794_v6, 1  ;;  %v473_v0 = vsel %vm419_vm3, %v470_v59, %v472_v62 }
  0x71   :  { %615 = vmatprep.mubr.f32.mxu0 %v13511_v3  ;;  %8195 = vmatpush1.bf16.msk.msra.mxu0 %vm9433_vm2, %v8193_v11  ;;  %v455_v11 = vrot.slane %v9611_v47, 1 }
  0x72   :  { %8197 = vmatprep.subr.bf16.mxu0 %v8196_v12  ;;  %v454_v9 = vsel %vm419_vm3, %v451_v5, %v453_v8  ;;  %v456_v12 = vrot.slane %v9621_v50, 1  ;;  %v7418_v5 = vld [vmem:[%s13503_s1 + $0xc0] sm:$0xff]  ;;  %v7423_v8 = vld [vmem:[%s13503_s1 + $0xe8] sm:$0xff] }
  0x74   :  { %7362 = vmatmul.mubr.msk.f32.gmra.mrb[4].mxu0 %vm74_vm4, %v426_v14  ;;  %v457_v14 = vsel %vm419_vm3, %v455_v11, %v456_v12 }
  0x75   :  { %621 = vmatprep.mubr.f32.mxu0 %v13511_v3 }
  0x78   :  { %7363 = vmatmul.mubr.msk.f32.gmra.mrb[6].mxu0 %vm74_vm4, %v429_v17  ;;  %v1175_v17 = vrot.slane %v9466_v21, 3 }
  0x79   :  { %627 = vmatprep.mubr.f32.mxu0 %v13511_v3 }
  0x7c   :  { %7364 = vmatmul.mubr.msk.f32.gmra.mrb[8].mxu0 %vm74_vm4, %v431_v20  ;;  %v459_v20 = vsel %vm419_vm3, %v456_v12, %v458_v15  ;;  %v800_v12 = vrot.slane %v9505_v34, 2  ;;  %v7422_v15 = vld [vmem:[%s13503_s1 + $0xe0] sm:$0xff] }
  0x7d   :  { %633 = vmatprep.mubr.f32.mxu0 %v13511_v3 }
  0x80   :  { %7365 = vmatmul.mubr.msk.f32.gmra.mrb[10].mxu0 %vm74_vm4, %v433_v23  ;;  %v9823_v23 = vsel %vm1173_vm6, %v1174_v16, %v1175_v17  ;;  %v7424_v16 = vld [vmem:[%s13503_s1 + $0xf0] sm:$0xf] }
  0x81   :  { %639 = vmatprep.mubr.f32.mxu0 %v13511_v3 }
  0x84   :  { %7366 = vmatmul.mubr.msk.f32.gmra.mrb[12].mxu0 %vm74_vm4, %v436_v26  ;;  %v463_v26 = vrot.slane %v9650_v54, 1 }
  0x85   :  { %645 = vmatprep.mubr.f32.mxu0 %v13511_v3 }
  0x86   :  { %v464_v27 = vsel %vm419_vm3, %v462_v25, %v463_v26  ;;  %v802_v25 = vrot.slane %v9703_v1, 2 }
  0x88   :  { %7367 = vmatmul.mubr.msk.f32.gmra.mrb[14].mxu0 %vm74_vm4, %v438_v29  ;;  %v465_v29 = vrot.slane %v9658_v55, 1 }
  0x89   :  { %651 = vmatprep.mubr.f32.mxu0 %v13511_v3 }
  0x8a   :  { %v468_v33 = vsel %vm419_vm3, %v465_v29, %v467_v32  ;;  %v807_v32 = vrot.slane %v9531_v37, 2 }
  0x8c   :  { %7368 = vmatmul.mubr.msk.f32.gmra.mrb[16].mxu0 %vm74_vm4, %v440_v31  ;;  %v466_v31 = vsel %vm419_vm3, %v463_v26, %v465_v29  ;;  %v8203_v26 = vpack.c.bf16 %v7424_v16, %v7422_v15  ;;  %v804_v29 = vrot.slane %v9515_v35, 2  ;;  %v823_v15 = vrot.slane %v9776_v60, 2 }
  0x8d   :  { %657 = vmatprep.mubr.f32.mxu0 %v13511_v3 }
  0x90   :  { %7369 = vmatmul.mubr.msk.f32.gmra.mrb[18].mxu0 %vm74_vm4, %v443_v48  ;;  %v469_v48 = vrot.slane %v9666_v56, 1 }
  0x91   :  { %663 = vmatprep.mubr.f32.mxu0 %v13511_v3 }
  0x94   :  { %7370 = vmatmul.mubr.msk.f32.gmra.mrb[20].mxu0 %vm74_vm4, %v445_v61  ;;  %v471_v61 = vsel %vm419_vm3, %v469_v48, %v470_v59  ;;  %v809_v48 = vrot.slane %v9740_v19, 2 }
  0x95   :  { %669 = vmatprep.mubr.f32.mxu0 %v13511_v3 }
  0x96   :  { %v810_v59 = vsel %vm796_vm5, %v807_v32, %v809_v48  ;;  %v835_v48 = vrot.slane %v9634_v52, 2 }
  0x98   :  { %7371 = vmatmul.mubr.msk.f32.gmra.mrb[22].mxu0 %vm74_vm4, %v447_v63  ;;  %v9855_v63 = vld [vmem:[%s13504_s0 + $0xf8] sm:$0xf] }
  0x99   :  { %675 = vmatprep.mubr.f32.mxu0 %v13511_v3  ;;  %v474_v2 = vrot.slane %v9855_v63, 1 }
  0x9c   :  { %7372 = vmatmul.mubr.msk.f32.gmra.mrb[24].mxu0 %vm74_vm4, %v450_v4  ;;  %v475_v4 = vsel %vm419_vm3, %v472_v62, %v474_v2  ;;  %v812_v62 = vrot.slane %v9547_v39, 2  ;;  %v814_v2 = vrot.slane %v9555_v40, 2 }
  0x9d   :  { %681 = vmatprep.mubr.f32.mxu0 %v13511_v3 }
  0xa0   :  { %7373 = vmatmul.mubr.msk.f32.gmra.mrb[26].mxu0 %vm74_vm4, %v452_v7  ;;  %v7420_v7 = vld [vmem:[%s13503_s1 + $0xd0] sm:$0xff] }
  0xa1   :  { %687 = vmatprep.mubr.f32.mxu0 %v13511_v3  ;;  %v8198_v11 = vpack.c.bf16 %v7420_v7, %v7418_v5  ;;  %v816_v5 = vrot.slane %v9758_v28, 2 }
  0xa3   :  { %v817_v7 = vsel %vm796_vm5, %v814_v2, %v816_v5  ;;  %v842_v5 = vrot.slane %v9658_v55, 2 }
  0xa4   :  { %7374 = vmatmul.mubr.msk.f32.gmra.mrb[28].mxu0 %vm74_vm4, %v454_v9  ;;  %v7425_v9 = vld [vmem:[%s13503_s1 + $0xf8] sm:$0xf] }
  0xa5   :  { %693 = vmatprep.mubr.f32.mxu0 %v13511_v3 }
  0xa8   :  { %7375 = vmatmul.mubr.msk.f32.gmra.mrb[30].mxu0 %vm74_vm4, %v457_v14  ;;  %v8200_v14 = vpack.c.bf16 %v7425_v9, %v7423_v8  ;;  %v818_v8 = vrot.slane %v9563_v41, 2  ;;  %v819_v9 = vrot.slane %v9571_v42, 2 }
  0xa9   :  { %699 = vmatprep.mubr.f32.mxu0 %v13511_v3 }
  0xac   :  { %7376 = vmatmul.mubr.msk.f32.gmra.mrb[32].mxu0 %vm74_vm4, %v459_v20  ;;  %v7453_v20 = vld [vmem:[%s13503_s1 + $0x108] sm:$0xff] }
  0xad   :  { %705 = vmatprep.mubr.f32.mxu0 %v13511_v3 }
  0xb0   :  { %7377 = vmatmul.mubr.msk.f32.gmra.mrb[34].mxu0 %vm74_vm4, %v461_v24  ;;  %v801_v24 = vsel %vm796_vm5, %v798_v49, %v800_v12 }
  0xb1   :  { %711 = vmatprep.mubr.f32.mxu0 %v13511_v3 }
  0xb4   :  { %7378 = vmatmul.mubr.msk.f32.gmra.mrb[36].mxu0 %vm74_vm4, %v464_v27  ;;  %v8206_v27 = vpack.c.bf16 %v7455_v22, %v7453_v20  ;;  %v825_v20 = vrot.slane %v9587_v44, 2  ;;  %v826_v22 = vrot.slane %v9595_v45, 2 }
  0xb5   :  { %717 = vmatprep.mubr.f32.mxu0 %v13511_v3 }
  0xb8   :  { %7379 = vmatmul.mubr.msk.f32.gmra.mrb[38].mxu0 %vm74_vm4, %v466_v31  ;;  %v805_v31 = vrot.slane %v9523_v36, 2 }
  0xb9   :  { %723 = vmatprep.mubr.f32.mxu0 %v13511_v3 }
  0xba   :  { %v806_v49 = vsel %vm796_vm5, %v804_v29, %v805_v31  ;;  %v832_v29 = vrot.slane %v9611_v47, 2 }
  0xbc   :  { %7380 = vmatmul.mubr.msk.f32.gmra.mrb[40].mxu0 %vm74_vm4, %v468_v33  ;;  %v808_v33 = vsel %vm796_vm5, %v805_v31, %v807_v32  ;;  %v833_v31 = vrot.slane %v9621_v50, 2  ;;  %v1551_v32 = vrot.slane %v9466_v21, 4 }
  0xbd   :  { %729 = vmatprep.mubr.f32.mxu0 %v13511_v3 }
  0xc0   :  { %7381 = vmatmul.mubr.msk.f32.gmra.mrb[42].mxu0 %vm74_vm4, %v471_v61  ;;  %v811_v61 = vrot.slane %v9539_v38, 2 }
  0xc1   :  { %735 = vmatprep.mubr.f32.mxu0 %v13511_v3 }
  0xc4   :  { %7382 = vmatmul.mubr.msk.f32.gmra.mrb[44].mxu0 %vm74_vm4, %v473_v0  ;;  %v813_v0 = vsel %vm796_vm5, %v811_v61, %v812_v62  ;;  %v837_v61 = vrot.slane %v9814_v18, 2 }
  0xc5   :  { %741 = vmatprep.mubr.f32.mxu0 %v13511_v3 }
  0xc8   :  { %7383 = vmatmul.mubr.msk.f32.gmra.mrb[46].mxu0 %vm74_vm4, %v475_v4  ;;  %v815_v4 = vsel %vm796_vm5, %v812_v62, %v814_v2  ;;  %v838_v62 = vsel %vm796_vm5, %v835_v48, %v837_v61  ;;  %v840_v2 = vrot.slane %v9650_v54, 2 }
  0xc9   :  { %980 = vmatprep.mubr.f32.mxu0 %v13511_v3 }
  0xcc   :  { %7394 = vmatmul.mubr.msk.f32.vlgmr.msra.gmra.mrb[0].mxu0 %vm74_vm4, %v9626_v51  ;;  %v803_v51 = vsel %vm796_vm5, %v800_v12, %v802_v25  ;;  %v821_v12 = vrot.slane %v9579_v43, 2  ;;  %v828_v25 = vrot.slane %v9603_v46, 2 }
  0xcd   :  { %8199 = vmatpush1.bf16.msra.mxu0 %v8198_v11  ;;  %986 = vmatprep.mubr.f32.mxu0 %v13511_v3  ;;  %v820_v11 = vsel %vm796_vm5, %v818_v8, %v819_v9  ;;  %v844_v8 = vrot.slane %v9837_v30, 2 }
  0xce   :  { %8202 = vmatprep.subr.msk.bf16.mxu0 %vm9433_vm2, %v8200_v14  ;;  %v822_v14 = vsel %vm796_vm5, %v819_v9, %v821_v12  ;;  %v824_v16 = vsel %vm796_vm5, %v821_v12, %v823_v15  ;;  %v847_v12 = vrot.slane %v9674_v57, 2  ;;  %v849_v15 = vrot.slane %v9682_v58, 2 }
  0xcf   :  { %v845_v9 = vsel %vm796_vm5, %v842_v5, %v844_v8  ;;  %v1189_v8 = vrot.slane %v9547_v39, 3 }
  0xd0   :  { %7395 = vmatmul.mubr.msk.f32.gmra.mrb[2].mxu0 %vm74_vm4, %v801_v24  ;;  %v827_v24 = vsel %vm796_vm5, %v825_v20, %v826_v22  ;;  %v851_v20 = vrot.slane %v9855_v63, 2 }
  0xd1   :  { %992 = vmatprep.mubr.f32.mxu0 %v13511_v3  ;;  %8205 = vmatpush1.bf16.msk.msra.mxu0 %vm9433_vm2, %v8203_v26  ;;  %v829_v26 = vsel %vm796_vm5, %v826_v22, %v828_v25 }
  0xd2   :  { %8207 = vmatprep.subr.bf16.mxu0 %v8206_v27  ;;  %v830_v27 = vrot.slane %v9794_v6, 2  ;;  %v852_v22 = vsel %vm796_vm5, %v849_v15, %v851_v20  ;;  %v1196_v20 = vrot.slane %v9571_v42, 3 }
  0xd4   :  { %7396 = vmatmul.mubr.msk.f32.gmra.mrb[4].mxu0 %vm74_vm4, %v803_v51  ;;  %v831_v51 = vsel %vm796_vm5, %v828_v25, %v830_v27  ;;  %v7454_v25 = vld [vmem:[%s13503_s1 + $0x110] sm:$0xff]  ;;  %v7459_v27 = vld [vmem:[%s13503_s1 + $0x138] sm:$0xf] }
  0xd5   :  { %998 = vmatprep.mubr.f32.mxu0 %v13511_v3 }
  0xd8   :  { %7397 = vmatmul.mubr.msk.f32.gmra.mrb[6].mxu0 %vm74_vm4, %v806_v49  ;;  %v1550_v49 = vrot.slane %v9446_v13, 4 }
  0xd9   :  { %1004 = vmatprep.mubr.f32.mxu0 %v13511_v3 }
  0xda   :  { %v9972_v13 = vsel %vm147_vm0, %v1550_v49, %v1551_v32  ;;  %v7456_v49 = vld [vmem:[%s13503_s1 + $0x120] sm:$0xff] }
  0xdc   :  { %7398 = vmatmul.mubr.msk.f32.gmra.mrb[8].mxu0 %vm74_vm4, %v808_v33  ;;  %v834_v33 = vsel %vm796_vm5, %v832_v29, %v833_v31  ;;  %v1177_v29 = vrot.slane %v9505_v34, 3 }
  0xdd   :  { %1010 = vmatprep.mubr.f32.mxu0 %v13511_v3 }
  0xe0   :  { %7399 = vmatmul.mubr.msk.f32.gmra.mrb[10].mxu0 %vm74_vm4, %v810_v59  ;;  %v836_v59 = vsel %vm796_vm5, %v833_v31, %v835_v48  ;;  %v1178_v48 = vsel %vm1173_vm6, %v1175_v17, %v1177_v29 }
  0xe1   :  { %1016 = vmatprep.mubr.f32.mxu0 %v13511_v3 }
  0xe4   :  { %7400 = vmatmul.mubr.msk.f32.gmra.mrb[12].mxu0 %vm74_vm4, %v813_v0  ;;  %v839_v0 = vrot.slane %v9642_v53, 2 }
  0xe5   :  { %1022 = vmatprep.mubr.f32.mxu0 %v13511_v3 }
  0xe8   :  { %7401 = vmatmul.mubr.msk.f32.gmra.mrb[14].mxu0 %vm74_vm4, %v815_v4  ;;  %v841_v4 = vsel %vm796_vm5, %v839_v0, %v840_v2  ;;  %v1182_v0 = vrot.slane %v9523_v36, 3 }
  0xe9   :  { %1028 = vmatprep.mubr.f32.mxu0 %v13511_v3 }
  0xec   :  { %7402 = vmatmul.mubr.msk.f32.gmra.mrb[16].mxu0 %vm74_vm4, %v817_v7  ;;  %v843_v7 = vsel %vm796_vm5, %v840_v2, %v842_v5  ;;  %v1184_v2 = vrot.slane %v9531_v37, 3  ;;  %v1186_v5 = vrot.slane %v9740_v19, 3 }
  0xed   :  { %1034 = vmatprep.mubr.f32.mxu0 %v13511_v3 }
  0xee   :  { %v1187_v10 = vsel %vm1173_vm6, %v1184_v2, %v1186_v5  ;;  %v1216_v5 = vrot.slane %v9642_v53, 3 }
  0xf0   :  { %7403 = vmatmul.mubr.msk.f32.gmra.mrb[18].mxu0 %vm74_vm4, %v820_v11  ;;  %v846_v11 = vrot.slane %v9666_v56, 2 }
  0xf1   :  { %1040 = vmatprep.mubr.f32.mxu0 %v13511_v3 }
  0xf4   :  { %7404 = vmatmul.mubr.msk.f32.gmra.mrb[20].mxu0 %vm74_vm4, %v822_v14  ;;  %v848_v14 = vsel %vm796_vm5, %v846_v11, %v847_v12  ;;  %v1191_v11 = vrot.slane %v9555_v40, 3 }
  0xf5   :  { %1046 = vmatprep.mubr.f32.mxu0 %v13511_v3 }
  0xf8   :  { %7405 = vmatmul.mubr.msk.f32.gmra.mrb[22].mxu0 %vm74_vm4, %v824_v16  ;;  %v850_v16 = vsel %vm796_vm5, %v847_v12, %v849_v15  ;;  %v1192_v12 = vsel %vm1173_vm6, %v1189_v8, %v1191_v11 }
  0xf9   :  { %1052 = vmatprep.mubr.f32.mxu0 %v13511_v3 }
  0xfc   :  { %7406 = vmatmul.mubr.msk.f32.gmra.mrb[24].mxu0 %vm74_vm4, %v827_v24  ;;  %v7452_v24 = vld [vmem:[%s13503_s1 + $0x100] sm:$0xff] }
  0xfd   :  { %1058 = vmatprep.mubr.f32.mxu0 %v13511_v3 }
 0x100   :  { %7407 = vmatmul.mubr.msk.f32.gmra.mrb[26].mxu0 %vm74_vm4, %v829_v26  ;;  %v7457_v26 = vld [vmem:[%s13503_s1 + $0x128] sm:$0xff] }
 0x101   :  { %1064 = vmatprep.mubr.f32.mxu0 %v13511_v3  ;;  %v8210_v31 = vpack.c.bf16 %v7459_v27, %v7457_v26  ;;  %v1200_v26 = vrot.slane %v9776_v60, 3 }
 0x104   :  { %7408 = vmatmul.mubr.msk.f32.gmra.mrb[28].mxu0 %vm74_vm4, %v831_v51  ;;  %v8208_v51 = vpack.c.bf16 %v7454_v25, %v7452_v24  ;;  %v1198_v24 = vrot.slane %v9579_v43, 3 }
 0x105   :  { %1070 = vmatprep.mubr.f32.mxu0 %v13511_v3 }
 0x106   :  { %v1199_v25 = vsel %vm1173_vm6, %v1196_v20, %v1198_v24  ;;  %v1201_v27 = vsel %vm1173_vm6, %v1198_v24, %v1200_v26  ;;  %v1228_v24 = vrot.slane %v9855_v63, 3  ;;  %v1553_v26 = vrot.slane %v9505_v34, 4 }
 0x107   :  { %v1558_v34 = vrot.slane %v9523_v36, 4  ;;  %v1564_v36 = vrot.slane %v9539_v38, 4 }
 0x108   :  { %7409 = vmatmul.mubr.msk.f32.gmra.mrb[30].mxu0 %vm74_vm4, %v834_v33  ;;  %v7458_v33 = vld [vmem:[%s13503_s1 + $0x130] sm:$0xf] }
 0x109   :  { %1076 = vmatprep.mubr.f32.mxu0 %v13511_v3  ;;  %v8213_v61 = vpack.c.bf16 %v7458_v33, %v7456_v49  ;;  %v1205_v49 = vrot.slane %v9603_v46, 3 }
 0x10c   :  { %7410 = vmatmul.mubr.msk.f32.gmra.mrb[32].mxu0 %vm74_vm4, %v836_v59  ;;  %v1179_v59 = vrot.slane %v9703_v1, 3 }
 0x10d   :  { %1082 = vmatprep.mubr.f32.mxu0 %v13511_v3 }
 0x110   :  { %7411 = vmatmul.mubr.msk.f32.gmra.mrb[34].mxu0 %vm74_vm4, %v838_v62  ;;  %v1180_v62 = vsel %vm1173_vm6, %v1177_v29, %v1179_v59  ;;  %v1203_v29 = vrot.slane %v9595_v45, 3 }
 0x111   :  { %1088 = vmatprep.mubr.f32.mxu0 %v13511_v3 }
 0x112   :  { %v1206_v33 = vsel %vm1173_vm6, %v1203_v29, %v1205_v49 }
 0x114   :  { %7412 = vmatmul.mubr.msk.f32.gmra.mrb[36].mxu0 %vm74_vm4, %v841_v4  ;;  %v1185_v4 = vsel %vm1173_vm6, %v1182_v0, %v1184_v2  ;;  %v1214_v2 = vrot.slane %v9814_v18, 3 }
 0x115   :  { %1094 = vmatprep.mubr.f32.mxu0 %v13511_v3 }
 0x118   :  { %7413 = vmatmul.mubr.msk.f32.gmra.mrb[38].mxu0 %vm74_vm4, %v843_v7  ;;  %v1188_v7 = vrot.slane %v9539_v38, 3 }
 0x119   :  { %1100 = vmatprep.mubr.f32.mxu0 %v13511_v3 }
 0x11c   :  { %7414 = vmatmul.mubr.msk.f32.gmra.mrb[40].mxu0 %vm74_vm4, %v845_v9  ;;  %v1190_v9 = vsel %vm1173_vm6, %v1188_v7, %v1189_v8  ;;  %v1219_v8 = vrot.slane %v9658_v55, 3 }
 0x11d   :  { %1106 = vmatprep.mubr.f32.mxu0 %v13511_v3 }
 0x120   :  { %7415 = vmatmul.mubr.msk.f32.gmra.mrb[42].mxu0 %vm74_vm4, %v848_v14  ;;  %v1193_v14 = vrot.slane %v9758_v28, 3 }
 0x121   :  { %1112 = vmatprep.mubr.f32.mxu0 %v13511_v3 }
 0x122   :  { %v1194_v15 = vsel %vm1173_vm6, %v1191_v11, %v1193_v14  ;;  %v1221_v11 = vrot.slane %v9837_v30, 3  ;;  %v1223_v14 = vrot.slane %v9666_v56, 3 }
 0x124   :  { %7416 = vmatmul.mubr.msk.f32.gmra.mrb[44].mxu0 %vm74_vm4, %v850_v16  ;;  %v1195_v16 = vrot.slane %v9563_v41, 3 }
 0x125   :  { %1118 = vmatprep.mubr.f32.mxu0 %v13511_v3 }
 0x128   :  { %7417 = vmatmul.mubr.msk.f32.gmra.mrb[46].mxu0 %vm74_vm4, %v852_v22  ;;  %v1197_v22 = vsel %vm1173_vm6, %v1195_v16, %v1196_v20  ;;  %v1226_v20 = vrot.slane %v9682_v58, 3 }
 0x129   :  { %1357 = vmatprep.mubr.f32.mxu0 %v13511_v3 }
 0x12c   :  { %7428 = vmatmul.mubr.msk.f32.vlgmr.msra.gmra.mrb[0].mxu0 %vm74_vm4, %v9823_v23  ;;  %v1181_v23 = vrot.slane %v9515_v35, 3 }
 0x12d   :  { %8209 = vmatpush1.bf16.msra.mxu0 %v8208_v51  ;;  %1363 = vmatprep.mubr.f32.mxu0 %v13511_v3  ;;  %v1202_v51 = vrot.slane %v9587_v44, 3 }
 0x12e   :  { %8212 = vmatprep.subr.msk.bf16.mxu0 %vm9433_vm2, %v8210_v31  ;;  %v1183_v17 = vsel %vm1173_vm6, %v1181_v23, %v1182_v0  ;;  %v1212_v0 = vrot.slane %v9634_v52, 3 }
 0x12f   :  { %v1204_v31 = vsel %vm1173_vm6, %v1202_v51, %v1203_v29  ;;  %v1555_v51 = vrot.slane %v9703_v1, 4 }
 0x130   :  { %7429 = vmatmul.mubr.msk.f32.gmra.mrb[2].mxu0 %vm74_vm4, %v1178_v48  ;;  %v1207_v48 = vrot.slane %v9794_v6, 3 }
 0x131   :  { %1369 = vmatprep.mubr.f32.mxu0 %v13511_v3  ;;  %8215 = vmatpush1.bf16.msk.msra.mxu0 %vm9433_vm2, %v8213_v61  ;;  %v1209_v61 = vrot.slane %v9611_v47, 3  ;;  %v1556_v29 = vsel %vm147_vm0, %v1553_v26, %v1555_v51 }
 0x132   :  { %v1208_v59 = vsel %vm1173_vm6, %v1205_v49, %v1207_v48  ;;  %v1565_v49 = vrot.slane %v9547_v39, 4  ;;  %v1569_v48 = vrot.slane %v9758_v28, 4  ;;  %v1571_v39 = vrot.slane %v9563_v41, 4 }
 0x134   :  { %7430 = vmatmul.mubr.msk.f32.gmra.mrb[4].mxu0 %vm74_vm4, %v1180_v62  ;;  %v1210_v62 = vrot.slane %v9621_v50, 3 }
 0x135   :  { %1375 = vmatprep.mubr.f32.mxu0 %v13511_v3 }
 0x136   :  { %v1211_v23 = vsel %vm1173_vm6, %v1209_v61, %v1210_v62  ;;  %v1574_v61 = vrot.slane %v9579_v43, 4 }
 0x138   :  { %7431 = vmatmul.mubr.msk.f32.gmra.mrb[6].mxu0 %vm74_vm4, %v1183_v17  ;;  %v1213_v17 = vsel %vm1173_vm6, %v1210_v62, %v1212_v0  ;;  %v1576_v62 = vrot.slane %v9776_v60, 4 }
 0x139   :  { %1381 = vmatprep.mubr.f32.mxu0 %v13511_v3 }
 0x13a   :  { %v1577_v41 = vsel %vm147_vm0, %v1574_v61, %v1576_v62  ;;  %v2550_v62 = vld [vmem:[%s13505_s3 + $0x70] sm:$0xff] }
 0x13c   :  { %7432 = vmatmul.mubr.msk.f32.gmra.mrb[8].mxu0 %vm74_vm4, %v1185_v4  ;;  %v1215_v4 = vsel %vm1173_vm6, %v1212_v0, %v1214_v2  ;;  %v1581_v0 = vrot.slane %v9603_v46, 4  ;;  %v1586_v2 = vrot.slane %v9621_v50, 4  ;;  %v1592_v50 = vrot.slane %v9642_v53, 4 }
 0x13d   :  { %1387 = vmatprep.mubr.f32.mxu0 %v13511_v3 }
 0x140   :  { %7433 = vmatmul.mubr.msk.f32.gmra.mrb[10].mxu0 %vm74_vm4, %v1187_v10  ;;  %v1217_v10 = vrot.slane %v9650_v54, 3 }
 0x141   :  { %1393 = vmatprep.mubr.f32.mxu0 %v13511_v3 }
 0x142   :  { %v1218_v7 = vsel %vm1173_vm6, %v1216_v5, %v1217_v10  ;;  %v1590_v5 = vrot.slane %v9814_v18, 4 }
 0x144   :  { %7434 = vmatmul.mubr.msk.f32.gmra.mrb[12].mxu0 %vm74_vm4, %v1190_v9  ;;  %v1220_v9 = vsel %vm1173_vm6, %v1217_v10, %v1219_v8  ;;  %v1593_v10 = vrot.slane %v9650_v54, 4  ;;  %v1599_v54 = vrot.slane %v9666_v56, 4 }
 0x145   :  { %1399 = vmatprep.mubr.f32.mxu0 %v13511_v3 }
 0x148   :  { %7435 = vmatmul.mubr.msk.f32.gmra.mrb[14].mxu0 %vm74_vm4, %v1192_v12  ;;  %v1222_v12 = vsel %vm1173_vm6, %v1219_v8, %v1221_v11  ;;  %v1597_v8 = vrot.slane %v9837_v30, 4  ;;  %v1602_v11 = vrot.slane %v9682_v58, 4 }
 0x149   :  { %1405 = vmatprep.mubr.f32.mxu0 %v13511_v3 }
 0x14c   :  { %7436 = vmatmul.mubr.msk.f32.gmra.mrb[16].mxu0 %vm74_vm4, %v1194_v15  ;;  %v1224_v15 = vrot.slane %v9674_v57, 3 }
 0x14d   :  { %1411 = vmatprep.mubr.f32.mxu0 %v13511_v3 }
 0x14e   :  { %v1225_v16 = vsel %vm1173_vm6, %v1223_v14, %v1224_v15  ;;  %v2537_v14 = vld [vmem:[%s13505_s3 + $0x8] sm:$0xff] }
 0x150   :  { %7437 = vmatmul.mubr.msk.f32.gmra.mrb[18].mxu0 %vm74_vm4, %v1197_v22  ;;  %v1227_v22 = vsel %vm1173_vm6, %v1224_v15, %v1226_v20 }
 0x151   :  { %1417 = vmatprep.mubr.f32.mxu0 %v13511_v3 }
 0x154   :  { %7438 = vmatmul.mubr.msk.f32.gmra.mrb[20].mxu0 %vm74_vm4, %v1199_v25  ;;  %v1229_v25 = vsel %vm1173_vm6, %v1226_v20, %v1228_v24  ;;  %v2538_v20 = vld [vmem:[%s13505_s3 + $0x10] sm:$0xff] }
 0x155   :  { %1423 = vmatprep.mubr.f32.mxu0 %v13511_v3 }
 0x158   :  { %7439 = vmatmul.mubr.msk.f32.gmra.mrb[22].mxu0 %vm74_vm4, %v1201_v27  ;;  %v1554_v27 = vsel %vm147_vm0, %v1551_v32, %v1553_v26  ;;  %v1560_v32 = vrot.slane %v9531_v37, 4  ;;  %v1566_v37 = vsel %vm147_vm0, %v1564_v36, %v1565_v49  ;;  %v2541_v26 = vld [vmem:[%s13505_s3 + $0x28] sm:$0xff] }
 0x159   :  { %1429 = vmatprep.mubr.f32.mxu0 %v13511_v3 }
 0x15a   :  { %v1561_v1 = vsel %vm147_vm0, %v1558_v34, %v1560_v32 }
 0x15c   :  { %7440 = vmatmul.mubr.msk.f32.gmra.mrb[24].mxu0 %vm74_vm4, %v1204_v31  ;;  %v1557_v31 = vrot.slane %v9515_v35, 4 }
 0x15d   :  { %1435 = vmatprep.mubr.f32.mxu0 %v13511_v3 }
 0x15e   :  { %v1559_v21 = vsel %vm147_vm0, %v1557_v31, %v1558_v34  ;;  %v2542_v31 = vld [vmem:[%s13505_s3 + $0x30] sm:$0xff] }
 0x160   :  { %7441 = vmatmul.mubr.msk.f32.gmra.mrb[26].mxu0 %vm74_vm4, %v1206_v33  ;;  %v1567_v33 = vrot.slane %v9555_v40, 4 }
 0x161   :  { %1441 = vmatprep.mubr.f32.mxu0 %v13511_v3 }
 0x162   :  { %v1570_v38 = vsel %vm147_vm0, %v1567_v33, %v1569_v48 }
 0x164   :  { %7442 = vmatmul.mubr.msk.f32.gmra.mrb[28].mxu0 %vm74_vm4, %v1208_v59  ;;  %v1572_v59 = vrot.slane %v9571_v42, 4  ;;  %v1578_v42 = vrot.slane %v9587_v44, 4 }
 0x165   :  { %1447 = vmatprep.mubr.f32.mxu0 %v13511_v3 }
 0x166   :  { %v1573_v40 = vsel %vm147_vm0, %v1571_v39, %v1572_v59  ;;  %v1575_v28 = vsel %vm147_vm0, %v1572_v59, %v1574_v61  ;;  %v2549_v39 = vld [vmem:[%s13505_s3 + $0x68] sm:$0xff]  ;;  %v2551_v59 = vld [vmem:[%s13505_s3 + $0x78] sm:$0xff] }
 0x167   :  { %v8228_v61 = vpack.c.bf16 %v2551_v59, %v2549_v39 }
 0x168   :  { %7443 = vmatmul.mubr.msk.f32.gmra.mrb[30].mxu0 %vm74_vm4, %v1211_v23  ;;  %v1579_v23 = vrot.slane %v9595_v45, 4  ;;  %v1585_v45 = vrot.slane %v9611_v47, 4 }
 0x169   :  { %1453 = vmatprep.mubr.f32.mxu0 %v13511_v3 }
 0x16a   :  { %v1580_v43 = vsel %vm147_vm0, %v1578_v42, %v1579_v23  ;;  %v1582_v60 = vsel %vm147_vm0, %v1579_v23, %v1581_v0  ;;  %v1587_v46 = vsel %vm147_vm0, %v1585_v45, %v1586_v2  ;;  %v2552_v45 = vld [vmem:[%s13505_s3 + $0x80] sm:$0xff] }
 0x16c   :  { %7444 = vmatmul.mubr.msk.f32.gmra.mrb[32].mxu0 %vm74_vm4, %v1213_v17  ;;  %v1583_v17 = vrot.slane %v9794_v6, 4 }
 0x16d   :  { %1459 = vmatprep.mubr.f32.mxu0 %v13511_v3 }
 0x16e   :  { %v1584_v44 = vsel %vm147_vm0, %v1581_v0, %v1583_v17  ;;  %v2553_v0 = vld [vmem:[%s13505_s3 + $0x88] sm:$0xff] }
 0x170   :  { %7445 = vmatmul.mubr.msk.f32.gmra.mrb[34].mxu0 %vm74_vm4, %v1215_v4  ;;  %v1588_v4 = vrot.slane %v9634_v52, 4  ;;  %v1594_v52 = vsel %vm147_vm0, %v1592_v50, %v1593_v10  ;;  %v7609_v50 = vld [vmem:[%s13505_s3 + $0x338] sm:$0xff] }
 0x171   :  { %1465 = vmatprep.mubr.f32.mxu0 %v13511_v3 }
 0x172   :  { %v1589_v6 = vsel %vm147_vm0, %v1586_v2, %v1588_v4  ;;  %v1591_v47 = vsel %vm147_vm0, %v1588_v4, %v1590_v5  ;;  %v2554_v2 = vld [vmem:[%s13505_s3 + $0x90] sm:$0xff] }
 0x173   :  { %v8234_v5 = vpack.c.bf16 %v2554_v2, %v2552_v45 }
 0x174   :  { %7446 = vmatmul.mubr.msk.f32.gmra.mrb[36].mxu0 %vm74_vm4, %v1218_v7  ;;  %v1595_v7 = vrot.slane %v9658_v55, 4 }
 0x175   :  { %1471 = vmatprep.mubr.f32.mxu0 %v13511_v3 }
 0x176   :  { %v1596_v18 = vsel %vm147_vm0, %v1593_v10, %v1595_v7  ;;  %v1598_v53 = vsel %vm147_vm0, %v1595_v7, %v1597_v8  ;;  %v7608_v7 = vld [vmem:[%s13505_s3 + $0x330] sm:$0xff] }
 0x178   :  { %7447 = vmatmul.mubr.msk.f32.gmra.mrb[38].mxu0 %vm74_vm4, %v1220_v9  ;;  %v1600_v9 = vrot.slane %v9674_v57, 4  ;;  %v54_v57 = vlaneseq }
 0x179   :  { %1477 = vmatprep.mubr.f32.mxu0 %v13511_v3 }
 0x17a   :  { %v1601_v55 = vsel %vm147_vm0, %v1599_v54, %v1600_v9  ;;  %v1603_v30 = vsel %vm147_vm0, %v1600_v9, %v1602_v11  ;;  %v10235_v58 = vshrl.u32 %v54_v57, 7 }
 0x17c   :  { %7448 = vmatmul.mubr.msk.f32.gmra.mrb[40].mxu0 %vm74_vm4, %v1222_v12  ;;  %v1604_v12 = vrot.slane %v9855_v63, 4  ;;  %13541 = vst [vmem:[#allocation2_spill] sm:$0xff] %v10235_v58  ;;  %v2539_v63 = vld [vmem:[%s13505_s3 + $0x18] sm:$0xff]  ;;  %v13510_v24 = vsub.s32 0, %v10235_v58 }
 0x17d   :  { %1483 = vmatprep.mubr.f32.mxu0 %v13511_v3  ;;  %v8216_v15 = vpack.c.bf16 %v2539_v63, %v2537_v14 }
 0x17e   :  { %v1605_v56 = vsel %vm147_vm0, %v1602_v11, %v1604_v12  ;;  %v7613_v11 = vld [vmem:[%s13505_s3 + $0x358] sm:$0xff]  ;;  %v7610_v12 = vld [vmem:[%s13505_s3 + $0x340] sm:$0xff] }
 0x17f   :  { %8217 = vmatprep.subr.bf16.mxu0 %v8216_v15 }
 0x180   :  { %7449 = vmatmul.mubr.msk.f32.gmra.mrb[42].mxu0 %vm74_vm4, %v1225_v16  ;;  %v2536_v16 = vld [vmem:[%s13505_s3] sm:$0xff] }
 0x181   :  { %1489 = vmatprep.mubr.f32.mxu0 %v13511_v3 }
 0x184   :  { %7450 = vmatmul.mubr.msk.f32.gmra.mrb[44].mxu0 %vm74_vm4, %v1227_v22  ;;  %v8218_v22 = vpack.c.bf16 %v2538_v20, %v2536_v16  ;;  %v7615_v20 = vld [vmem:[%s13505_s3 + $0x368] sm:$0xff] }
 0x185   :  { %1495 = vmatprep.mubr.f32.mxu0 %v13511_v3 }
 0x188   :  { %7451 = vmatmul.mubr.msk.f32.gmra.mrb[46].mxu0 %vm74_vm4, %v1229_v25  ;;  %v52_v25 = vld [vmem:[%s13506_s2] sm:$0x3]  ;;  %s9378_s2 = smov 108  }
 0x189   :  { %1733 = vmatprep.mubr.f32.mxu0 %v13511_v3  ;;  %v10267_v34 = vrot.slane %v52_v25, %v13510_v24  ;;  %v7497_v24 = vld [vmem:[%s13505_s3 + $0xb8] sm:$0xff] }
 0x18c   :  { %7462 = vmatmul.mubr.msk.f32.vlgmr.msra.gmra.mrb[0].mxu0 %vm74_vm4, %v9972_v13  ;;  %v1562_v13 = vrot.slane %v9740_v19, 4  ;;  %v1568_v19 = vsel %vm147_vm0, %v1565_v49, %v1567_v33  ;;  %v2544_v49 = vld [vmem:[%s13505_s3 + $0x40] sm:$0xff] }
 0x18d   :  { %1739 = vmatprep.mubr.f32.mxu0 %v13511_v3  ;;  %8219 = vmatpush1.bf16.msra.mxu0 %v8218_v22  ;;  %v7617_v22 = vld [vmem:[%s13505_s3 + $0x378] sm:$0xff] }
 0x18e   :  { %v1563_v35 = vsel %vm147_vm0, %v1560_v32, %v1562_v13  ;;  %v2547_v13 = vld [vmem:[%s13505_s3 + $0x58] sm:$0xff] }
 0x190   :  { %7463 = vmatmul.mubr.msk.f32.gmra.mrb[2].mxu0 %vm74_vm4, %v1554_v27  ;;  %v2543_v27 = vld [vmem:[%s13505_s3 + $0x38] sm:$0xff] }
 0x191   :  { %1745 = vmatprep.mubr.f32.mxu0 %v13511_v3  ;;  %v8220_v51 = vpack.c.bf16 %v2543_v27, %v2541_v26  ;;  %v7614_v26 = vld [vmem:[%s13505_s3 + $0x360] sm:$0xff]  ;;  %v7616_v27 = vld [vmem:[%s13505_s3 + $0x370] sm:$0xff] }
 0x193   :  { %8221 = vmatprep.subr.bf16.mxu0 %v8220_v51  ;;  %v10393_v51 = vpack.c.bf16 %v7616_v27, %v7614_v26 }
 0x194   :  { %7464 = vmatmul.mubr.msk.f32.gmra.mrb[4].mxu0 %vm74_vm4, %v1556_v29  ;;  %v2540_v29 = vld [vmem:[%s13505_s3 + $0x20] sm:$0xff] }
 0x195   :  { %1751 = vmatprep.mubr.f32.mxu0 %v13511_v3  ;;  %v8222_v32 = vpack.c.bf16 %v2542_v31, %v2540_v29  ;;  %13547 = vst [vmem:[#allocation8_spill] sm:$0xff] %v10393_v51 }
 0x197   :  { %8223 = vmatpush1.bf16.msra.mxu0 %v8222_v32 }
 0x198   :  { %7465 = vmatmul.mubr.msk.f32.gmra.mrb[6].mxu0 %vm74_vm4, %v1559_v21  ;;  %v13509_v21 = vsub.s32 1, %v10235_v58  ;;  %v7506_v58 = vld [vmem:[%s13505_s3 + $0x100] sm:$0xff] }
 0x199   :  { %1757 = vmatprep.mubr.f32.mxu0 %v13511_v3 }
 0x19c   :  { %7466 = vmatmul.mubr.msk.f32.gmra.mrb[8].mxu0 %vm74_vm4, %v1561_v1  ;;  %v2545_v1 = vld [vmem:[%s13505_s3 + $0x48] sm:$0xff] }
 0x19d   :  { %1763 = vmatprep.mubr.f32.mxu0 %v13511_v3  ;;  %v8224_v36 = vpack.c.bf16 %v2547_v13, %v2545_v1  ;;  %v7619_v13 = vld [vmem:[%s13505_s3 + $0x388] sm:$0xff] }
 0x19f   :  { %8225 = vmatprep.subr.bf16.mxu0 %v8224_v36 }
 0x1a0   :  { %7467 = vmatmul.mubr.msk.f32.gmra.mrb[10].mxu0 %vm74_vm4, %v1563_v35 }
 0x1a1   :  { %1769 = vmatprep.mubr.f32.mxu0 %v13511_v3 }
 0x1a4   :  { %7468 = vmatmul.mubr.msk.f32.gmra.mrb[12].mxu0 %vm74_vm4, %v1566_v37  ;;  %v2546_v37 = vld [vmem:[%s13505_s3 + $0x50] sm:$0xff] }
 0x1a5   :  { %1775 = vmatprep.mubr.f32.mxu0 %v13511_v3 }
 0x1a8   :  { %7469 = vmatmul.mubr.msk.f32.gmra.mrb[14].mxu0 %vm74_vm4, %v1568_v19  ;;  %v10287_v19 = vrot.slane %v52_v25, %v13509_v21  ;;  %v10382_v25 = vpack.c.bf16 %v7617_v22, %v7615_v20 }
 0x1a9   :  { %1781 = vmatprep.mubr.f32.mxu0 %v13511_v3 }
 0x1aa   :  { %13546 = vst [vmem:[#allocation7_spill] sm:$0xff] %v10382_v25 }
 0x1ac   :  { %7470 = vmatmul.mubr.msk.f32.gmra.mrb[16].mxu0 %vm74_vm4, %v1570_v38  ;;  %v8226_v38 = vpack.c.bf16 %v2546_v37, %v2544_v49  ;;  %v7618_v49 = vld [vmem:[%s13505_s3 + $0x380] sm:$0xff]  ;;  %v7620_v37 = vld [vmem:[%s13505_s3 + $0x390] sm:$0xff] }
 0x1ad   :  { %1787 = vmatprep.mubr.f32.mxu0 %v13511_v3 }
 0x1ae   :  { %8227 = vmatpush1.bf16.msra.mxu0 %v8226_v38 }
 0x1af   :  { %8229 = vmatprep.subr.bf16.mxu0 %v8228_v61  ;;  %v7623_v61 = vld [vmem:[%s13505_s3 + $0x3a8] sm:$0xff] }
 0x1b0   :  { %7471 = vmatmul.mubr.msk.f32.gmra.mrb[18].mxu0 %vm74_vm4, %v1573_v40 }
 0x1b1   :  { %1793 = vmatprep.mubr.f32.mxu0 %v13511_v3 }
 0x1b4   :  { %7472 = vmatmul.mubr.msk.f32.gmra.mrb[20].mxu0 %vm74_vm4, %v1575_v28  ;;  %v2548_v28 = vld [vmem:[%s13505_s3 + $0x60] sm:$0xff] }
 0x1b5   :  { %1799 = vmatprep.mubr.f32.mxu0 %v13511_v3 }
 0x1b8   :  { %7473 = vmatmul.mubr.msk.f32.gmra.mrb[22].mxu0 %vm74_vm4, %v1577_v41 }
 0x1b9   :  { %1805 = vmatprep.mubr.f32.mxu0 %v13511_v3 }
 0x1bc   :  { %7474 = vmatmul.mubr.msk.f32.gmra.mrb[24].mxu0 %vm74_vm4, %v1580_v43  ;;  %v8230_v43 = vpack.c.bf16 %v2550_v62, %v2548_v28  ;;  %v7625_v28 = vld [vmem:[%s13505_s3 + $0x3b8] sm:$0xff] }
 0x1bd   :  { %1811 = vmatprep.mubr.f32.mxu0 %v13511_v3  ;;  %v10432_v62 = vpack.c.bf16 %v7625_v28, %v7623_v61 }
 0x1be   :  { %8231 = vmatpush1.bf16.msra.mxu0 %v8230_v43 }
 0x1bf   :  { %13550 = vst [vmem:[#allocation11_spill] sm:$0xff] %v10432_v62 }
 0x1c0   :  { %7475 = vmatmul.mubr.msk.f32.gmra.mrb[26].mxu0 %vm74_vm4, %v1582_v60  ;;  %v2555_v60 = vld [vmem:[%s13505_s3 + $0x98] sm:$0xff] }
 0x1c1   :  { %1817 = vmatprep.mubr.f32.mxu0 %v13511_v3 }
 0x1c4   :  { %7476 = vmatmul.mubr.msk.f32.gmra.mrb[28].mxu0 %vm74_vm4, %v1584_v44  ;;  %v8232_v44 = vpack.c.bf16 %v2555_v60, %v2553_v0 }
 0x1c5   :  { %1823 = vmatprep.mubr.f32.mxu0 %v13511_v3 }
 0x1c6   :  { %8233 = vmatprep.subr.bf16.mxu0 %v8232_v44 }
 0x1c7   :  { %8235 = vmatpush1.bf16.msra.mxu0 %v8234_v5 }
 0x1c8   :  { %7477 = vmatmul.mubr.msk.f32.gmra.mrb[30].mxu0 %vm74_vm4, %v1587_v46 }
 0x1c9   :  { %1829 = vmatprep.mubr.f32.mxu0 %v13511_v3 }
 0x1cc   :  { %7478 = vmatmul.mubr.msk.f32.gmra.mrb[32].mxu0 %vm74_vm4, %v1589_v6 }
 0x1cd   :  { %1835 = vmatprep.mubr.f32.mxu0 %v13511_v3 }
 0x1d0   :  { %7479 = vmatmul.mubr.msk.f32.gmra.mrb[34].mxu0 %vm74_vm4, %v1591_v47  ;;  %v7607_v47 = vld [vmem:[%s13505_s3 + $0x328] sm:$0xff] }
 0x1d1   :  { %1841 = vmatprep.mubr.f32.mxu0 %v13511_v3  ;;  %v10332_v10 = vpack.c.bf16 %v7609_v50, %v7607_v47 }
 0x1d3   :  { %13542 = vst [vmem:[#allocation3_spill] sm:$0xff] %v10332_v10  ;;  %8716 = vmatprep.subr.bf16.mxu1 %v10332_v10  ;;  %v7784_v10 = vld [vmem:[%s13505_s3 + $0x730] sm:$0xff] }
 0x1d4   :  { %7480 = vmatmul.mubr.msk.f32.gmra.mrb[36].mxu0 %vm74_vm4, %v1594_v52  ;;  %v7606_v52 = vld [vmem:[%s13505_s3 + $0x320] sm:$0xff] }
 0x1d5   :  { %1847 = vmatprep.mubr.f32.mxu0 %v13511_v3 }
 0x1d8   :  { %7481 = vmatmul.mubr.msk.f32.gmra.mrb[38].mxu0 %vm74_vm4, %v1596_v18  ;;  %v10343_v18 = vpack.c.bf16 %v7608_v7, %v7606_v52 }
 0x1d9   :  { %1853 = vmatprep.mubr.f32.mxu0 %v13511_v3 }
 0x1da   :  { %13543 = vst [vmem:[#allocation4_spill] sm:$0xff] %v10343_v18  ;;  %8721 = vmatpush1.bf16.msra.mxu1 %v10343_v18 }
 0x1dc   :  { %7482 = vmatmul.mubr.msk.f32.gmra.mrb[40].mxu0 %vm74_vm4, %v1598_v53 }
 0x1dd   :  { %1859 = vmatprep.mubr.f32.mxu0 %v13511_v3 }
 0x1e0   :  { %7483 = vmatmul.mubr.msk.f32.gmra.mrb[42].mxu0 %vm74_vm4, %v1601_v55  ;;  %v7611_v55 = vld [vmem:[%s13505_s3 + $0x348] sm:$0xff] }
 0x1e1   :  { %1865 = vmatprep.mubr.f32.mxu0 %v13511_v3 }
 0x1e4   :  { %7484 = vmatmul.mubr.msk.f32.gmra.mrb[44].mxu0 %vm74_vm4, %v1603_v30  ;;  %v10357_v30 = vpack.c.bf16 %v7613_v11, %v7611_v55 }
 0x1e5   :  { %1871 = vmatprep.mubr.f32.mxu0 %v13511_v3 }
 0x1e6   :  { %13544 = vst [vmem:[#allocation5_spill] sm:$0xff] %v10357_v30  ;;  %8717 = vmatprep.subr.bf16.mxu1 %v10357_v30 }
 0x1e8   :  { %7485 = vmatmul.mubr.msk.f32.gmra.mrb[46].mxu0 %vm74_vm4, %v1605_v56  ;;  %v7612_v56 = vld [vmem:[%s13505_s3 + $0x350] sm:$0xff] }
 0x1e9   :  { %2645 = vmatprep.mubr.f32.mxu0 %v13511_v3  ;;  %v10368_v57 = vpack.c.bf16 %v7612_v56, %v7610_v12 }
 0x1eb   :  { %13545 = vst [vmem:[#allocation6_spill] sm:$0xff] %v10368_v57  ;;  %8722 = vmatpush1.bf16.msra.mxu1 %v10368_v57 }
 0x1ec   :  { %8718 = vmatprep.subr.bf16.mxu1 %v10382_v25 }
 0x1ef   :  { %8723 = vmatpush1.bf16.msra.mxu1 %v10393_v51 }
 0x25f   :  { %v1735_v35 = vpop.f32.mrb[0].mxu0 }
 0x260   :  { %v10283_v33 = vadd.f32 %v1735_v35, %v10267_v34  ;;  %v1737_v48 = vpop.f32.mrb[1].mxu0  ;;  %v7621_v35 = vld [vmem:[%s13505_s3 + $0x398] sm:$0xff] }
 0x261   :  { %v8727_v41 = vadd.f32 %v1737_v48, %v10287_v19  ;;  %v10407_v36 = vpack.c.bf16 %v7621_v35, %v7619_v13  ;;  %v10418_v48 = vpack.c.bf16 %v7620_v37, %v7618_v49 }
 0x262   :  { %1974 = vrot.lane.b32.xlu0 %v10283_v33, %s9376_s9 }
 0x263   :  { %v1741_v40 = vpop.f32.mrb[2].mxu0  ;;  %13548 = vst [vmem:[#allocation9_spill] sm:$0xff] %v10407_v36  ;;  %13549 = vst [vmem:[#allocation10_spill] sm:$0xff] %v10418_v48  ;;  %8719 = vmatprep.subr.bf16.mxu1 %v10407_v36 }
 0x264   :  { %v10305_v42 = vadd.f32 %v1741_v40, %v10267_v34  ;;  %v1743_v23 = vpop.f32.mrb[3].mxu0  ;;  %8724 = vmatpush1.bf16.msra.mxu1 %v10418_v48  ;;  %v7727_v48 = vld [vmem:[%s13505_s3 + $0x5e8] sm:$0xff] }
 0x265   :  { %v8729_v46 = vadd.f32 %v1743_v23, %v10287_v19  ;;  %v7624_v23 = vld [vmem:[%s13505_s3 + $0x3b0] sm:$0xff]  ;;  %8720 = vmatprep.subr.bf16.mxu1 %v10432_v62 }
 0x266   :  { %1976 = vrot.lane.b32.xlu0 %v8727_v41, %s9376_s9  ;;  %1978 = vrot.lane.b32.xlu1 %v10305_v42, %s9376_s9  ;;  %v7622_v41 = vld [vmem:[%s13505_s3 + $0x3a0] sm:$0xff] }
 0x267   :  { %v1747_v17 = vpop.f32.mrb[4].mxu0  ;;  %v10443_v43 = vpack.c.bf16 %v7624_v23, %v7622_v41 }
 0x268   :  { %v10324_v4 = vadd.f32 %v1747_v17, %v10267_v34  ;;  %v1749_v6 = vpop.f32.mrb[5].mxu0 }
 0x269   :  { %v8731_v53 = vadd.f32 %v1749_v6, %v10287_v19  ;;  %13551 = vst [vmem:[#allocation12_spill] sm:$0xff] %v10443_v43  ;;  %8725 = vmatpush1.bf16.msra.mxu1 %v10443_v43 }
 0x26a   :  { %1980 = vrot.lane.b32.xlu1 %v8729_v46, %s9376_s9  ;;  %1982 = vrot.lane.b32.xlu0 %v10324_v4, %s9376_s9 }
 0x26b   :  { %v1753_v8 = vpop.f32.mrb[6].mxu0 }
 0x26c   :  { %v10348_v54 = vadd.f32 %v1753_v8, %v10267_v34  ;;  %v1755_v9 = vpop.f32.mrb[7].mxu0 }
 0x26d   :  { %v8733_v63 = vadd.f32 %v1755_v9, %v10287_v19 }
 0x26e   :  { %1984 = vrot.lane.b32.xlu1 %v8731_v53, %s9376_s9  ;;  %1986 = vrot.lane.b32.xlu0 %v10348_v54, %s9376_s9 }
 0x26f   :  { %v1759_v14 = vpop.f32.mrb[8].mxu0 }
 0x270   :  { %v10373_v15 = vadd.f32 %v1759_v14, %v10267_v34  ;;  %v1761_v16 = vpop.f32.mrb[9].mxu0 }
 0x271   :  { %v8735_v31 = vadd.f32 %v1761_v16, %v10287_v19 }
 0x272   :  { %1988 = vrot.lane.b32.xlu1 %v8733_v63, %s9376_s9  ;;  %1990 = vrot.lane.b32.xlu0 %v10373_v15, %s9376_s9 }
 0x273   :  { %v1765_v29 = vpop.f32.mrb[10].mxu0 }
 0x274   :  { %v10398_v32 = vadd.f32 %v1765_v29, %v10267_v34  ;;  %v1767_v1 = vpop.f32.mrb[11].mxu0 }
 0x275   :  { %v8737_v39 = vadd.f32 %v1767_v1, %v10287_v19 }
 0x276   :  { %1992 = vrot.lane.b32.xlu1 %v8735_v31, %s9376_s9  ;;  %1994 = vrot.lane.b32.xlu0 %v10398_v32, %s9376_s9 }
 0x277   :  { %v1771_v38 = vpop.f32.mrb[12].mxu0 }
 0x278   :  { %v10423_v59 = vadd.f32 %v1771_v38, %v10267_v34  ;;  %v1773_v40 = vpop.f32.mrb[13].mxu0 }
 0x279   :  { %v8739_v60 = vadd.f32 %v1773_v40, %v10287_v19 }
 0x27a   :  { %1996 = vrot.lane.b32.xlu1 %v8737_v39, %s9376_s9  ;;  %1998 = vrot.lane.b32.xlu0 %v10423_v59, %s9376_s9 }
 0x27b   :  { %v1777_v0 = vpop.f32.mrb[14].mxu0 }
 0x27c   :  { %v10448_v17 = vadd.f32 %v1777_v0, %v10267_v34  ;;  %v1779_v44 = vpop.f32.mrb[15].mxu0 }
 0x27d   :  { %v8741_v2 = vadd.f32 %v1779_v44, %v10287_v19 }
 0x27e   :  { %2000 = vrot.lane.b32.xlu1 %v8739_v60, %s9376_s9  ;;  %2002 = vrot.lane.b32.xlu0 %v10448_v17, %s9376_s9 }
 0x27f   :  { %v1783_v45 = vpop.f32.mrb[16].mxu0 }
 0x280   :  { %v10456_v46 = vadd.f32 %v1783_v45, %v10267_v34  ;;  %v1785_v6 = vpop.f32.mrb[17].mxu0 }
 0x281   :  { %v8743_v47 = vadd.f32 %v1785_v6, %v10287_v19 }
 0x282   :  { %2004 = vrot.lane.b32.xlu1 %v8741_v2, %s9376_s9  ;;  %2006 = vrot.lane.b32.xlu0 %v10456_v46, %s9376_s9 }
 0x283   :  { %v1789_v5 = vpop.f32.mrb[18].mxu0 }
 0x284   :  { %v10463_v50 = vadd.f32 %v1789_v5, %v10267_v34  ;;  %v1791_v52 = vpop.f32.mrb[19].mxu0 }
 0x285   :  { %v8745_v8 = vadd.f32 %v1791_v52, %v10287_v19 }
 0x286   :  { %2008 = vrot.lane.b32.xlu1 %v8743_v47, %s9376_s9  ;;  %2010 = vrot.lane.b32.xlu0 %v10463_v50, %s9376_s9 }
 0x287   :  { %v1795_v7 = vpop.f32.mrb[20].mxu0 }
 0x288   :  { %v10470_v53 = vadd.f32 %v1795_v7, %v10267_v34  ;;  %v1797_v9 = vpop.f32.mrb[21].mxu0 }
 0x289   :  { %v8747_v11 = vadd.f32 %v1797_v9, %v10287_v19 }
 0x28a   :  { %2012 = vrot.lane.b32.xlu1 %v8745_v8, %s9376_s9  ;;  %2014 = vrot.lane.b32.xlu0 %v10470_v53, %s9376_s9 }
 0x28b   :  { %v1801_v55 = vpop.f32.mrb[22].mxu0 }
 0x28c   :  { %v10477_v12 = vadd.f32 %v1801_v55, %v10267_v34  ;;  %v1803_v56 = vpop.f32.mrb[23].mxu0 }
 0x28d   :  { %v8749_v63 = vadd.f32 %v1803_v56, %v10287_v19 }
 0x28e   :  { %2016 = vrot.lane.b32.xlu1 %v8747_v11, %s9376_s9  ;;  %2018 = vrot.lane.b32.xlu0 %v10477_v12, %s9376_s9 }
 0x28f   :  { %v1807_v14 = vpop.f32.mrb[24].mxu0 }
 0x290   :  { %v10484_v16 = vadd.f32 %v1807_v14, %v10267_v34  ;;  %v1809_v20 = vpop.f32.mrb[25].mxu0 }
 0x291   :  { %v8751_v26 = vadd.f32 %v1809_v20, %v10287_v19 }
 0x292   :  { %2020 = vrot.lane.b32.xlu1 %v8749_v63, %s9376_s9  ;;  %2022 = vrot.lane.b32.xlu0 %v10484_v16, %s9376_s9 }
 0x293   :  { %v1813_v22 = vpop.f32.mrb[26].mxu0 }
 0x294   :  { %v10491_v27 = vadd.f32 %v1813_v22, %v10267_v34  ;;  %v1815_v29 = vpop.f32.mrb[27].mxu0 }
 0x295   :  { %v8753_v1 = vadd.f32 %v1815_v29, %v10287_v19 }
 0x296   :  { %2024 = vrot.lane.b32.xlu1 %v8751_v26, %s9376_s9  ;;  %2026 = vrot.lane.b32.xlu0 %v10491_v27, %s9376_s9 }
 0x297   :  { %v1819_v31 = vpop.f32.mrb[28].mxu0 }
 0x298   :  { %v10498_v13 = vadd.f32 %v1819_v31, %v10267_v34  ;;  %v1821_v35 = vpop.f32.mrb[29].mxu0 }
 0x299   :  { %v8755_v37 = vadd.f32 %v1821_v35, %v10287_v19 }
 0x29a   :  { %2028 = vrot.lane.b32.xlu1 %v8753_v1, %s9376_s9  ;;  %2030 = vrot.lane.b32.xlu0 %v10498_v13, %s9376_s9 }
 0x29b   :  { %v1825_v49 = vpop.f32.mrb[30].mxu0 }
 0x29c   :  { %v10505_v38 = vadd.f32 %v1825_v49, %v10267_v34  ;;  %v1827_v39 = vpop.f32.mrb[31].mxu0 }
 0x29d   :  { %v8757_v61 = vadd.f32 %v1827_v39, %v10287_v19 }
 0x29e   :  { %2032 = vrot.lane.b32.xlu1 %v8755_v37, %s9376_s9  ;;  %2034 = vrot.lane.b32.xlu0 %v10505_v38, %s9376_s9 }
 0x29f   :  { %v1831_v40 = vpop.f32.mrb[32].mxu0 }
 0x2a0   :  { %v10512_v28 = vadd.f32 %v1831_v40, %v10267_v34  ;;  %v1833_v41 = vpop.f32.mrb[33].mxu0 }
 0x2a1   :  { %v8759_v0 = vadd.f32 %v1833_v41, %v10287_v19  ;;  %v7637_v41 = vld [vmem:[%s13505_s3 + $0x3d8] sm:$0xff] }
 0x2a2   :  { %2036 = vrot.lane.b32.xlu1 %v8757_v61, %s9376_s9  ;;  %2038 = vrot.lane.b32.xlu0 %v10512_v28, %s9376_s9  ;;  %v7635_v61 = vld [vmem:[%s13505_s3 + $0x3c8] sm:$0xff] }
 0x2a3   :  { %v1837_v23 = vpop.f32.mrb[34].mxu0 }
 0x2a4   :  { %v10519_v60 = vadd.f32 %v1837_v23, %v10267_v34  ;;  %v1839_v44 = vpop.f32.mrb[35].mxu0 }
 0x2a5   :  { %v8761_v2 = vadd.f32 %v1839_v44, %v10287_v19 }
 0x2a6   :  { %2040 = vrot.lane.b32.xlu1 %v8759_v0, %s9376_s9  ;;  %2042 = vrot.lane.b32.xlu0 %v10519_v60, %s9376_s9 }
 0x2a7   :  { %v1843_v45 = vpop.f32.mrb[36].mxu0 }
 0x2a8   :  { %v10526_v6 = vadd.f32 %v1843_v45, %v10267_v34  ;;  %v1845_v5 = vpop.f32.mrb[37].mxu0 }
 0x2a9   :  { %v8763_v52 = vadd.f32 %v1845_v5, %v10287_v19 }
 0x2aa   :  { %2044 = vrot.lane.b32.xlu1 %v8761_v2, %s9376_s9  ;;  %2046 = vrot.lane.b32.xlu0 %v10526_v6, %s9376_s9 }
 0x2ab   :  { %v1849_v47 = vpop.f32.mrb[38].mxu0 }
 0x2ac   :  { %v10533_v7 = vadd.f32 %v1849_v47, %v10267_v34  ;;  %v1851_v8 = vpop.f32.mrb[39].mxu0 }
 0x2ad   :  { %v8765_v55 = vadd.f32 %v1851_v8, %v10287_v19 }
 0x2ae   :  { %2048 = vrot.lane.b32.xlu1 %v8763_v52, %s9376_s9  ;;  %2050 = vrot.lane.b32.xlu0 %v10533_v7, %s9376_s9 }
 0x2af   :  { %v1855_v9 = vpop.f32.mrb[40].mxu0 }
 0x2b0   :  { %v10540_v11 = vadd.f32 %v1855_v9, %v10267_v34  ;;  %v1857_v56 = vpop.f32.mrb[41].mxu0 }
 0x2b1   :  { %v8767_v63 = vadd.f32 %v1857_v56, %v10287_v19 }
 0x2b2   :  { %2052 = vrot.lane.b32.xlu1 %v8765_v55, %s9376_s9  ;;  %2054 = vrot.lane.b32.xlu0 %v10540_v11, %s9376_s9 }
 0x2b3   :  { %v1861_v14 = vpop.f32.mrb[42].mxu0 }
 0x2b4   :  { %v10547_v20 = vadd.f32 %v1861_v14, %v10267_v34  ;;  %v1863_v22 = vpop.f32.mrb[43].mxu0 }
 0x2b5   :  { %v8769_v29 = vadd.f32 %v1863_v22, %v10287_v19 }
 0x2b6   :  { %2056 = vrot.lane.b32.xlu1 %v8767_v63, %s9376_s9  ;;  %2058 = vrot.lane.b32.xlu0 %v10547_v20, %s9376_s9 }
 0x2b7   :  { %v1867_v26 = vpop.f32.mrb[44].mxu0 }
 0x2b8   :  { %v10554_v31 = vadd.f32 %v1867_v26, %v10267_v34  ;;  %v1869_v1 = vpop.f32.mrb[45].mxu0 }
 0x2b9   :  { %v8771_v49 = vadd.f32 %v1869_v1, %v10287_v19 }
 0x2ba   :  { %2060 = vrot.lane.b32.xlu1 %v8769_v29, %s9376_s9  ;;  %2062 = vrot.lane.b32.xlu0 %v10554_v31, %s9376_s9 }
 0x2bb   :  { %v1873_v35 = vpop.f32.mrb[46].mxu0 }
 0x2bc   :  { %v10561_v37 = vadd.f32 %v1873_v35, %v10267_v34  ;;  %v1875_v39 = vpop.f32.mrb[47].mxu0  ;;  %v8336_v34 = vpack.c.bf16 %v7637_v41, %v7635_v61 }
 0x2bd   :  { %v8773_v40 = vadd.f32 %v1875_v39, %v10287_v19 }
 0x2be   :  { %2064 = vrot.lane.b32.xlu1 %v8771_v49, %s9376_s9  ;;  %2066 = vrot.lane.b32.xlu0 %v10561_v37, %s9376_s9 }
 0x2bf   :  { %8337 = vmatprep.subr.bf16.mxu1 %v8336_v34 }
 0x2c2   :  { %2068 = vrot.lane.b32.xlu1 %v8773_v40, %s9376_s9  ;;  %s9377_s9 = smov 118  }
 0x2d4   :  { %v1975_v23 = vpop.permute.xlu0 %1974 }
 0x2d8   :  { %v1977_v0 = vpop.permute.xlu0 %1976  ;;  %v1979_v44 = vpop.permute.xlu1 %1978 }
 0x2d9   :  { %v2071_v45 = vsel %vm2070_vm7, %v1975_v23, %v1977_v0 }
 0x2da   :  { %v2119_v19 = vmax.f32 %v10283_v33, %v2071_v45 }
 0x2dc   :  { %v2151_v2 = vrot.slane %v2119_v19, 1  ;;  %v1981_v5 = vpop.permute.xlu1 %1980  ;;  %v1983_v47 = vpop.permute.xlu0 %1982 }
 0x2dd   :  { %v2072_v52 = vsel %vm2070_vm7, %v1979_v44, %v1981_v5 }
 0x2de   :  { %v2167_v8 = vmax.f32 %v2119_v19, %v2151_v2  ;;  %v2120_v9 = vmax.f32 %v10305_v42, %v2072_v52 }
 0x2e0   :  { %v2247_v55 = vrot.slane %v2167_v8, 1  ;;  %v2263_v56 = vrot.slane %v2167_v8, 2  ;;  %v2183_v14 = vrot.slane %v2120_v9, 1  ;;  %v1985_v63 = vpop.permute.xlu1 %1984  ;;  %v1987_v22 = vpop.permute.xlu0 %1986  ;;  %v2279_v29 = vrot.slane %v2167_v8, 3 }
 0x2e1   :  { %v2073_v26 = vsel %vm2070_vm7, %v1983_v47, %v1985_v63 }
 0x2e2   :  { %v2424_v33 = vsel %vm2423_vm8, %v2167_v8, %v2247_v55  ;;  %v2199_v1 = vmax.f32 %v2120_v9, %v2183_v14  ;;  %v2121_v35 = vmax.f32 %v10324_v4, %v2073_v26 }
 0x2e3   :  { %v2433_v49 = vsel %vm2432_vm9, %v2424_v33, %v2263_v56 }
 0x2e4   :  { %v2442_v42 = vsel %vm2441_vm10, %v2433_v49, %v2279_v29  ;;  %v2303_v39 = vrot.slane %v2199_v1, 4  ;;  %v2319_v40 = vrot.slane %v2199_v1, 5  ;;  %v1989_v61 = vpop.permute.xlu1 %1988  ;;  %v1991_v41 = vpop.permute.xlu0 %1990  ;;  %v2215_v34 = vrot.slane %v2121_v35, 1 }
 0x2e5   :  { %v2074_v23 = vsel %vm2070_vm7, %v1987_v22, %v1989_v61  ;;  %v2335_v0 = vrot.slane %v2199_v1, 6  ;;  %v2351_v19 = vrot.slane %v2199_v1, 7 }
 0x2e6   :  { %v2450_v44 = vsel %vm147_vm0, %v2442_v42, %v2303_v39  ;;  %v2122_v45 = vmax.f32 %v10348_v54, %v2074_v23  ;;  %v2231_v4 = vmax.f32 %v2121_v35, %v2215_v34 }
 0x2e7   :  { %v2458_v2 = vsel %vm1173_vm6, %v2450_v44, %v2319_v40 }
 0x2e8   :  { %v2466_v5 = vsel %vm796_vm5, %v2458_v2, %v2335_v0  ;;  %v2152_v47 = vrot.slane %v2122_v45, 1  ;;  %v1993_v52 = vpop.permute.xlu1 %1992  ;;  %v1995_v8 = vpop.permute.xlu0 %1994  ;;  %v2375_v55 = vrot.slane %v2231_v4, 1  ;;  %v2391_v56 = vrot.slane %v2231_v4, 2 }
 0x2e9   :  { %v2474_v9 = vsel %vm419_vm3, %v2466_v5, %v2351_v19  ;;  %v2075_v22 = vsel %vm2070_vm7, %v1991_v41, %v1993_v52  ;;  %v2407_v54 = vrot.slane %v2231_v4, 3 }
 0x2ea   :  { %v10589_v14 = vmax.f32 %v2474_v9, 0.0  ;;  %v2168_v63 = vmax.f32 %v2122_v45, %v2152_v47  ;;  %v2482_v26 = vsel %vm2423_vm8, %v2231_v4, %v2375_v55  ;;  %v2123_v29 = vmax.f32 %v10373_v15, %v2075_v22 }
 0x2eb   :  { %v2490_v33 = vsel %vm2432_vm9, %v2482_v26, %v2391_v56 }
 0x2ec   :  { %v2248_v1 = vrot.slane %v2168_v63, 1  ;;  %v2264_v35 = vrot.slane %v2168_v63, 2  ;;  %7486 = vmatmul.mubr.msk.f32.vlgmr.msra.gmra.mrb[48].mxu0 %vm2556_vm11, %v10589_v14  ;;  %v1997_v49 = vpop.permute.xlu1 %1996  ;;  %v1999_v42 = vpop.permute.xlu0 %1998  ;;  %v2498_v39 = vsel %vm2441_vm10, %v2490_v33, %v2407_v54  ;;  %v2184_v40 = vrot.slane %v2123_v29, 1 }
 0x2ed   :  { %v2076_v61 = vsel %vm2070_vm7, %v1995_v8, %v1997_v49  ;;  %2651 = vmatprep.mubr.f32.mxu0 %v13511_v3  ;;  %v10600_v41 = vmax.f32 %v2498_v39, 0.0  ;;  %v2280_v34 = vrot.slane %v2168_v63, 3  ;;  %v3446_v5 = vrot.slane %v10589_v14, 1 }
 0x2ee   :  { %v2425_v15 = vsel %vm2423_vm8, %v2168_v63, %v2248_v1  ;;  %v2124_v23 = vmax.f32 %v10398_v32, %v2076_v61  ;;  %v2200_v44 = vmax.f32 %v2123_v29, %v2184_v40 }
 0x2ef   :  { %v2434_v0 = vsel %vm2432_vm9, %v2425_v15, %v2264_v35  ;;  %v3447_v47 = vrot.slane %v10600_v41, 1 }
 0x2f0   :  { %v2443_v45 = vsel %vm2441_vm10, %v2434_v0, %v2280_v34  ;;  %v2216_v19 = vrot.slane %v2124_v23, 1  ;;  %v2001_v2 = vpop.permute.xlu1 %2000  ;;  %v2003_v4 = vpop.permute.xlu0 %2002  ;;  %v2304_v52 = vrot.slane %v2200_v44, 4  ;;  %v2320_v8 = vrot.slane %v2200_v44, 5 }
 0x2f1   :  { %v2077_v55 = vsel %vm2070_vm7, %v1999_v42, %v2001_v2  ;;  %v10610_v56 = vsel %vm419_vm3, %v3446_v5, %v3447_v47  ;;  %v2336_v32 = vrot.slane %v2200_v44, 6  ;;  %v2352_v54 = vrot.slane %v2200_v44, 7  ;;  %v7634_v44 = vld [vmem:[%s13505_s3 + $0x3c0] sm:$0xff] }
 0x2f2   :  { %v2232_v9 = vmax.f32 %v2124_v23, %v2216_v19  ;;  %13552 = vst [vmem:[#allocation13_spill] sm:$0xff] %v10610_v56  ;;  %v2451_v63 = vsel %vm147_vm0, %v2443_v45, %v2304_v52  ;;  %v2125_v22 = vmax.f32 %v10423_v59, %v2077_v55  ;;  %3657 = vrot.lane.b32.xlu0 %v10610_v56, %s9377_s9  ;;  %v7636_v45 = vld [vmem:[%s13505_s3 + $0x3d0] sm:$0xff] }
 0x2f3   :  { %v2459_v26 = vsel %vm1173_vm6, %v2451_v63, %v2320_v8  ;;  %v8338_v55 = vpack.c.bf16 %v7636_v45, %v7634_v44  ;;  %v7641_v63 = vld [vmem:[%s13505_s3 + $0x3f8] sm:$0xff] }
 0x2f4   :  { %v2376_v29 = vrot.slane %v2232_v9, 1  ;;  %v2392_v33 = vrot.slane %v2232_v9, 2  ;;  %v2005_v1 = vpop.permute.xlu1 %2004  ;;  %v2007_v35 = vpop.permute.xlu0 %2006  ;;  %v2467_v49 = vsel %vm796_vm5, %v2459_v26, %v2336_v32  ;;  %v2153_v42 = vrot.slane %v2125_v22, 1  ;;  %v7639_v32 = vld [vmem:[%s13505_s3 + $0x3e8] sm:$0xff] }
 0x2f5   :  { %v2078_v39 = vsel %vm2070_vm7, %v2003_v4, %v2005_v1  ;;  %v2475_v40 = vsel %vm419_vm3, %v2467_v49, %v2352_v54  ;;  %v2408_v61 = vrot.slane %v2232_v9, 3 }
 0x2f6   :  { %v2483_v59 = vsel %vm2423_vm8, %v2232_v9, %v2376_v29  ;;  %v2126_v34 = vmax.f32 %v10448_v17, %v2078_v39  ;;  %v10622_v15 = vmax.f32 %v2475_v40, 0.0  ;;  %v2169_v0 = vmax.f32 %v2125_v22, %v2153_v42 }
 0x2f7   :  { %v2491_v23 = vsel %vm2432_vm9, %v2483_v59, %v2392_v33 }
 0x2f8   :  { %v2499_v19 = vsel %vm2441_vm10, %v2491_v23, %v2408_v61  ;;  %v2185_v2 = vrot.slane %v2126_v34, 1  ;;  %v2009_v4 = vpop.permute.xlu1 %2008  ;;  %v2011_v5 = vpop.permute.xlu0 %2010  ;;  %v2249_v17 = vrot.slane %v2169_v0, 1  ;;  %v2265_v52 = vrot.slane %v2169_v0, 2  ;;  %7487 = vmatmul.mubr.msk.f32.gmra.mrb[50].mxu0 %vm2556_vm11, %v10622_v15  ;;  %v7640_v23 = vld [vmem:[%s13505_s3 + $0x3f0] sm:$0xff] }
 0x2f9   :  { %v10632_v47 = vmax.f32 %v2499_v19, 0.0  ;;  %v2079_v9 = vsel %vm2070_vm7, %v2007_v35, %v2009_v4  ;;  %2657 = vmatprep.mubr.f32.mxu0 %v13511_v3  ;;  %v2281_v22 = vrot.slane %v2169_v0, 3  ;;  %v3449_v39 = vrot.slane %v10622_v15, 1  ;;  %v7645_v4 = vld [vmem:[%s13505_s3 + $0x418] sm:$0xff] }
 0x2fa   :  { %v2201_v8 = vmax.f32 %v2126_v34, %v2185_v2  ;;  %v2426_v54 = vsel %vm2423_vm8, %v2169_v0, %v2249_v17  ;;  %v2127_v26 = vmax.f32 %v10456_v46, %v2079_v9  ;;  %v8340_v34 = vpack.c.bf16 %v7641_v63, %v7639_v32  ;;  %v7638_v46 = vld [vmem:[%s13505_s3 + $0x3e0] sm:$0xff]  ;;  %v7643_v2 = vld [vmem:[%s13505_s3 + $0x408] sm:$0xff] }
 0x2fb   :  { %v3450_v29 = vrot.slane %v10632_v47, 1  ;;  %v2435_v33 = vsel %vm2432_vm9, %v2426_v54, %v2265_v52 }
 0x2fc   :  { %v2305_v1 = vrot.slane %v2201_v8, 4  ;;  %v2321_v35 = vrot.slane %v2201_v8, 5  ;;  %v2013_v49 = vpop.permute.xlu1 %2012  ;;  %v2015_v42 = vpop.permute.xlu0 %2014  ;;  %v2444_v40 = vsel %vm2441_vm10, %v2435_v33, %v2281_v22  ;;  %v2217_v61 = vrot.slane %v2127_v26, 1  ;;  %v7642_v33 = vld [vmem:[%s13505_s3 + $0x400] sm:$0xff] }
 0x2fd   :  { %v2080_v59 = vsel %vm2070_vm7, %v2011_v5, %v2013_v49  ;;  %v2337_v0 = vrot.slane %v2201_v8, 6  ;;  %v10660_v19 = vsel %vm419_vm3, %v3449_v39, %v3450_v29  ;;  %v2353_v5 = vrot.slane %v2201_v8, 7  ;;  %v7647_v39 = vld [vmem:[%s13505_s3 + $0x428] sm:$0xff] }
 0x2fe   :  { %v2452_v44 = vsel %vm147_vm0, %v2444_v40, %v2305_v1  ;;  %v2128_v45 = vmax.f32 %v10463_v50, %v2080_v59  ;;  %v2233_v52 = vmax.f32 %v2127_v26, %v2217_v61  ;;  %7627 = vmatmul.mubr.msk.f32.vlgmr.msra.gmra.mrb[0].mxu1 %vm2556_vm11, %v10660_v19  ;;  %3659 = vrot.lane.b32.xlu1 %v10660_v19, %s9377_s9  ;;  %v7644_v1 = vld [vmem:[%s13505_s3 + $0x410] sm:$0xff]  ;;  %v7649_v40 = vld [vmem:[%s13505_s3 + $0x438] sm:$0xff] }
 0x2ff   :  { %v2460_v17 = vsel %vm1173_vm6, %v2452_v44, %v2321_v35  ;;  %3583 = vmatprep.mubr.f32.mxu1 %v13511_v3  ;;  %8339 = vmatpush1.bf16.msra.mxu1 %v8338_v55  ;;  %v8342_v22 = vpack.c.bf16 %v7640_v23, %v7638_v46  ;;  %v8344_v26 = vpack.c.bf16 %v7645_v4, %v7643_v2  ;;  %v7646_v2 = vld [vmem:[%s13505_s3 + $0x420] sm:$0xff]  ;;  %v7648_v4 = vld [vmem:[%s13505_s3 + $0x430] sm:$0xff] }
 0x300   :  { %v2468_v50 = vsel %vm796_vm5, %v2460_v17, %v2337_v0  ;;  %v2154_v9 = vrot.slane %v2128_v45, 1  ;;  %v2017_v32 = vpop.permute.xlu1 %2016  ;;  %v2019_v63 = vpop.permute.xlu0 %2018  ;;  %v2377_v54 = vrot.slane %v2233_v52, 1  ;;  %v2393_v29 = vrot.slane %v2233_v52, 2  ;;  %8341 = vmatprep.subr.bf16.mxu1 %v8340_v34 }
 0x301   :  { %v2476_v8 = vsel %vm419_vm3, %v2468_v50, %v2353_v5  ;;  %v2081_v55 = vsel %vm2070_vm7, %v2015_v42, %v2017_v32  ;;  %v2409_v61 = vrot.slane %v2233_v52, 3 }
 0x302   :  { %v10682_v35 = vmax.f32 %v2476_v8, 0.0  ;;  %v2170_v49 = vmax.f32 %v2128_v45, %v2154_v9  ;;  %v2484_v59 = vsel %vm2423_vm8, %v2233_v52, %v2377_v54  ;;  %v2129_v34 = vmax.f32 %v10470_v53, %v2081_v55  ;;  %v7651_v8 = vld [vmem:[%s13505_s3 + $0x448] sm:$0xff]  ;;  %v7653_v54 = vld [vmem:[%s13505_s3 + $0x458] sm:$0xff] }
 0x303   :  { %v2492_v46 = vsel %vm2432_vm9, %v2484_v59, %v2393_v29  ;;  %8343 = vmatpush1.bf16.msra.mxu1 %v8342_v22  ;;  %v8346_v45 = vpack.c.bf16 %v7644_v1, %v7642_v33  ;;  %v8348_v52 = vpack.c.bf16 %v7649_v40, %v7647_v39  ;;  %v7650_v40 = vld [vmem:[%s13505_s3 + $0x440] sm:$0xff] }
 0x304   :  { %v2250_v23 = vrot.slane %v2170_v49, 1  ;;  %v2266_v0 = vrot.slane %v2170_v49, 2  ;;  %7488 = vmatmul.mubr.msk.f32.gmra.mrb[52].mxu0 %vm2556_vm11, %v10682_v35  ;;  %v2021_v42 = vpop.permute.xlu1 %2020  ;;  %v2023_v44 = vpop.permute.xlu0 %2022  ;;  %v2500_v53 = vsel %vm2441_vm10, %v2492_v46, %v2409_v61  ;;  %v2186_v5 = vrot.slane %v2129_v34, 1  ;;  %8345 = vmatprep.subr.bf16.mxu1 %v8344_v26  ;;  %v7652_v61 = vld [vmem:[%s13505_s3 + $0x450] sm:$0xff] }
 0x305   :  { %v2082_v17 = vsel %vm2070_vm7, %v2019_v63, %v2021_v42  ;;  %2663 = vmatprep.mubr.f32.mxu0 %v13511_v3  ;;  %v10705_v50 = vmax.f32 %v2500_v53, 0.0  ;;  %v2282_v9 = vrot.slane %v2170_v49, 3  ;;  %v8350_v26 = vpack.c.bf16 %v7648_v4, %v7646_v2 }
 0x306   :  { %v2427_v32 = vsel %vm2423_vm8, %v2170_v49, %v2250_v23  ;;  %v2130_v22 = vmax.f32 %v10477_v12, %v2082_v17  ;;  %v2202_v29 = vmax.f32 %v2129_v34, %v2186_v5  ;;  %v3452_v49 = vrot.slane %v10682_v35, 1 }
 0x307   :  { %v2436_v63 = vsel %vm2432_vm9, %v2427_v32, %v2266_v0  ;;  %v3453_v12 = vrot.slane %v10705_v50, 1  ;;  %8347 = vmatpush1.bf16.msra.mxu1 %v8346_v45  ;;  %v8352_v46 = vpack.c.bf16 %v7653_v54, %v7651_v8  ;;  %v8354_v53 = vpack.c.bf16 %v7652_v61, %v7650_v40 }
 0x308   :  { %v2445_v33 = vsel %vm2441_vm10, %v2436_v63, %v2282_v9  ;;  %v2218_v1 = vrot.slane %v2130_v22, 1  ;;  %v2025_v55 = vpop.permute.xlu1 %2024  ;;  %v2027_v39 = vpop.permute.xlu0 %2026  ;;  %v2306_v59 = vrot.slane %v2202_v29, 4  ;;  %v2322_v34 = vrot.slane %v2202_v29, 5  ;;  %8349 = vmatprep.subr.bf16.mxu1 %v8348_v52 }
 0x309   :  { %v2083_v0 = vsel %vm2070_vm7, %v2023_v44, %v2025_v55  ;;  %v10727_v42 = vsel %vm419_vm3, %v3452_v49, %v3453_v12  ;;  %v2338_v2 = vrot.slane %v2202_v29, 6  ;;  %v2354_v5 = vrot.slane %v2202_v29, 7 }
 0x30a   :  { %v2234_v23 = vmax.f32 %v2130_v22, %v2218_v1  ;;  %v2453_v45 = vsel %vm147_vm0, %v2445_v33, %v2306_v59  ;;  %v2131_v4 = vmax.f32 %v10484_v16, %v2083_v0  ;;  %7628 = vmatmul.mubr.msk.f32.gmra.mrb[2].mxu1 %vm2556_vm11, %v10727_v42  ;;  %3661 = vrot.lane.b32.xlu0 %v10727_v42, %s9377_s9 }
 0x30b   :  { %v2461_v17 = vsel %vm1173_vm6, %v2453_v45, %v2322_v34  ;;  %3589 = vmatprep.mubr.f32.mxu1 %v13511_v3  ;;  %8351 = vmatpush1.bf16.msra.mxu1 %v8350_v26 }
 0x30c   :  { %v2378_v52 = vrot.slane %v2234_v23, 1  ;;  %v2394_v44 = vrot.slane %v2234_v23, 2  ;;  %v2029_v9 = vpop.permute.xlu1 %2028  ;;  %v2031_v32 = vpop.permute.xlu0 %2030  ;;  %v2469_v22 = vsel %vm796_vm5, %v2461_v17, %v2338_v2  ;;  %v2155_v16 = vrot.slane %v2131_v4, 1  ;;  %8353 = vmatprep.subr.bf16.mxu1 %v8352_v46 }
 0x30d   :  { %v2084_v8 = vsel %vm2070_vm7, %v2027_v39, %v2029_v9  ;;  %v2477_v54 = vsel %vm419_vm3, %v2469_v22, %v2354_v5  ;;  %v2410_v63 = vrot.slane %v2234_v23, 3 }
 0x30e   :  { %v2485_v29 = vsel %vm2423_vm8, %v2234_v23, %v2378_v52  ;;  %v2132_v33 = vmax.f32 %v10491_v27, %v2084_v8  ;;  %v10742_v1 = vmax.f32 %v2477_v54, 0.0  ;;  %v2171_v49 = vmax.f32 %v2131_v4, %v2155_v16 }
 0x30f   :  { %v2493_v55 = vsel %vm2432_vm9, %v2485_v29, %v2394_v44  ;;  %8355 = vmatpush1.bf16.msra.mxu1 %v8354_v53 }
 0x310   :  { %v2501_v26 = vsel %vm2441_vm10, %v2493_v55, %v2410_v63  ;;  %v2187_v12 = vrot.slane %v2132_v33, 1  ;;  %v2033_v40 = vpop.permute.xlu1 %2032  ;;  %v2035_v61 = vpop.permute.xlu0 %2034  ;;  %v2251_v59 = vrot.slane %v2171_v49, 1  ;;  %v2267_v34 = vrot.slane %v2171_v49, 2  ;;  %7489 = vmatmul.mubr.msk.f32.gmra.mrb[54].mxu0 %vm2556_vm11, %v10742_v1 }
 0x311   :  { %v10746_v39 = vmax.f32 %v2501_v26, 0.0  ;;  %v2085_v27 = vsel %vm2070_vm7, %v2031_v32, %v2033_v40  ;;  %2669 = vmatprep.mubr.f32.mxu0 %v13511_v3  ;;  %v2283_v23 = vrot.slane %v2171_v49, 3  ;;  %v3455_v44 = vrot.slane %v10742_v1, 1 }
 0x312   :  { %v2203_v46 = vmax.f32 %v2132_v33, %v2187_v12  ;;  %v2428_v0 = vsel %vm2423_vm8, %v2171_v49, %v2251_v59  ;;  %v2133_v2 = vmax.f32 %v10498_v13, %v2085_v27 }
 0x313   :  { %v3456_v45 = vrot.slane %v10746_v39, 1  ;;  %v2437_v4 = vsel %vm2432_vm9, %v2428_v0, %v2267_v34 }
 0x314   :  { %v2307_v53 = vrot.slane %v2203_v46, 4  ;;  %v2323_v5 = vrot.slane %v2203_v46, 5  ;;  %v2037_v17 = vpop.permute.xlu1 %2036  ;;  %v2039_v52 = vpop.permute.xlu0 %2038  ;;  %v2446_v9 = vsel %vm2441_vm10, %v2437_v4, %v2283_v23  ;;  %v2219_v32 = vrot.slane %v2133_v2, 1 }
 0x315   :  { %v2086_v22 = vsel %vm2070_vm7, %v2035_v61, %v2037_v17  ;;  %v2339_v16 = vrot.slane %v2203_v46, 6  ;;  %v10762_v54 = vsel %vm419_vm3, %v3455_v44, %v3456_v45  ;;  %v2355_v63 = vrot.slane %v2203_v46, 7  ;;  %v7663_v17 = vld [vmem:[%s13505_s3 + $0x468] sm:$0xff] }
 0x316   :  { %v2454_v8 = vsel %vm147_vm0, %v2446_v9, %v2307_v53  ;;  %v2134_v13 = vmax.f32 %v10505_v38, %v2086_v22  ;;  %v2235_v33 = vmax.f32 %v2133_v2, %v2219_v32  ;;  %7629 = vmatmul.mubr.msk.f32.gmra.mrb[4].mxu1 %vm2556_vm11, %v10762_v54  ;;  %3663 = vrot.lane.b32.xlu1 %v10762_v54, %s9377_s9 }
 0x317   :  { %v2462_v29 = vsel %vm1173_vm6, %v2454_v8, %v2323_v5  ;;  %3595 = vmatprep.mubr.f32.mxu1 %v13511_v3 }
 0x318   :  { %v2470_v55 = vsel %vm796_vm5, %v2462_v29, %v2339_v16  ;;  %v2156_v49 = vrot.slane %v2134_v13, 1  ;;  %v2041_v26 = vpop.permute.xlu1 %2040  ;;  %v2043_v12 = vpop.permute.xlu0 %2042  ;;  %v2379_v40 = vrot.slane %v2235_v33, 1  ;;  %v2395_v61 = vrot.slane %v2235_v33, 2 }
 0x319   :  { %v2478_v38 = vsel %vm419_vm3, %v2470_v55, %v2355_v63  ;;  %v2087_v46 = vsel %vm2070_vm7, %v2039_v52, %v2041_v26  ;;  %v2411_v27 = vrot.slane %v2235_v33, 3  ;;  %v7665_v52 = vld [vmem:[%s13505_s3 + $0x478] sm:$0xff] }
 0x31a   :  { %v10772_v59 = vmax.f32 %v2478_v38, 0.0  ;;  %v2172_v34 = vmax.f32 %v2134_v13, %v2156_v49  ;;  %v2486_v23 = vsel %vm2423_vm8, %v2235_v33, %v2379_v40  ;;  %v2135_v0 = vmax.f32 %v10512_v28, %v2087_v46 }
 0x31b   :  { %v2494_v2 = vsel %vm2432_vm9, %v2486_v23, %v2395_v61  ;;  %v8356_v29 = vpack.c.bf16 %v7665_v52, %v7663_v17 }
 0x31c   :  { %v2252_v45 = vrot.slane %v2172_v34, 1  ;;  %v2268_v4 = vrot.slane %v2172_v34, 2  ;;  %7490 = vmatmul.mubr.msk.f32.gmra.mrb[56].mxu0 %vm2556_vm11, %v10772_v59  ;;  %v2045_v53 = vpop.permute.xlu1 %2044  ;;  %v2047_v5 = vpop.permute.xlu0 %2046  ;;  %v2502_v44 = vsel %vm2441_vm10, %v2494_v2, %v2411_v27  ;;  %v2188_v28 = vrot.slane %v2135_v0, 1 }
 0x31d   :  { %v2088_v9 = vsel %vm2070_vm7, %v2043_v12, %v2045_v53  ;;  %2675 = vmatprep.mubr.f32.mxu0 %v13511_v3  ;;  %v10789_v32 = vmax.f32 %v2502_v44, 0.0  ;;  %v2284_v22 = vrot.slane %v2172_v34, 3  ;;  %v3458_v12 = vrot.slane %v10772_v59, 1  ;;  %8357 = vmatprep.subr.bf16.mxu1 %v8356_v29 }
 0x31e   :  { %v2429_v16 = vsel %vm2423_vm8, %v2172_v34, %v2252_v45  ;;  %v2136_v8 = vmax.f32 %v10519_v60, %v2088_v9  ;;  %v2204_v63 = vmax.f32 %v2135_v0, %v2188_v28 }
 0x31f   :  { %v2438_v13 = vsel %vm2432_vm9, %v2429_v16, %v2268_v4  ;;  %v3459_v38 = vrot.slane %v10789_v32, 1 }
 0x320   :  { %v2447_v33 = vsel %vm2441_vm10, %v2438_v13, %v2284_v22  ;;  %v2220_v55 = vrot.slane %v2136_v8, 1  ;;  %v2049_v49 = vpop.permute.xlu1 %2048  ;;  %v2051_v26 = vpop.permute.xlu0 %2050  ;;  %v2308_v40 = vrot.slane %v2204_v63, 4  ;;  %v2324_v61 = vrot.slane %v2204_v63, 5 }
 0x321   :  { %v2089_v34 = vsel %vm2070_vm7, %v2047_v5, %v2049_v49  ;;  %v10799_v60 = vsel %vm419_vm3, %v3458_v12, %v3459_v38  ;;  %v2340_v27 = vrot.slane %v2204_v63, 6  ;;  %v2356_v2 = vrot.slane %v2204_v63, 7 }
 0x322   :  { %v2236_v46 = vmax.f32 %v2136_v8, %v2220_v55  ;;  %v2455_v23 = vsel %vm147_vm0, %v2447_v33, %v2308_v40  ;;  %v2137_v0 = vmax.f32 %v10526_v6, %v2089_v34  ;;  %7630 = vmatmul.mubr.msk.f32.gmra.mrb[6].mxu1 %vm2556_vm11, %v10799_v60  ;;  %3665 = vrot.lane.b32.xlu0 %v10799_v60, %s9377_s9 }
 0x323   :  { %v2463_v45 = vsel %vm1173_vm6, %v2455_v23, %v2324_v61  ;;  %3601 = vmatprep.mubr.f32.mxu1 %v13511_v3 }
 0x324   :  { %v2380_v4 = vrot.slane %v2236_v46, 1  ;;  %v2396_v53 = vrot.slane %v2236_v46, 2  ;;  %v2053_v5 = vpop.permute.xlu1 %2052  ;;  %v2055_v17 = vpop.permute.xlu0 %2054  ;;  %v2471_v52 = vsel %vm796_vm5, %v2463_v45, %v2340_v27  ;;  %v2157_v44 = vrot.slane %v2137_v0, 1 }
 0x325   :  { %v2090_v6 = vsel %vm2070_vm7, %v2051_v26, %v2053_v5  ;;  %v2479_v28 = vsel %vm419_vm3, %v2471_v52, %v2356_v2  ;;  %v2412_v9 = vrot.slane %v2236_v46, 3 }
 0x326   :  { %v2487_v22 = vsel %vm2423_vm8, %v2236_v46, %v2380_v4  ;;  %v2138_v16 = vmax.f32 %v10533_v7, %v2090_v6  ;;  %v10814_v8 = vmax.f32 %v2479_v28, 0.0  ;;  %v2173_v63 = vmax.f32 %v2137_v0, %v2157_v44 }
 0x327   :  { %v2495_v13 = vsel %vm2432_vm9, %v2487_v22, %v2396_v53 }
 0x328   :  { %v2503_v29 = vsel %vm2441_vm10, %v2495_v13, %v2412_v9  ;;  %v2189_v33 = vrot.slane %v2138_v16, 1  ;;  %v2057_v55 = vpop.permute.xlu1 %2056  ;;  %v2059_v49 = vpop.permute.xlu0 %2058  ;;  %v2253_v26 = vrot.slane %v2173_v63, 1  ;;  %v2269_v38 = vrot.slane %v2173_v63, 2  ;;  %7491 = vmatmul.mubr.msk.f32.gmra.mrb[58].mxu0 %vm2556_vm11, %v10814_v8 }
 0x329   :  { %v10818_v12 = vmax.f32 %v2503_v29, 0.0  ;;  %v2091_v7 = vsel %vm2070_vm7, %v2055_v17, %v2057_v55  ;;  %2681 = vmatprep.mubr.f32.mxu0 %v13511_v3  ;;  %v2285_v61 = vrot.slane %v2173_v63, 3  ;;  %v3461_v4 = vrot.slane %v10814_v8, 1 }
 0x32a   :  { %v2205_v40 = vmax.f32 %v2138_v16, %v2189_v33  ;;  %v2430_v46 = vsel %vm2423_vm8, %v2173_v63, %v2253_v26  ;;  %v2139_v34 = vmax.f32 %v10540_v11, %v2091_v7 }
 0x32b   :  { %v3462_v27 = vrot.slane %v10818_v12, 1  ;;  %v2439_v23 = vsel %vm2432_vm9, %v2430_v46, %v2269_v38 }
 0x32c   :  { %v2309_v0 = vrot.slane %v2205_v40, 4  ;;  %v2325_v2 = vrot.slane %v2205_v40, 5  ;;  %v2061_v45 = vpop.permute.xlu1 %2060  ;;  %v2448_v53 = vsel %vm2441_vm10, %v2439_v23, %v2285_v61  ;;  %v2221_v5 = vrot.slane %v2139_v34, 1  ;;  %v2063_v11 = vpop.permute.xlu0 %2062 }
 0x32d   :  { %v2092_v17 = vsel %vm2070_vm7, %v2059_v49, %v2061_v45  ;;  %v2341_v52 = vrot.slane %v2205_v40, 6  ;;  %v10834_v28 = vsel %vm419_vm3, %v3461_v4, %v3462_v27  ;;  %v2357_v9 = vrot.slane %v2205_v40, 7 }
 0x32e   :  { %v2456_v44 = vsel %vm147_vm0, %v2448_v53, %v2309_v0  ;;  %v2140_v6 = vmax.f32 %v10547_v20, %v2092_v17  ;;  %v2237_v16 = vmax.f32 %v2139_v34, %v2221_v5  ;;  %7631 = vmatmul.mubr.msk.f32.gmra.mrb[8].mxu1 %vm2556_vm11, %v10834_v28  ;;  %3667 = vrot.lane.b32.xlu1 %v10834_v28, %s9377_s9 }
 0x32f   :  { %v2464_v22 = vsel %vm1173_vm6, %v2456_v44, %v2325_v2  ;;  %3607 = vmatprep.mubr.f32.mxu1 %v13511_v3 }
 0x330   :  { %v2472_v13 = vsel %vm796_vm5, %v2464_v22, %v2341_v52  ;;  %v2158_v63 = vrot.slane %v2140_v6, 1  ;;  %v2065_v29 = vpop.permute.xlu1 %2064  ;;  %v2381_v33 = vrot.slane %v2237_v16, 1  ;;  %v2397_v55 = vrot.slane %v2237_v16, 2  ;;  %v2067_v23 = vpop.permute.xlu0 %2066 }
 0x331   :  { %v2480_v20 = vsel %vm419_vm3, %v2472_v13, %v2357_v9  ;;  %v2093_v38 = vsel %vm2070_vm7, %v2063_v11, %v2065_v29  ;;  %v2413_v40 = vrot.slane %v2237_v16, 3 }
 0x332   :  { %v10844_v49 = vmax.f32 %v2480_v20, 0.0  ;;  %v2174_v26 = vmax.f32 %v2140_v6, %v2158_v63  ;;  %v2488_v7 = vsel %vm2423_vm8, %v2237_v16, %v2381_v33  ;;  %v2141_v61 = vmax.f32 %v10554_v31, %v2093_v38 }
 0x333   :  { %v2496_v46 = vsel %vm2432_vm9, %v2488_v7, %v2397_v55 }
 0x334   :  { %v2254_v34 = vrot.slane %v2174_v26, 1  ;;  %v2270_v27 = vrot.slane %v2174_v26, 2  ;;  %7492 = vmatmul.mubr.msk.f32.gmra.mrb[60].mxu0 %vm2556_vm11, %v10844_v49  ;;  %v2069_v0 = vpop.permute.xlu1 %2068  ;;  %v2504_v2 = vsel %vm2441_vm10, %v2496_v46, %v2413_v40  ;;  %v2190_v45 = vrot.slane %v2141_v61, 1 }
 0x335   :  { %v2094_v4 = vsel %vm2070_vm7, %v2067_v23, %v2069_v0  ;;  %2687 = vmatprep.mubr.f32.mxu0 %v13511_v3  ;;  %v10855_v53 = vmax.f32 %v2504_v2, 0.0  ;;  %v2286_v5 = vrot.slane %v2174_v26, 3  ;;  %v3464_v9 = vrot.slane %v10844_v49, 1 }
 0x336   :  { %v2431_v31 = vsel %vm2423_vm8, %v2174_v26, %v2254_v34  ;;  %v2142_v17 = vmax.f32 %v10561_v37, %v2094_v4  ;;  %v2206_v44 = vmax.f32 %v2141_v61, %v2190_v45 }
 0x337   :  { %v2440_v52 = vsel %vm2432_vm9, %v2431_v31, %v2270_v27  ;;  %v3465_v22 = vrot.slane %v10855_v53, 1  ;;  %v7664_v31 = vld [vmem:[%s13505_s3 + $0x470] sm:$0xff] }
 0x338   :  { %v2449_v6 = vsel %vm2441_vm10, %v2440_v52, %v2286_v5  ;;  %v2222_v11 = vrot.slane %v2142_v17, 1  ;;  %v2310_v16 = vrot.slane %v2206_v44, 4  ;;  %v2326_v13 = vrot.slane %v2206_v44, 5  ;;  %v7662_v5 = vld [vmem:[%s13505_s3 + $0x460] sm:$0xff]  ;;  %v7669_v52 = vld [vmem:[%s13505_s3 + $0x498] sm:$0xff] }
 0x339   :  { %v10864_v29 = vsel %vm419_vm3, %v3464_v9, %v3465_v22  ;;  %v2342_v20 = vrot.slane %v2206_v44, 6  ;;  %v2358_v37 = vrot.slane %v2206_v44, 7  ;;  %v8358_v44 = vpack.c.bf16 %v7664_v31, %v7662_v5  ;;  %v7666_v9 = vld [vmem:[%s13505_s3 + $0x480] sm:$0xff]  ;;  %v7668_v22 = vld [vmem:[%s13505_s3 + $0x490] sm:$0xff] }
 0x33a   :  { %v2238_v63 = vmax.f32 %v2142_v17, %v2222_v11  ;;  %v2457_v33 = vsel %vm147_vm0, %v2449_v6, %v2310_v16  ;;  %7632 = vmatmul.mubr.msk.f32.gmra.mrb[10].mxu1 %vm2556_vm11, %v10864_v29  ;;  %3669 = vrot.lane.b32.xlu0 %v10864_v29, %s9377_s9  ;;  %v7667_v17 = vld [vmem:[%s13505_s3 + $0x488] sm:$0xff]  ;;  %v7673_v16 = vld [vmem:[%s13505_s3 + $0x4b8] sm:$0xff]  ;;  %v7678_v5 = vld [vmem:[%s13505_s3 + $0x4e0] sm:$0xff] }
 0x33b   :  { %v2465_v55 = vsel %vm1173_vm6, %v2457_v33, %v2326_v13  ;;  %3613 = vmatprep.mubr.f32.mxu1 %v13511_v3  ;;  %v8360_v11 = vpack.c.bf16 %v7669_v52, %v7667_v17  ;;  %v8362_v13 = vpack.c.bf16 %v7668_v22, %v7666_v9  ;;  %v7672_v33 = vld [vmem:[%s13505_s3 + $0x4b0] sm:$0xff]  ;;  %v4377_v52 = vrot.slane %v10789_v32, 2 }
 0x33c   :  { %v2382_v26 = vrot.slane %v2238_v63, 1  ;;  %v2398_v38 = vrot.slane %v2238_v63, 2  ;;  %v2473_v40 = vsel %vm796_vm5, %v2465_v55, %v2342_v20  ;;  %v2414_v61 = vrot.slane %v2238_v63, 3  ;;  %v7670_v20 = vld [vmem:[%s13505_s3 + $0x4a0] sm:$0xff]  ;;  %v7677_v55 = vld [vmem:[%s13505_s3 + $0x4d8] sm:$0xff]  ;;  %v7680_v31 = vld [vmem:[%s13505_s3 + $0x4f0] sm:$0xff] }
 0x33d   :  { %v2481_v7 = vsel %vm419_vm3, %v2473_v40, %v2358_v37  ;;  %v4365_v37 = vrot.slane %v10600_v41, 2  ;;  %v8374_v9 = vpack.c.bf16 %v7680_v31, %v7678_v5  ;;  %v5289_v31 = vrot.slane %v10705_v50, 3 }
 0x33e   :  { %v2489_v46 = vsel %vm2423_vm8, %v2238_v63, %v2382_v26  ;;  %v10876_v34 = vmax.f32 %v2481_v7, 0.0  ;;  %3839 = vrot.lane.b32.xlu0 %v10610_v56, %s9378_s2  ;;  %v4364_v26 = vrot.slane %v10589_v14, 2  ;;  %v7676_v7 = vld [vmem:[%s13505_s3 + $0x4d0] sm:$0xff] }
 0x33f   :  { %v2497_v27 = vsel %vm2432_vm9, %v2489_v46, %v2398_v38  ;;  %v8366_v38 = vpack.c.bf16 %v7672_v33, %v7670_v20  ;;  %v7679_v46 = vld [vmem:[%s13505_s3 + $0x4e8] sm:$0xff]  ;;  %v4374_v33 = vrot.slane %v10746_v39, 2 }
 0x340   :  { %v2505_v23 = vsel %vm2441_vm10, %v2497_v27, %v2414_v61  ;;  %7493 = vmatmul.mubr.msk.f32.gmra.mrb[62].mxu0 %vm2556_vm11, %v10876_v34  ;;  %v3467_v2 = vrot.slane %v10876_v34, 1  ;;  %v10984_v61 = vsel %vm796_vm5, %v4364_v26, %v4365_v37  ;;  %v7681_v27 = vld [vmem:[%s13505_s3 + $0x4f8] sm:$0xff]  ;;  %v4380_v26 = vrot.slane %v10818_v12, 2 }
 0x341   :  { %v10882_v0 = vmax.f32 %v2505_v23, 0.0  ;;  %2827 = vmatprep.mubr.f32.mxu0 %v13511_v3  ;;  %v4370_v23 = vrot.slane %v10682_v35, 2 }
 0x342   :  { %3843 = vrot.lane.b32.xlu0 %v10727_v42, %s9378_s2 }
 0x343   :  { %v3468_v45 = vrot.slane %v10882_v0, 1 }
 0x345   :  { %v10892_v4 = vsel %vm419_vm3, %v3467_v2, %v3468_v45 }
 0x346   :  { %3671 = vrot.lane.b32.xlu1 %v10892_v4, %s9377_s9  ;;  %7633 = vmatmul.mubr.msk.f32.gmra.mrb[12].mxu1 %vm2556_vm11, %v10892_v4 }
 0x347   :  { %3847 = vrot.lane.b32.xlu0 %v10799_v60, %s9378_s2  ;;  %3753 = vmatprep.mubr.f32.mxu1 %v13511_v3 }
 0x34a   :  { %3841 = vrot.lane.b32.xlu1 %v10660_v19, %s9378_s2 }
 0x34b   :  { %3851 = vrot.lane.b32.xlu0 %v10864_v29, %s9378_s2 }
 0x34e   :  { %3845 = vrot.lane.b32.xlu1 %v10762_v54, %s9378_s2 }
 0x34f   :  { %4021 = vrot.lane.b32.xlu0 %v10610_v56, %s9379_s27 }
 0x352   :  { %3849 = vrot.lane.b32.xlu1 %v10834_v28, %s9378_s2 }
 0x353   :  { %4025 = vrot.lane.b32.xlu0 %v10727_v42, %s9379_s27 }
 0x356   :  { %3853 = vrot.lane.b32.xlu1 %v10892_v4, %s9378_s2 }
 0x357   :  { %4029 = vrot.lane.b32.xlu0 %v10799_v60, %s9379_s27 }
 0x35a   :  { %4023 = vrot.lane.b32.xlu1 %v10660_v19, %s9379_s27 }
 0x35b   :  { %4033 = vrot.lane.b32.xlu0 %v10864_v29, %s9379_s27 }
 0x35e   :  { %4027 = vrot.lane.b32.xlu1 %v10762_v54, %s9379_s27 }
 0x35f   :  { %4203 = vrot.lane.b32.xlu0 %v10610_v56, %s9380_s28 }
 0x362   :  { %4031 = vrot.lane.b32.xlu1 %v10834_v28, %s9379_s27 }
 0x363   :  { %4207 = vrot.lane.b32.xlu0 %v10727_v42, %s9380_s28  ;;  %v7671_v42 = vld [vmem:[%s13505_s3 + $0x4a8] sm:$0xff] }
 0x364   :  { %v3658_v6 = vpop.permute.xlu0 %3657  ;;  %v8364_v63 = vpack.c.bf16 %v7673_v16, %v7671_v42  ;;  %v4383_v16 = vrot.slane %v10855_v53, 2 }
 0x365   :  { %7654 = vmatmul.mubr.msk.f32.vlgmr.msra.gmra.mrb[14].mxu1 %vm2556_vm11, %v3658_v6  ;;  %v7693_v6 = vld [vmem:[%s13505_s3 + $0x518] sm:$0xff] }
 0x366   :  { %4035 = vrot.lane.b32.xlu1 %v10892_v4, %s9379_s27  ;;  %3759 = vmatprep.mubr.f32.mxu1 %v13511_v3 }
 0x367   :  { %4211 = vrot.lane.b32.xlu0 %v10799_v60, %s9380_s28  ;;  %8359 = vmatpush1.bf16.msra.mxu1 %v8358_v44  ;;  %v7675_v60 = vld [vmem:[%s13505_s3 + $0x4c8] sm:$0xff] }
 0x368   :  { %8361 = vmatprep.subr.bf16.mxu1 %v8360_v11  ;;  %v8368_v40 = vpack.c.bf16 %v7677_v55, %v7675_v60  ;;  %v7691_v44 = vld [vmem:[%s13505_s3 + $0x508] sm:$0xff]  ;;  %v4376_v11 = vrot.slane %v10772_v59, 2 }
 0x369   :  { %v8376_v22 = vpack.c.bf16 %v7693_v6, %v7691_v44 }
 0x36a   :  { %4205 = vrot.lane.b32.xlu1 %v10660_v19, %s9380_s28  ;;  %v7674_v19 = vld [vmem:[%s13505_s3 + $0x4c0] sm:$0xff]  ;;  %v11023_v42 = vsel %vm796_vm5, %v4376_v11, %v4377_v52  ;;  %v5288_v52 = vrot.slane %v10682_v35, 3  ;;  %v5295_v11 = vrot.slane %v10789_v32, 3 }
 0x36b   :  { %4215 = vrot.lane.b32.xlu0 %v10864_v29, %s9380_s28  ;;  %8363 = vmatpush1.bf16.msra.mxu1 %v8362_v13  ;;  %v4371_v29 = vrot.slane %v10705_v50, 2  ;;  %v8370_v2 = vpack.c.bf16 %v7676_v7, %v7674_v19  ;;  %v4367_v13 = vrot.slane %v10622_v15, 2  ;;  %v4386_v19 = vrot.slane %v10882_v0, 2 }
 0x36c   :  { %8365 = vmatprep.subr.bf16.mxu1 %v8364_v63  ;;  %v4382_v63 = vrot.slane %v10844_v49, 2  ;;  %v4385_v7 = vrot.slane %v10876_v34, 2  ;;  %v11127_v6 = vsel %vm1173_vm6, %v5288_v52, %v5289_v31  ;;  %v7694_v52 = vld [vmem:[%s13505_s3 + $0x520] sm:$0xff] }
 0x36d   :  { %v11006_v17 = vsel %vm796_vm5, %v4370_v23, %v4371_v29  ;;  %13554 = vst [vmem:[#allocation15_spill] sm:$0xff] %v11127_v6 }
 0x36e   :  { %4209 = vrot.lane.b32.xlu1 %v10762_v54, %s9380_s28  ;;  %v8372_v54 = vpack.c.bf16 %v7681_v27, %v7679_v46  ;;  %v11037_v37 = vsel %vm796_vm5, %v4382_v63, %v4383_v16  ;;  %v11065_v29 = vsel %vm796_vm5, %v4385_v7, %v4386_v19  ;;  %v5285_v63 = vrot.slane %v10622_v15, 3 }
 0x36f   :  { %4575 = vrot.lane.b32.xlu0 %v10984_v61, %s9377_s9  ;;  %8367 = vmatpush1.bf16.msra.mxu1 %v8366_v38  ;;  %v4379_v38 = vrot.slane %v10814_v8, 2  ;;  %v5292_v7 = vrot.slane %v10746_v39, 3 }
 0x370   :  { %v3660_v45 = vpop.permute.xlu1 %3659  ;;  %8369 = vmatprep.subr.bf16.mxu1 %v8368_v40 }
 0x371   :  { %7655 = vmatmul.mubr.msk.f32.gmra.mrb[0].mxu1 %vm2556_vm11, %v3660_v45  ;;  %v11056_v40 = vsel %vm796_vm5, %v4379_v38, %v4380_v26  ;;  %v5282_v45 = vrot.slane %v10589_v14, 3  ;;  %v5300_v26 = vrot.slane %v10844_v49, 3 }
 0x372   :  { %4213 = vrot.lane.b32.xlu1 %v10834_v28, %s9380_s28  ;;  %3765 = vmatprep.mubr.f32.mxu1 %v13511_v3  ;;  %v4368_v28 = vrot.slane %v10632_v47, 2 }
 0x373   :  { %4579 = vrot.lane.b32.xlu0 %v11006_v17, %s9377_s9  ;;  %8371 = vmatpush1.bf16.msra.mxu1 %v8370_v2  ;;  %v5283_v2 = vrot.slane %v10600_v41, 3 }
 0x374   :  { %8373 = vmatprep.subr.bf16.mxu1 %v8372_v54  ;;  %v11033_v20 = vsel %vm796_vm5, %v4367_v13, %v4368_v28  ;;  %v5301_v13 = vrot.slane %v10855_v53, 3 }
 0x375   :  { %v11117_v5 = vsel %vm1173_vm6, %v5282_v45, %v5283_v2  ;;  %v5291_v45 = vrot.slane %v10742_v1, 3 }
 0x376   :  { %4217 = vrot.lane.b32.xlu1 %v10892_v4, %s9380_s28  ;;  %v4373_v4 = vrot.slane %v10742_v1, 2  ;;  %13553 = vst [vmem:[#allocation14_spill] sm:$0xff] %v11117_v5 }
 0x377   :  { %4583 = vrot.lane.b32.xlu0 %v11023_v42, %s9377_s9  ;;  %8375 = vmatpush1.bf16.msra.mxu1 %v8374_v9  ;;  %v5294_v9 = vrot.slane %v10772_v59, 3 }
 0x378   :  { %8377 = vmatprep.subr.bf16.mxu1 %v8376_v22  ;;  %v11045_v55 = vsel %vm796_vm5, %v4373_v4, %v4374_v33  ;;  %v5286_v22 = vrot.slane %v10632_v47, 3  ;;  %v7690_v33 = vld [vmem:[%s13505_s3 + $0x500] sm:$0xff]  ;;  %v7692_v4 = vld [vmem:[%s13505_s3 + $0x510] sm:$0xff] }
 0x379   :  { %v11137_v16 = vsel %vm1173_vm6, %v5294_v9, %v5295_v11  ;;  %v8378_v2 = vpack.c.bf16 %v7692_v4, %v7690_v33  ;;  %v7696_v11 = vld [vmem:[%s13505_s3 + $0x530] sm:$0xff]  ;;  %v7701_v33 = vld [vmem:[%s13505_s3 + $0x558] sm:$0xff] }
 0x37a   :  { %4577 = vrot.lane.b32.xlu1 %v11033_v20, %s9377_s9  ;;  %13555 = vst [vmem:[#allocation16_spill] sm:$0xff] %v11137_v16  ;;  %v11156_v19 = vsel %vm1173_vm6, %v5285_v63, %v5286_v22  ;;  %v11184_v22 = vsel %vm1173_vm6, %v5291_v45, %v5292_v7  ;;  %v7699_v63 = vld [vmem:[%s13505_s3 + $0x548] sm:$0xff]  ;;  %v8382_v4 = vpack.c.bf16 %v7696_v11, %v7694_v52  ;;  %v7698_v7 = vld [vmem:[%s13505_s3 + $0x540] sm:$0xff]  ;;  %v5304_v45 = vrot.slane %v10882_v0, 3  ;;  %v7705_v52 = vld [vmem:[%s13505_s3 + $0x578] sm:$0xff] }
 0x37b   :  { %4587 = vrot.lane.b32.xlu0 %v11037_v37, %s9377_s9  ;;  %13556 = vst [vmem:[#allocation17_spill] sm:$0xff] %v11156_v19  ;;  %13558 = vst [vmem:[#allocation19_spill] sm:$0xff] %v11184_v22 }
 0x37c   :  { %v3662_v60 = vpop.permute.xlu0 %3661 }
 0x37d   :  { %7656 = vmatmul.mubr.msk.f32.gmra.mrb[2].mxu1 %vm2556_vm11, %v3662_v60 }
 0x37e   :  { %4581 = vrot.lane.b32.xlu1 %v11045_v55, %s9377_s9  ;;  %3771 = vmatprep.mubr.f32.mxu1 %v13511_v3 }
 0x37f   :  { %4757 = vrot.lane.b32.xlu0 %v10984_v61, %s9378_s2 }
 0x382   :  { %4585 = vrot.lane.b32.xlu1 %v11056_v40, %s9377_s9 }
 0x383   :  { %4761 = vrot.lane.b32.xlu0 %v11006_v17, %s9378_s2 }
 0x386   :  { %4589 = vrot.lane.b32.xlu1 %v11065_v29, %s9377_s9 }
 0x387   :  { %4765 = vrot.lane.b32.xlu0 %v11023_v42, %s9378_s2 }
 0x388   :  { %v3664_v46 = vpop.permute.xlu1 %3663 }
 0x389   :  { %7657 = vmatmul.mubr.msk.f32.gmra.mrb[4].mxu1 %vm2556_vm11, %v3664_v46  ;;  %v7695_v46 = vld [vmem:[%s13505_s3 + $0x528] sm:$0xff] }
 0x38a   :  { %4759 = vrot.lane.b32.xlu1 %v11033_v20, %s9378_s2  ;;  %3777 = vmatprep.mubr.f32.mxu1 %v13511_v3 }
 0x38b   :  { %4769 = vrot.lane.b32.xlu0 %v11037_v37, %s9378_s2 }
 0x38e   :  { %4763 = vrot.lane.b32.xlu1 %v11045_v55, %s9378_s2 }
 0x38f   :  { %4939 = vrot.lane.b32.xlu0 %v10984_v61, %s9379_s27 }
 0x392   :  { %4767 = vrot.lane.b32.xlu1 %v11056_v40, %s9378_s2 }
 0x393   :  { %4943 = vrot.lane.b32.xlu0 %v11006_v17, %s9379_s27 }
 0x394   :  { %v3666_v27 = vpop.permute.xlu0 %3665 }
 0x395   :  { %7658 = vmatmul.mubr.msk.f32.gmra.mrb[6].mxu1 %vm2556_vm11, %v3666_v27  ;;  %v7697_v27 = vld [vmem:[%s13505_s3 + $0x538] sm:$0xff] }
 0x396   :  { %4771 = vrot.lane.b32.xlu1 %v11065_v29, %s9378_s2  ;;  %3783 = vmatprep.mubr.f32.mxu1 %v13511_v3  ;;  %v8380_v31 = vpack.c.bf16 %v7697_v27, %v7695_v46  ;;  %v7700_v46 = vld [vmem:[%s13505_s3 + $0x550] sm:$0xff] }
 0x397   :  { %4947 = vrot.lane.b32.xlu0 %v11023_v42, %s9379_s27  ;;  %v8386_v11 = vpack.c.bf16 %v7700_v46, %v7698_v7  ;;  %v7709_v7 = vld [vmem:[%s13505_s3 + $0x598] sm:$0xff] }
 0x39a   :  { %4941 = vrot.lane.b32.xlu1 %v11033_v20, %s9379_s27 }
 0x39b   :  { %4951 = vrot.lane.b32.xlu0 %v11037_v37, %s9379_s27 }
 0x39e   :  { %4945 = vrot.lane.b32.xlu1 %v11045_v55, %s9379_s27 }
 0x39f   :  { %5121 = vrot.lane.b32.xlu0 %v10984_v61, %s9380_s28 }
 0x3a0   :  { %v3668_v23 = vpop.permute.xlu1 %3667 }
 0x3a1   :  { %7659 = vmatmul.mubr.msk.f32.gmra.mrb[8].mxu1 %vm2556_vm11, %v3668_v23  ;;  %v11166_v23 = vsel %vm1173_vm6, %v5300_v26, %v5301_v13  ;;  %v5298_v13 = vrot.slane %v10818_v12, 3  ;;  %v8384_v26 = vpack.c.bf16 %v7701_v33, %v7699_v63  ;;  %v7702_v33 = vld [vmem:[%s13505_s3 + $0x560] sm:$0xff] }
 0x3a2   :  { %4949 = vrot.lane.b32.xlu1 %v11056_v40, %s9379_s27  ;;  %3789 = vmatprep.mubr.f32.mxu1 %v13511_v3  ;;  %13557 = vst [vmem:[#allocation18_spill] sm:$0xff] %v11166_v23 }
 0x3a3   :  { %5125 = vrot.lane.b32.xlu0 %v11006_v17, %s9380_s28 }
 0x3a6   :  { %4953 = vrot.lane.b32.xlu1 %v11065_v29, %s9379_s27 }
 0x3a7   :  { %5129 = vrot.lane.b32.xlu0 %v11023_v42, %s9380_s28 }
 0x3aa   :  { %5123 = vrot.lane.b32.xlu1 %v11033_v20, %s9380_s28 }
 0x3ab   :  { %5133 = vrot.lane.b32.xlu0 %v11037_v37, %s9380_s28 }
 0x3ac   :  { %v3670_v54 = vpop.permute.xlu0 %3669 }
 0x3ad   :  { %7660 = vmatmul.mubr.msk.f32.gmra.mrb[10].mxu1 %vm2556_vm11, %v3670_v54 }
 0x3ae   :  { %5127 = vrot.lane.b32.xlu1 %v11045_v55, %s9380_s28  ;;  %3795 = vmatprep.mubr.f32.mxu1 %v13511_v3 }
 0x3af   :  { %5493 = vrot.lane.b32.xlu0 %v11117_v5, %s9377_s9 }
 0x3b0   :  { %v3840_v44 = vpop.permute.xlu0 %3839 }
 0x3b2   :  { %5131 = vrot.lane.b32.xlu1 %v11056_v40, %s9380_s28 }
 0x3b3   :  { %5497 = vrot.lane.b32.xlu0 %v11127_v6, %s9377_s9 }
 0x3b4   :  { %v3844_v28 = vpop.permute.xlu0 %3843 }
 0x3b6   :  { %5135 = vrot.lane.b32.xlu1 %v11065_v29, %s9380_s28 }
 0x3b7   :  { %5501 = vrot.lane.b32.xlu0 %v11137_v16, %s9377_s9 }
 0x3b8   :  { %v3672_v60 = vpop.permute.xlu1 %3671 }
 0x3b9   :  { %v11152_v38 = vpop.permute.xlu0 %3847  ;;  %7661 = vmatmul.mubr.msk.f32.gmra.mrb[12].mxu1 %vm2556_vm11, %v3672_v60 }
 0x3ba   :  { %5495 = vrot.lane.b32.xlu1 %v11156_v19, %s9377_s9  ;;  %3935 = vmatprep.mubr.f32.mxu1 %v13511_v3 }
 0x3bb   :  { %5505 = vrot.lane.b32.xlu0 %v11166_v23, %s9377_s9 }
 0x3bc   :  { %v3842_v54 = vpop.permute.xlu1 %3841 }
 0x3bd   :  { %v11180_v9 = vpop.permute.xlu0 %3851  ;;  %7682 = vmatmul.mubr.msk.f32.vlgmr.msra.gmra.mrb[14].mxu1 %vm2556_vm11, %v3840_v44  ;;  %v5297_v44 = vrot.slane %v10814_v8, 3 }
 0x3be   :  { %5499 = vrot.lane.b32.xlu1 %v11184_v22, %s9377_s9  ;;  %8379 = vmatpush1.bf16.msra.mxu1 %v8378_v2 }
 0x3bf   :  { %5675 = vrot.lane.b32.xlu0 %v11117_v5, %s9378_s2  ;;  %3941 = vmatprep.mubr.f32.mxu1 %v13511_v3  ;;  %v11209_v2 = vsel %vm1173_vm6, %v5297_v44, %v5298_v13  ;;  %v7704_v44 = vld [vmem:[%s13505_s3 + $0x570] sm:$0xff] }
 0x3c0   :  { %v3846_v60 = vpop.permute.xlu1 %3845  ;;  %8381 = vmatprep.subr.bf16.mxu1 %v8380_v31  ;;  %13559 = vst [vmem:[#allocation20_spill] sm:$0xff] %v11209_v2  ;;  %v7703_v31 = vld [vmem:[%s13505_s3 + $0x568] sm:$0xff] }
 0x3c1   :  { %v11205_v27 = vpop.permute.xlu0 %4021  ;;  %7683 = vmatmul.mubr.msk.f32.gmra.mrb[0].mxu1 %vm2556_vm11, %v3842_v54  ;;  %v5303_v54 = vrot.slane %v10876_v34, 3  ;;  %v8388_v63 = vpack.c.bf16 %v7705_v52, %v7703_v31  ;;  %v7706_v31 = vld [vmem:[%s13505_s3 + $0x580] sm:$0xff]  ;;  %v7708_v52 = vld [vmem:[%s13505_s3 + $0x590] sm:$0xff] }
 0x3c2   :  { %5503 = vrot.lane.b32.xlu1 %v11209_v2, %s9377_s9  ;;  %3947 = vmatprep.mubr.f32.mxu1 %v13511_v3 }
 0x3c3   :  { %5679 = vrot.lane.b32.xlu0 %v11127_v6, %s9378_s2  ;;  %8383 = vmatpush1.bf16.msra.mxu1 %v8382_v4  ;;  %v11234_v4 = vsel %vm1173_vm6, %v5303_v54, %v5304_v45 }
 0x3c4   :  { %v3850_v13 = vpop.permute.xlu1 %3849  ;;  %8385 = vmatprep.subr.bf16.mxu1 %v8384_v26  ;;  %13560 = vst [vmem:[#allocation21_spill] sm:$0xff] %v11234_v4  ;;  %v7707_v26 = vld [vmem:[%s13505_s3 + $0x588] sm:$0xff] }
 0x3c5   :  { %v11230_v21 = vpop.permute.xlu0 %4025  ;;  %7684 = vmatmul.mubr.msk.f32.gmra.mrb[2].mxu1 %vm2556_vm11, %v3844_v28  ;;  %v8390_v28 = vpack.c.bf16 %v7704_v44, %v7702_v33  ;;  %v8392_v45 = vpack.c.bf16 %v7709_v7, %v7707_v26  ;;  %v8394_v33 = vpack.c.bf16 %v7708_v52, %v7706_v31  ;;  %v7495_v7 = vld [vmem:[%s13505_s3 + $0xa8] sm:$0xff] }
 0x3c6   :  { %5507 = vrot.lane.b32.xlu1 %v11234_v4, %s9377_s9  ;;  %3953 = vmatprep.mubr.f32.mxu1 %v13511_v3 }
 0x3c7   :  { %5683 = vrot.lane.b32.xlu0 %v11137_v16, %s9378_s2  ;;  %8387 = vmatpush1.bf16.msra.mxu1 %v8386_v11  ;;  %v7719_v11 = vld [vmem:[%s13505_s3 + $0x5a8] sm:$0xff] }
 0x3c8   :  { %v11247_v46 = vpop.permute.xlu1 %3853  ;;  %8389 = vmatprep.subr.bf16.mxu1 %v8388_v63  ;;  %v7721_v63 = vld [vmem:[%s13505_s3 + $0x5b8] sm:$0xff] }
 0x3c9   :  { %v11255_v54 = vpop.permute.xlu0 %4029  ;;  %7685 = vmatmul.mubr.msk.f32.gmra.mrb[4].mxu1 %vm2556_vm11, %v3846_v60  ;;  %v8396_v60 = vpack.c.bf16 %v7721_v63, %v7719_v11  ;;  %v7501_v63 = vld [vmem:[%s13505_s3 + $0xd8] sm:$0xff] }
 0x3ca   :  { %5677 = vrot.lane.b32.xlu1 %v11156_v19, %s9378_s2  ;;  %3959 = vmatprep.mubr.f32.mxu1 %v13511_v3 }
 0x3cb   :  { %5687 = vrot.lane.b32.xlu0 %v11166_v23, %s9378_s2  ;;  %8391 = vmatpush1.bf16.msra.mxu1 %v8390_v28  ;;  %v7494_v28 = vld [vmem:[%s13505_s3 + $0xa0] sm:$0xff] }
 0x3cc   :  { %v11269_v44 = vpop.permute.xlu1 %4023  ;;  %8393 = vmatprep.subr.bf16.mxu1 %v8392_v45  ;;  %v8236_v45 = vpack.c.bf16 %v7497_v24, %v7495_v7  ;;  %v7499_v24 = vld [vmem:[%s13505_s3 + $0xc8] sm:$0xff] }
 0x3cd   :  { %v11271_v26 = vpop.permute.xlu0 %4033  ;;  %7686 = vmatmul.mubr.msk.f32.gmra.mrb[6].mxu1 %vm2556_vm11, %v11152_v38  ;;  %v7496_v38 = vld [vmem:[%s13505_s3 + $0xb0] sm:$0xff] }
 0x3ce   :  { %5681 = vrot.lane.b32.xlu1 %v11184_v22, %s9378_s2  ;;  %3965 = vmatprep.mubr.f32.mxu1 %v13511_v3  ;;  %v8238_v31 = vpack.c.bf16 %v7496_v38, %v7494_v28  ;;  %v7503_v38 = vld [vmem:[%s13505_s3 + $0xe8] sm:$0xff] }
 0x3cf   :  { %5857 = vrot.lane.b32.xlu0 %v11117_v5, %s9379_s27  ;;  %8395 = vmatpush1.bf16.msra.mxu1 %v8394_v33  ;;  %v8240_v33 = vpack.c.bf16 %v7501_v63, %v7499_v24  ;;  %v7502_v24 = vld [vmem:[%s13505_s3 + $0xe0] sm:$0xff] }
 0x3d0   :  { %v11292_v52 = vpop.permute.xlu1 %4027  ;;  %8397 = vmatprep.subr.bf16.mxu1 %v8396_v60  ;;  %8237 = vmatprep.subr.bf16.mxu0 %v8236_v45  ;;  %v7498_v60 = vld [vmem:[%s13505_s3 + $0xc0] sm:$0xff] }
 0x3d1   :  { %v11294_v11 = vpop.permute.xlu0 %4203  ;;  %7687 = vmatmul.mubr.msk.f32.gmra.mrb[8].mxu1 %vm2556_vm11, %v3850_v13  ;;  %8239 = vmatpush1.bf16.msra.mxu0 %v8238_v31  ;;  %v7500_v13 = vld [vmem:[%s13505_s3 + $0xd0] sm:$0xff]  ;;  %v7505_v31 = vld [vmem:[%s13505_s3 + $0xf8] sm:$0xff] }
 0x3d2   :  { %5685 = vrot.lane.b32.xlu1 %v11209_v2, %s9378_s2  ;;  %3971 = vmatprep.mubr.f32.mxu1 %v13511_v3  ;;  %v8242_v7 = vpack.c.bf16 %v7500_v13, %v7498_v60  ;;  %v8244_v63 = vpack.c.bf16 %v7505_v31, %v7503_v38  ;;  %v7720_v60 = vld [vmem:[%s13505_s3 + $0x5b0] sm:$0xff]  ;;  %v7723_v31 = vld [vmem:[%s13505_s3 + $0x5c8] sm:$0xff] }
 0x3d3   :  { %5861 = vrot.lane.b32.xlu0 %v11127_v6, %s9379_s27  ;;  %8241 = vmatprep.subr.bf16.mxu0 %v8240_v33  ;;  %v7718_v33 = vld [vmem:[%s13505_s3 + $0x5a0] sm:$0xff] }
 0x3d4   :  { %v11314_v28 = vpop.permute.xlu1 %4031 }
 0x3d5   :  { %v11316_v45 = vpop.permute.xlu0 %4207  ;;  %7688 = vmatmul.mubr.msk.f32.gmra.mrb[10].mxu1 %vm2556_vm11, %v11180_v9  ;;  %8243 = vmatpush1.bf16.msra.mxu0 %v8242_v7  ;;  %v7504_v9 = vld [vmem:[%s13505_s3 + $0xf0] sm:$0xff] }
 0x3d6   :  { %5689 = vrot.lane.b32.xlu1 %v11234_v4, %s9378_s2  ;;  %3977 = vmatprep.mubr.f32.mxu1 %v13511_v3  ;;  %v8246_v13 = vpack.c.bf16 %v7504_v9, %v7502_v24  ;;  %v7725_v3 = vld [vmem:[%s13505_s3 + $0x5d8] sm:$0xff]  ;;  %v7507_v24 = vld [vmem:[%s13505_s3 + $0x108] sm:$0xff]  ;;  %v8398_v9 = vpack.c.bf16 %v7720_v60, %v7718_v33  ;;  %v7722_v33 = vld [vmem:[%s13505_s3 + $0x5c0] sm:$0xff] }
 0x3d7   :  { %5865 = vrot.lane.b32.xlu0 %v11137_v16, %s9379_s27  ;;  %8245 = vmatprep.subr.bf16.mxu0 %v8244_v63  ;;  %v13561_v63 = vmov 0.0   ;;  %v8400_v62 = vpack.c.bf16 %v7725_v3, %v7723_v31  ;;  %v7724_v60 = vld [vmem:[%s13505_s3 + $0x5d0] sm:$0xff]  ;;  %v7729_v3 = vld [vmem:[%s13505_s3 + $0x5f8] sm:$0xff]  ;;  %v7511_v31 = vld [vmem:[%s13505_s3 + $0x128] sm:$0xff] }
 0x3d8   :  { %v11343_v7 = vpop.permute.xlu1 %4035  ;;  %v8404_v25 = vpack.c.bf16 %v7729_v3, %v7727_v48  ;;  %v7733_v48 = vld [vmem:[%s13505_s3 + $0x618] sm:$0xff]  ;;  %v7732_v3 = vld [vmem:[%s13505_s3 + $0x610] sm:$0xff] }
 0x3d9   :  { %v11345_v38 = vpop.permute.xlu0 %4211  ;;  %7689 = vmatmul.mubr.msk.f32.gmra.mrb[12].mxu1 %vm2556_vm11, %v11247_v46  ;;  %8247 = vmatpush1.bf16.msra.mxu0 %v8246_v13  ;;  %v7509_v46 = vld [vmem:[%s13505_s3 + $0x118] sm:$0xff]  ;;  %v7508_v13 = vld [vmem:[%s13505_s3 + $0x110] sm:$0xff] }
 0x3da   :  { %5859 = vrot.lane.b32.xlu1 %v11156_v19, %s9379_s27  ;;  %4117 = vmatprep.mubr.f32.mxu1 %v13561_v63  ;;  %v8248_v56 = vpack.c.bf16 %v7509_v46, %v7507_v24  ;;  %v8250_v36 = vpack.c.bf16 %v7508_v13, %v7506_v58  ;;  %v7513_v24 = vld [vmem:[%s13505_s3 + $0x138] sm:$0xff]  ;;  %v8402_v46 = vpack.c.bf16 %v7724_v60, %v7722_v33  ;;  %v7730_v60 = vld [vmem:[%s13505_s3 + $0x600] sm:$0xff] }
 0x3db   :  { %5869 = vrot.lane.b32.xlu0 %v11166_v23, %s9379_s27  ;;  %v8252_v58 = vpack.c.bf16 %v7513_v24, %v7511_v31  ;;  %v7728_v31 = vld [vmem:[%s13505_s3 + $0x5f0] sm:$0xff] }
 0x3dc   :  { %v11372_v43 = vpop.permute.xlu1 %4205  ;;  %8249 = vmatprep.subr.bf16.mxu0 %v8248_v56  ;;  %v7512_v56 = vld [vmem:[%s13505_s3 + $0x130] sm:$0xff] }
 0x3dd   :  { %v11383_v51 = vpop.permute.xlu0 %4215  ;;  %7710 = vmatmul.mubr.msk.f32.vlgmr.msra.gmra.mrb[14].mxu1 %vm2556_vm11, %v11205_v27  ;;  %v7510_v27 = vld [vmem:[%s13505_s3 + $0x120] sm:$0xff]  ;;  %8251 = vmatpush1.bf16.msra.mxu0 %v8250_v36 }
 0x3de   :  { %5863 = vrot.lane.b32.xlu1 %v11184_v22, %s9379_s27  ;;  %8399 = vmatpush1.bf16.msra.mxu1 %v8398_v9  ;;  %v7726_v9 = vld [vmem:[%s13505_s3 + $0x5e0] sm:$0xff]  ;;  %v8254_v24 = vpack.c.bf16 %v7512_v56, %v7510_v27  ;;  %v7735_v27 = vld [vmem:[%s13505_s3 + $0x628] sm:$0xff]  ;;  %v8410_v56 = vpack.c.bf16 %v7732_v3, %v7730_v60  ;;  %v6201_v3 = vrot.slane %v10600_v41, 4  ;;  %v6204_v41 = vrot.slane %v10632_v47, 4  ;;  %v7525_v47 = vld [vmem:[%s13505_s3 + $0x158] sm:$0xff] }
 0x3df   :  { %6039 = vrot.lane.b32.xlu0 %v11117_v5, %s9380_s28  ;;  %4123 = vmatprep.mubr.f32.mxu1 %v13561_v63  ;;  %v8406_v36 = vpack.c.bf16 %v7728_v31, %v7726_v9  ;;  %v7734_v9 = vld [vmem:[%s13505_s3 + $0x620] sm:$0xff]  ;;  %v7736_v31 = vld [vmem:[%s13505_s3 + $0x630] sm:$0xff] }
 0x3e0   :  { %v11407_v13 = vpop.permute.xlu1 %4209  ;;  %8401 = vmatprep.subr.bf16.mxu1 %v8400_v62  ;;  %v7731_v62 = vld [vmem:[%s13505_s3 + $0x608] sm:$0xff]  ;;  %8253 = vmatprep.subr.bf16.mxu0 %v8252_v58  ;;  %v7782_v5 = vld [vmem:[%s13505_s3 + $0x720] sm:$0xff] }
 0x3e1   :  { %v11415_v57 = vpop.permute.xlu0 %4575  ;;  %7711 = vmatmul.mubr.msk.f32.gmra.mrb[0].mxu1 %vm2556_vm11, %v11269_v44  ;;  %v8408_v33 = vpack.c.bf16 %v7733_v48, %v7731_v62  ;;  %8255 = vmatpush1.bf16.msra.mxu0 %v8254_v24  ;;  %v7747_v62 = vld [vmem:[%s13505_s3 + $0x648] sm:$0xff]  ;;  %v7749_v48 = vld [vmem:[%s13505_s3 + $0x658] sm:$0xff] }
 0x3e2   :  { %5867 = vrot.lane.b32.xlu1 %v11209_v2, %s9379_s27  ;;  %4129 = vmatprep.mubr.f32.mxu1 %v13561_v63 }
 0x3e3   :  { %6043 = vrot.lane.b32.xlu0 %v11127_v6, %s9380_s28  ;;  %8403 = vmatpush1.bf16.msra.mxu1 %v8402_v46 }
 0x3e4   :  { %v11430_v44 = vpop.permute.xlu1 %4213  ;;  %8405 = vmatprep.subr.bf16.mxu1 %v8404_v25  ;;  %v7737_v25 = vld [vmem:[%s13505_s3 + $0x638] sm:$0xff] }
 0x3e5   :  { %v11438_v58 = vpop.permute.xlu0 %4579  ;;  %7712 = vmatmul.mubr.msk.f32.gmra.mrb[2].mxu1 %vm2556_vm11, %v11230_v21  ;;  %v8412_v21 = vpack.c.bf16 %v7737_v25, %v7735_v27  ;;  %v6200_v25 = vrot.slane %v10589_v14, 4 }
 0x3e6   :  { %5871 = vrot.lane.b32.xlu1 %v11234_v4, %s9379_s27  ;;  %4135 = vmatprep.mubr.f32.mxu1 %v13561_v63 }
 0x3e7   :  { %6047 = vrot.lane.b32.xlu0 %v11137_v16, %s9380_s28  ;;  %8407 = vmatpush1.bf16.msra.mxu1 %v8406_v36  ;;  %v8414_v36 = vpack.c.bf16 %v7736_v31, %v7734_v9  ;;  %v6203_v9 = vrot.slane %v10622_v15, 4  ;;  %v6212_v16 = vrot.slane %v10772_v59, 4 }
 0x3e8   :  { %v11453_v46 = vpop.permute.xlu1 %4217  ;;  %8409 = vmatprep.subr.bf16.mxu1 %v8408_v33 }
 0x3e9   :  { %v11461_v24 = vpop.permute.xlu0 %4583  ;;  %7713 = vmatmul.mubr.msk.f32.gmra.mrb[4].mxu1 %vm2556_vm11, %v11292_v52  ;;  %v8416_v52 = vpack.c.bf16 %v7749_v48, %v7747_v62  ;;  %v11518_v62 = vsel %vm147_vm0, %v6203_v9, %v6204_v41  ;;  %v6207_v48 = vrot.slane %v10705_v50, 4  ;;  %v7751_v50 = vld [vmem:[%s13505_s3 + $0x668] sm:$0xff]  ;;  %v7753_v9 = vld [vmem:[%s13505_s3 + $0x678] sm:$0xff] }
 0x3ea   :  { %6041 = vrot.lane.b32.xlu1 %v11156_v19, %s9380_s28  ;;  %4141 = vmatprep.mubr.f32.mxu1 %v13561_v63  ;;  %13563 = vst [vmem:[#allocation23_spill] sm:$0xff] %v11518_v62 }
 0x3eb   :  { %6051 = vrot.lane.b32.xlu0 %v11166_v23, %s9380_s28  ;;  %8411 = vmatpush1.bf16.msra.mxu1 %v8410_v56  ;;  %v8420_v23 = vpack.c.bf16 %v7753_v9, %v7751_v50  ;;  %v6213_v50 = vrot.slane %v10789_v32, 4  ;;  %v7756_v32 = vld [vmem:[%s13505_s3 + $0x690] sm:$0xff] }
 0x3ec   :  { %v11476_v33 = vpop.permute.xlu1 %4577  ;;  %8413 = vmatprep.subr.bf16.mxu1 %v8412_v21 }
 0x3ed   :  { %v11478_v60 = vpop.permute.xlu0 %4587  ;;  %7714 = vmatmul.mubr.msk.f32.gmra.mrb[6].mxu1 %vm2556_vm11, %v11255_v54  ;;  %v11496_v54 = vsel %vm147_vm0, %v6200_v25, %v6201_v3  ;;  %v6206_v25 = vrot.slane %v10682_v35, 4 }
 0x3ee   :  { %6045 = vrot.lane.b32.xlu1 %v11184_v22, %s9380_s28  ;;  %4147 = vmatprep.mubr.f32.mxu1 %v13561_v63  ;;  %13562 = vst [vmem:[#allocation22_spill] sm:$0xff] %v11496_v54 }
 0x3ef   :  { %2731 = vrot.lane.b32.xlu0 %v10589_v14, %s9377_s9  ;;  %8415 = vmatpush1.bf16.msra.mxu1 %v8414_v36 }
 0x3f0   :  { %v11488_v27 = vpop.permute.xlu1 %4581  ;;  %8417 = vmatprep.subr.bf16.mxu1 %v8416_v52  ;;  %v7748_v52 = vld [vmem:[%s13505_s3 + $0x650] sm:$0xff] }
 0x3f1   :  { %v11491_v56 = vpop.permute.xlu0 %4757  ;;  %7715 = vmatmul.mubr.msk.f32.gmra.mrb[8].mxu1 %vm2556_vm11, %v11314_v28  ;;  %v7523_v28 = vld [vmem:[%s13505_s3 + $0x148] sm:$0xff] }
 0x3f2   :  { %6049 = vrot.lane.b32.xlu1 %v11209_v2, %s9380_s28  ;;  %4153 = vmatprep.mubr.f32.mxu1 %v13561_v63  ;;  %v8256_v36 = vpack.c.bf16 %v7525_v47, %v7523_v28  ;;  %v11546_v28 = vsel %vm147_vm0, %v6206_v25, %v6207_v48  ;;  %v6210_v47 = vrot.slane %v10746_v39, 4  ;;  %v7750_v48 = vld [vmem:[%s13505_s3 + $0x660] sm:$0xff]  ;;  %v7752_v25 = vld [vmem:[%s13505_s3 + $0x670] sm:$0xff]  ;;  %v7755_v39 = vld [vmem:[%s13505_s3 + $0x688] sm:$0xff] }
 0x3f3   :  { %6411 = vrot.lane.b32.xlu0 %v11496_v54, %s9377_s9  ;;  %13564 = vst [vmem:[#allocation24_spill] sm:$0xff] %v11546_v28 }
 0x3f4   :  { %v11504_v21 = vpop.permute.xlu1 %4585  ;;  %8257 = vmatprep.subr.bf16.mxu0 %v8256_v36 }
 0x3f5   :  { %v11507_v31 = vpop.permute.xlu0 %4761  ;;  %7716 = vmatmul.mubr.msk.f32.gmra.mrb[10].mxu1 %vm2556_vm11, %v11271_v26  ;;  %v7746_v26 = vld [vmem:[%s13505_s3 + $0x640] sm:$0xff] }
 0x3f6   :  { %6053 = vrot.lane.b32.xlu1 %v11234_v4, %s9380_s28  ;;  %4159 = vmatprep.mubr.f32.mxu1 %v13561_v63  ;;  %v8418_v36 = vpack.c.bf16 %v7748_v52, %v7746_v26  ;;  %v6209_v4 = vrot.slane %v10742_v1, 4  ;;  %v7757_v26 = vld [vmem:[%s13505_s3 + $0x698] sm:$0xff] }
 0x3f7   :  { %6413 = vrot.lane.b32.xlu0 %v11518_v62, %s9377_s9  ;;  %v8424_v30 = vpack.c.bf16 %v7757_v26, %v7755_v39  ;;  %v6215_v26 = vrot.slane %v10814_v8, 4 }
 0x3f8   :  { %v11532_v3 = vpop.permute.xlu1 %4589  ;;  %v11574_v52 = vsel %vm147_vm0, %v6209_v4, %v6210_v47  ;;  %v7754_v4 = vld [vmem:[%s13505_s3 + $0x680] sm:$0xff] }
 0x3f9   :  { %v11535_v41 = vpop.permute.xlu0 %4765  ;;  %7717 = vmatmul.mubr.msk.f32.gmra.mrb[12].mxu1 %vm2556_vm11, %v11343_v7  ;;  %13565 = vst [vmem:[#allocation25_spill] sm:$0xff] %v11574_v52 }
 0x3fa   :  { %2733 = vrot.lane.b32.xlu1 %v10622_v15, %s9377_s9  ;;  %4299 = vmatprep.mubr.f32.mxu1 %v13561_v63 }
 0x3fb   :  { %6415 = vrot.lane.b32.xlu0 %v11546_v28, %s9377_s9 }
 0x3fc   :  { %v11554_v7 = vpop.permute.xlu1 %4759 }
 0x3fd   :  { %v11563_v2 = vpop.permute.xlu0 %4769  ;;  %7738 = vmatmul.mubr.msk.f32.vlgmr.msra.gmra.mrb[14].mxu1 %vm2556_vm11, %v11294_v11  ;;  %v8422_v11 = vpack.c.bf16 %v7752_v25, %v7750_v48  ;;  %v11602_v48 = vsel %vm147_vm0, %v6212_v16, %v6213_v50  ;;  %v6216_v25 = vrot.slane %v10818_v12, 4  ;;  %v7758_v16 = vld [vmem:[%s13505_s3 + $0x6a0] sm:$0xff]  ;;  %v7760_v50 = vld [vmem:[%s13505_s3 + $0x6b0] sm:$0xff] }
 0x3fe   :  { %2735 = vrot.lane.b32.xlu1 %v10682_v35, %s9377_s9  ;;  %8419 = vmatpush1.bf16.msra.mxu1 %v8418_v36  ;;  %v7759_v36 = vld [vmem:[%s13505_s3 + $0x6a8] sm:$0xff]  ;;  %13566 = vst [vmem:[#allocation26_spill] sm:$0xff] %v11602_v48 }
 0x3ff   :  { %6417 = vrot.lane.b32.xlu0 %v11574_v52, %s9377_s9  ;;  %4305 = vmatprep.mubr.f32.mxu1 %v13561_v63 }
 0x400   :  { %v11582_v9 = vpop.permute.xlu1 %4763  ;;  %8421 = vmatprep.subr.bf16.mxu1 %v8420_v23  ;;  %v7761_v23 = vld [vmem:[%s13505_s3 + $0x6b8] sm:$0xff] }
 0x401   :  { %v11591_v47 = vpop.permute.xlu0 %4939  ;;  %7739 = vmatmul.mubr.msk.f32.gmra.mrb[0].mxu1 %vm2556_vm11, %v11372_v43  ;;  %v8426_v43 = vpack.c.bf16 %v7756_v32, %v7754_v4  ;;  %v8428_v18 = vpack.c.bf16 %v7761_v23, %v7759_v36  ;;  %v11630_v4 = vsel %vm147_vm0, %v6215_v26, %v6216_v25  ;;  %v6219_v32 = vrot.slane %v10855_v53, 4  ;;  %v7762_v25 = vld [vmem:[%s13505_s3 + $0x6c0] sm:$0xff]  ;;  %v7764_v26 = vld [vmem:[%s13505_s3 + $0x6d0] sm:$0xff] }
 0x402   :  { %2737 = vrot.lane.b32.xlu1 %v10742_v1, %s9377_s9  ;;  %4311 = vmatprep.mubr.f32.mxu1 %v13561_v63  ;;  %v6218_v23 = vrot.slane %v10844_v49, 4 }
 0x403   :  { %6419 = vrot.lane.b32.xlu0 %v11602_v48, %s9377_s9  ;;  %8423 = vmatpush1.bf16.msra.mxu1 %v8422_v11  ;;  %v7763_v11 = vld [vmem:[%s13505_s3 + $0x6c8] sm:$0xff] }
 0x404   :  { %v11610_v39 = vpop.permute.xlu1 %4767  ;;  %8425 = vmatprep.subr.bf16.mxu1 %v8424_v30  ;;  %v7765_v30 = vld [vmem:[%s13505_s3 + $0x6d8] sm:$0xff] }
 0x405   :  { %v11619_v12 = vpop.permute.xlu0 %4943  ;;  %7740 = vmatmul.mubr.msk.f32.gmra.mrb[2].mxu1 %vm2556_vm11, %v11316_v45  ;;  %v8430_v45 = vpack.c.bf16 %v7760_v50, %v7758_v16  ;;  %v8432_v22 = vpack.c.bf16 %v7765_v30, %v7763_v11  ;;  %v11658_v16 = vsel %vm147_vm0, %v6218_v23, %v6219_v32  ;;  %v6222_v50 = vrot.slane %v10882_v0, 4 }
 0x406   :  { %2739 = vrot.lane.b32.xlu1 %v10772_v59, %s9377_s9  ;;  %4317 = vmatprep.mubr.f32.mxu1 %v13561_v63  ;;  %v6221_v30 = vrot.slane %v10876_v34, 4 }
 0x407   :  { %6421 = vrot.lane.b32.xlu0 %v11630_v4, %s9377_s9  ;;  %8427 = vmatpush1.bf16.msra.mxu1 %v8426_v43  ;;  %v7775_v43 = vld [vmem:[%s13505_s3 + $0x6e8] sm:$0xff] }
 0x408   :  { %v11638_v36 = vpop.permute.xlu1 %4771  ;;  %8429 = vmatprep.subr.bf16.mxu1 %v8428_v18  ;;  %v7777_v18 = vld [vmem:[%s13505_s3 + $0x6f8] sm:$0xff]  ;;  %v11674_v23 = vsel %vm147_vm0, %v6221_v30, %v6222_v50  ;;  %v7780_v30 = vld [vmem:[%s13505_s3 + $0x710] sm:$0xff] }
 0x409   :  { %v11647_v53 = vpop.permute.xlu0 %4947  ;;  %7741 = vmatmul.mubr.msk.f32.gmra.mrb[4].mxu1 %vm2556_vm11, %v11407_v13  ;;  %v8434_v13 = vpack.c.bf16 %v7764_v26, %v7762_v25  ;;  %v8436_v6 = vpack.c.bf16 %v7777_v18, %v7775_v43  ;;  %v7781_v43 = vld [vmem:[%s13505_s3 + $0x718] sm:$0xff] }
 0x40a   :  { %2741 = vrot.lane.b32.xlu1 %v10814_v8, %s9377_s9  ;;  %4323 = vmatprep.mubr.f32.mxu1 %v13561_v63 }
 0x40b   :  { %6423 = vrot.lane.b32.xlu0 %v11658_v16, %s9377_s9  ;;  %8431 = vmatpush1.bf16.msra.mxu1 %v8430_v45 }
 0x40c   :  { %v11666_v11 = vpop.permute.xlu1 %4941  ;;  %8433 = vmatprep.subr.bf16.mxu1 %v8432_v22 }
 0x40d   :  { %v11669_v32 = vpop.permute.xlu0 %4951  ;;  %7742 = vmatmul.mubr.msk.f32.gmra.mrb[6].mxu1 %vm2556_vm11, %v11345_v38 }
 0x40e   :  { %2743 = vrot.lane.b32.xlu1 %v10844_v49, %s9377_s9  ;;  %4329 = vmatprep.mubr.f32.mxu1 %v13561_v63 }
 0x40f   :  { %6425 = vrot.lane.b32.xlu0 %v11674_v23, %s9377_s9  ;;  %8435 = vmatpush1.bf16.msra.mxu1 %v8434_v13  ;;  %v7778_v13 = vld [vmem:[%s13505_s3 + $0x700] sm:$0xff] }
 0x410   :  { %v11681_v0 = vpop.permute.xlu1 %4945  ;;  %8437 = vmatprep.subr.bf16.mxu1 %v8436_v6  ;;  %v7774_v6 = vld [vmem:[%s13505_s3 + $0x6e0] sm:$0xff] }
 0x411   :  { %v11683_v22 = vpop.permute.xlu0 %5121  ;;  %7743 = vmatmul.mubr.msk.f32.gmra.mrb[8].mxu1 %vm2556_vm11, %v11430_v44  ;;  %v7776_v44 = vld [vmem:[%s13505_s3 + $0x6f0] sm:$0xff] }
 0x412   :  { %2745 = vrot.lane.b32.xlu1 %v10876_v34, %s9377_s9  ;;  %4335 = vmatprep.mubr.f32.mxu1 %v13561_v63  ;;  %v8438_v18 = vpack.c.bf16 %v7776_v44, %v7774_v6  ;;  %v7783_v6 = vld [vmem:[%s13505_s3 + $0x728] sm:$0xff]  ;;  %v7785_v44 = vld [vmem:[%s13505_s3 + $0x738] sm:$0xff] }
 0x413   :  { %6593 = vrot.lane.b32.xlu0 %v11496_v54, %s9378_s2 }
 0x414   :  { %v11692_v38 = vpop.permute.xlu1 %4949 }
 0x415   :  { %v11694_v45 = vpop.permute.xlu0 %5125  ;;  %7744 = vmatmul.mubr.msk.f32.gmra.mrb[10].mxu1 %vm2556_vm11, %v11383_v51  ;;  %v7779_v51 = vld [vmem:[%s13505_s3 + $0x708] sm:$0xff] }
 0x416   :  { %2913 = vrot.lane.b32.xlu1 %v10589_v14, %s9378_s2  ;;  %4341 = vmatprep.mubr.f32.mxu1 %v13561_v63 }
 0x417   :  { %6595 = vrot.lane.b32.xlu0 %v11518_v62, %s9378_s2 }
 0x418   :  { %v11709_v25 = vpop.permute.xlu1 %4953 }
 0x419   :  { %v11711_v26 = vpop.permute.xlu0 %5129  ;;  %7745 = vmatmul.mubr.msk.f32.gmra.mrb[12].mxu1 %vm2556_vm11, %v11453_v46  ;;  %v8440_v46 = vpack.c.bf16 %v7781_v43, %v7779_v51  ;;  %v8442_v51 = vpack.c.bf16 %v7780_v30, %v7778_v13  ;;  %v8446_v13 = vpack.c.bf16 %v7784_v10, %v7782_v5  ;;  %v7791_v10 = vld [vmem:[%s13505_s3 + $0x768] sm:$0xff]  ;;  %v7793_v5 = vld [vmem:[%s13505_s3 + $0x778] sm:$0xff] }
 0x41a   :  { %2915 = vrot.lane.b32.xlu1 %v10622_v15, %s9378_s2  ;;  %4489 = vmatprep.mubr.f32.mxu1 %v13561_v63 }
 0x41b   :  { %6597 = vrot.lane.b32.xlu0 %v11546_v28, %s9378_s2 }
 0x41c   :  { %v11726_v50 = vpop.permute.xlu1 %5123 }
 0x41d   :  { %v11734_v19 = vpop.permute.xlu0 %5133  ;;  %7766 = vmatmul.mubr.msk.f32.vlgmr.msra.gmra.mrb[14].mxu1 %vm2556_vm11, %v10984_v61  ;;  %v8444_v61 = vpack.c.bf16 %v7785_v44, %v7783_v6  ;;  %v7786_v6 = vld [vmem:[%s13505_s3 + $0x740] sm:$0xff]  ;;  %v7788_v44 = vld [vmem:[%s13505_s3 + $0x750] sm:$0xff] }
 0x41e   :  { %13567 = vst [vmem:[#allocation27_spill] sm:$0xff] %v11734_v19  ;;  %2917 = vrot.lane.b32.xlu1 %v10682_v35, %s9378_s2  ;;  %8439 = vmatpush1.bf16.msra.mxu1 %v8438_v18  ;;  %v7787_v18 = vld [vmem:[%s13505_s3 + $0x748] sm:$0xff] }
 0x41f   :  { %6599 = vrot.lane.b32.xlu0 %v11574_v52, %s9378_s2  ;;  %4495 = vmatprep.mubr.f32.mxu1 %v13561_v63 }
 0x420   :  { %v11749_v43 = vpop.permute.xlu1 %5127  ;;  %8441 = vmatprep.subr.bf16.mxu1 %v8440_v46  ;;  %v7789_v46 = vld [vmem:[%s13505_s3 + $0x758] sm:$0xff] }
 0x421   :  { %v11757_v19 = vpop.permute.xlu0 %5493  ;;  %7767 = vmatmul.mubr.msk.f32.gmra.mrb[0].mxu1 %vm2556_vm11, %v11033_v20  ;;  %v8448_v20 = vpack.c.bf16 %v7789_v46, %v7787_v18  ;;  %v7790_v18 = vld [vmem:[%s13505_s3 + $0x760] sm:$0xff]  ;;  %v7792_v46 = vld [vmem:[%s13505_s3 + $0x770] sm:$0xff] }
 0x422   :  { %13568 = vst [vmem:[#allocation28_spill] sm:$0xff] %v11757_v19  ;;  %2919 = vrot.lane.b32.xlu1 %v10742_v1, %s9378_s2  ;;  %4501 = vmatprep.mubr.f32.mxu1 %v13561_v63 }
 0x423   :  { %6601 = vrot.lane.b32.xlu0 %v11602_v48, %s9378_s2  ;;  %8443 = vmatpush1.bf16.msra.mxu1 %v8442_v51  ;;  %v8450_v51 = vpack.c.bf16 %v7788_v44, %v7786_v6  ;;  %v8454_v6 = vpack.c.bf16 %v7792_v46, %v7790_v18  ;;  %v7804_v18 = vld [vmem:[%s13505_s3 + $0x790] sm:$0xff] }
 0x424   :  { %v11772_v30 = vpop.permute.xlu1 %5131  ;;  %8445 = vmatprep.subr.bf16.mxu1 %v8444_v61 }
 0x425   :  { %v11780_v19 = vpop.permute.xlu0 %5497  ;;  %7768 = vmatmul.mubr.msk.f32.gmra.mrb[2].mxu1 %vm2556_vm11, %v11006_v17  ;;  %v8452_v17 = vpack.c.bf16 %v7793_v5, %v7791_v10 }
 0x426   :  { %13569 = vst [vmem:[#allocation29_spill] sm:$0xff] %v11780_v19  ;;  %2921 = vrot.lane.b32.xlu1 %v10772_v59, %s9378_s2  ;;  %4507 = vmatprep.mubr.f32.mxu1 %v13561_v63 }
 0x427   :  { %6603 = vrot.lane.b32.xlu0 %v11630_v4, %s9378_s2  ;;  %8447 = vmatpush1.bf16.msra.mxu1 %v8446_v13  ;;  %v7803_v13 = vld [vmem:[%s13505_s3 + $0x788] sm:$0xff] }
 0x428   :  { %v11795_v61 = vpop.permute.xlu1 %5135  ;;  %8449 = vmatprep.subr.bf16.mxu1 %v8448_v20  ;;  %v7805_v20 = vld [vmem:[%s13505_s3 + $0x798] sm:$0xff] }
 0x429   :  { %v11803_v19 = vpop.permute.xlu0 %5501  ;;  %7769 = vmatmul.mubr.msk.f32.gmra.mrb[4].mxu1 %vm2556_vm11, %v11045_v55  ;;  %v8456_v55 = vpack.c.bf16 %v7805_v20, %v7803_v13  ;;  %v7809_v20 = vld [vmem:[%s13505_s3 + $0x7b8] sm:$0xff] }
 0x42a   :  { %2923 = vrot.lane.b32.xlu1 %v10814_v8, %s9378_s2  ;;  %4513 = vmatprep.mubr.f32.mxu1 %v13561_v63 }
 0x42b   :  { %6605 = vrot.lane.b32.xlu0 %v11658_v16, %s9378_s2  ;;  %8451 = vmatpush1.bf16.msra.mxu1 %v8450_v51 }
 0x42c   :  { %v11818_v44 = vpop.permute.xlu1 %5495  ;;  %8453 = vmatprep.subr.bf16.mxu1 %v8452_v17 }
 0x42d   :  { %v11820_v10 = vpop.permute.xlu0 %5505  ;;  %7770 = vmatmul.mubr.msk.f32.gmra.mrb[6].mxu1 %vm2556_vm11, %v11023_v42 }
 0x42e   :  { %2925 = vrot.lane.b32.xlu1 %v10844_v49, %s9378_s2  ;;  %4519 = vmatprep.mubr.f32.mxu1 %v13561_v63 }
 0x42f   :  { %6607 = vrot.lane.b32.xlu0 %v11674_v23, %s9378_s2  ;;  %8455 = vmatpush1.bf16.msra.mxu1 %v8454_v6 }
 0x430   :  { %v11829_v5 = vpop.permute.xlu1 %5499  ;;  %8457 = vmatprep.subr.bf16.mxu1 %v8456_v55 }
 0x431   :  { %v11831_v51 = vpop.permute.xlu0 %5675  ;;  %7771 = vmatmul.mubr.msk.f32.gmra.mrb[8].mxu1 %vm2556_vm11, %v11056_v40  ;;  %v7802_v40 = vld [vmem:[%s13505_s3 + $0x780] sm:$0xff] }
 0x432   :  { %13570 = vst [vmem:[#allocation30_spill] sm:$0xff] %v11831_v51  ;;  %2927 = vrot.lane.b32.xlu1 %v10876_v34, %s9378_s2  ;;  %4525 = vmatprep.mubr.f32.mxu1 %v13561_v63  ;;  %v8458_v6 = vpack.c.bf16 %v7804_v18, %v7802_v40  ;;  %v7811_v40 = vld [vmem:[%s13505_s3 + $0x7c8] sm:$0xff]  ;;  %v7813_v18 = vld [vmem:[%s13505_s3 + $0x7d8] sm:$0xff] }
 0x433   :  { %6775 = vrot.lane.b32.xlu0 %v11496_v54, %s9379_s27 }
 0x434   :  { %v11840_v42 = vpop.permute.xlu1 %5503 }
 0x435   :  { %v11842_v17 = vpop.permute.xlu0 %5679  ;;  %7772 = vmatmul.mubr.msk.f32.gmra.mrb[10].mxu1 %vm2556_vm11, %v11037_v37  ;;  %v7807_v37 = vld [vmem:[%s13505_s3 + $0x7a8] sm:$0xff] }
 0x436   :  { %13571 = vst [vmem:[#allocation31_spill] sm:$0xff] %v11842_v17  ;;  %3095 = vrot.lane.b32.xlu1 %v10589_v14, %s9379_s27  ;;  %4531 = vmatprep.mubr.f32.mxu1 %v13561_v63  ;;  %v7808_v17 = vld [vmem:[%s13505_s3 + $0x7b0] sm:$0xff] }
 0x437   :  { %6777 = vrot.lane.b32.xlu0 %v11518_v62, %s9379_s27 }
 0x438   :  { %v11857_v46 = vpop.permute.xlu1 %5507 }
 0x439   :  { %v11859_v13 = vpop.permute.xlu0 %5683  ;;  %7773 = vmatmul.mubr.msk.f32.gmra.mrb[12].mxu1 %vm2556_vm11, %v11065_v29  ;;  %v8460_v29 = vpack.c.bf16 %v7809_v20, %v7807_v37 }
 0x43a   :  { %13572 = vst [vmem:[#allocation32_spill] sm:$0xff] %v11859_v13  ;;  %3097 = vrot.lane.b32.xlu1 %v10622_v15, %s9379_s27  ;;  %4671 = vmatprep.mubr.f32.mxu1 %v13561_v63  ;;  %v7806_v13 = vld [vmem:[%s13505_s3 + $0x7a0] sm:$0xff] }
 0x43b   :  { %6779 = vrot.lane.b32.xlu0 %v11546_v28, %s9379_s27  ;;  %v8462_v37 = vpack.c.bf16 %v7808_v17, %v7806_v13  ;;  %v7815_v17 = vld [vmem:[%s13505_s3 + $0x7e8] sm:$0xff]  ;;  %v7817_v13 = vld [vmem:[%s13505_s3 + $0x7f8] sm:$0xff] }
 0x43c   :  { %v11874_v55 = vpop.permute.xlu1 %5677 }
 0x43d   :  { %13573 = vst [vmem:[#allocation33_spill] sm:$0xff] %v11874_v55  ;;  %v11882_v51 = vpop.permute.xlu0 %5687  ;;  %7794 = vmatmul.mubr.msk.f32.vlgmr.msra.gmra.mrb[14].mxu1 %vm2556_vm11, %v11415_v57  ;;  %v8464_v57 = vpack.c.bf16 %v7813_v18, %v7811_v40  ;;  %v7814_v18 = vld [vmem:[%s13505_s3 + $0x7e0] sm:$0xff] }
 0x43e   :  { %13574 = vst [vmem:[#allocation34_spill] sm:$0xff] %v11882_v51  ;;  %8459 = vmatpush1.bf16.msra.mxu1 %v8458_v6  ;;  %3099 = vrot.lane.b32.xlu1 %v10682_v35, %s9379_s27  ;;  %v7810_v51 = vld [vmem:[%s13505_s3 + $0x7c0] sm:$0xff]  ;;  %v7812_v6 = vld [vmem:[%s13505_s3 + $0x7d0] sm:$0xff] }
 0x43f   :  { %6781 = vrot.lane.b32.xlu0 %v11574_v52, %s9379_s27  ;;  %4677 = vmatprep.mubr.f32.mxu1 %v13561_v63 }
 0x440   :  { %v11897_v20 = vpop.permute.xlu1 %5681  ;;  %8461 = vmatprep.subr.bf16.mxu1 %v8460_v29  ;;  %v8466_v29 = vpack.c.bf16 %v7812_v6, %v7810_v51  ;;  %v7819_v51 = vld [vmem:[%s13505_s3 + $0x808] sm:$0xff] }
 0x441   :  { %13575 = vst [vmem:[#allocation35_spill] sm:$0xff] %v11897_v20  ;;  %v11905_v55 = vpop.permute.xlu0 %5857  ;;  %7795 = vmatmul.mubr.msk.f32.gmra.mrb[0].mxu1 %vm2556_vm11, %v11476_v33  ;;  %v8468_v33 = vpack.c.bf16 %v7817_v13, %v7815_v17  ;;  %v7818_v17 = vld [vmem:[%s13505_s3 + $0x800] sm:$0xff]  ;;  %v7820_v13 = vld [vmem:[%s13505_s3 + $0x810] sm:$0xff] }
 0x442   :  { %13576 = vst [vmem:[#allocation36_spill] sm:$0xff] %v11905_v55  ;;  %3101 = vrot.lane.b32.xlu1 %v10742_v1, %s9379_s27  ;;  %4683 = vmatprep.mubr.f32.mxu1 %v13561_v63  ;;  %v7816_v55 = vld [vmem:[%s13505_s3 + $0x7f0] sm:$0xff] }
 0x443   :  { %6783 = vrot.lane.b32.xlu0 %v11602_v48, %s9379_s27  ;;  %8463 = vmatpush1.bf16.msra.mxu1 %v8462_v37  ;;  %v7821_v37 = vld [vmem:[%s13505_s3 + $0x818] sm:$0xff] }
 0x444   :  { %v11920_v40 = vpop.permute.xlu1 %5685  ;;  %8465 = vmatprep.subr.bf16.mxu1 %v8464_v57  ;;  %v8470_v57 = vpack.c.bf16 %v7816_v55, %v7814_v18  ;;  %v7831_v55 = vld [vmem:[%s13505_s3 + $0x828] sm:$0xff] }
 0x445   :  { %v11928_v20 = vpop.permute.xlu0 %5861  ;;  %7796 = vmatmul.mubr.msk.f32.gmra.mrb[2].mxu1 %vm2556_vm11, %v11438_v58  ;;  %v8472_v58 = vpack.c.bf16 %v7821_v37, %v7819_v51 }
 0x446   :  { %13577 = vst [vmem:[#allocation37_spill] sm:$0xff] %v11928_v20  ;;  %3103 = vrot.lane.b32.xlu1 %v10772_v59, %s9379_s27  ;;  %4689 = vmatprep.mubr.f32.mxu1 %v13561_v63 }
 0x447   :  { %6785 = vrot.lane.b32.xlu0 %v11630_v4, %s9379_s27  ;;  %8467 = vmatpush1.bf16.msra.mxu1 %v8466_v29  ;;  %v7833_v29 = vld [vmem:[%s13505_s3 + $0x838] sm:$0xff] }
 0x448   :  { %v11943_v6 = vpop.permute.xlu1 %5689  ;;  %8469 = vmatprep.subr.bf16.mxu1 %v8468_v33  ;;  %v8474_v33 = vpack.c.bf16 %v7820_v13, %v7818_v17  ;;  %v7832_v17 = vld [vmem:[%s13505_s3 + $0x830] sm:$0xff] }
 0x449   :  { %v11951_v20 = vpop.permute.xlu0 %5865  ;;  %7797 = vmatmul.mubr.msk.f32.gmra.mrb[4].mxu1 %vm2556_vm11, %v11488_v27  ;;  %v8476_v27 = vpack.c.bf16 %v7833_v29, %v7831_v55 }
 0x44a   :  { %3105 = vrot.lane.b32.xlu1 %v10814_v8, %s9379_s27  ;;  %4695 = vmatprep.mubr.f32.mxu1 %v13561_v63 }
 0x44b   :  { %6787 = vrot.lane.b32.xlu0 %v11658_v16, %s9379_s27  ;;  %8471 = vmatpush1.bf16.msra.mxu1 %v8470_v57 }
 0x44c   :  { %v11966_v18 = vpop.permute.xlu1 %5859  ;;  %8473 = vmatprep.subr.bf16.mxu1 %v8472_v58 }
 0x44d   :  { %v11968_v51 = vpop.permute.xlu0 %5869  ;;  %7798 = vmatmul.mubr.msk.f32.gmra.mrb[6].mxu1 %vm2556_vm11, %v11461_v24 }
 0x44e   :  { %3107 = vrot.lane.b32.xlu1 %v10844_v49, %s9379_s27  ;;  %4701 = vmatprep.mubr.f32.mxu1 %v13561_v63 }
 0x44f   :  { %6789 = vrot.lane.b32.xlu0 %v11674_v23, %s9379_s27  ;;  %8475 = vmatpush1.bf16.msra.mxu1 %v8474_v33 }
 0x450   :  { %v11977_v37 = vpop.permute.xlu1 %5863  ;;  %8477 = vmatprep.subr.bf16.mxu1 %v8476_v27 }
 0x451   :  { %v11979_v57 = vpop.permute.xlu0 %6039  ;;  %7799 = vmatmul.mubr.msk.f32.gmra.mrb[8].mxu1 %vm2556_vm11, %v11504_v21  ;;  %v7830_v21 = vld [vmem:[%s13505_s3 + $0x820] sm:$0xff] }
 0x452   :  { %3109 = vrot.lane.b32.xlu1 %v10876_v34, %s9379_s27  ;;  %4707 = vmatprep.mubr.f32.mxu1 %v13561_v63  ;;  %v8478_v29 = vpack.c.bf16 %v7832_v17, %v7830_v21  ;;  %v7839_v21 = vld [vmem:[%s13505_s3 + $0x868] sm:$0xff] }
 0x453   :  { %6957 = vrot.lane.b32.xlu0 %v11496_v54, %s9380_s28 }
 0x454   :  { %v11988_v24 = vpop.permute.xlu1 %5867 }
 0x455   :  { %v11990_v58 = vpop.permute.xlu0 %6043  ;;  %7800 = vmatmul.mubr.msk.f32.gmra.mrb[10].mxu1 %vm2556_vm11, %v11478_v60  ;;  %v7837_v60 = vld [vmem:[%s13505_s3 + $0x858] sm:$0xff] }
 0x456   :  { %3277 = vrot.lane.b32.xlu1 %v10589_v14, %s9380_s28  ;;  %4713 = vmatprep.mubr.f32.mxu1 %v13561_v63  ;;  %v7835_v14 = vld [vmem:[%s13505_s3 + $0x848] sm:$0xff] }
 0x457   :  { %6959 = vrot.lane.b32.xlu0 %v11518_v62, %s9380_s28  ;;  %v7834_v62 = vld [vmem:[%s13505_s3 + $0x840] sm:$0xff] }
 0x458   :  { %v12005_v13 = vpop.permute.xlu1 %5871 }
 0x459   :  { %v12007_v55 = vpop.permute.xlu0 %6047  ;;  %7801 = vmatmul.mubr.msk.f32.gmra.mrb[12].mxu1 %vm2556_vm11, %v11532_v3  ;;  %v8480_v3 = vpack.c.bf16 %v7837_v60, %v7835_v14  ;;  %v7522_v60 = vld [vmem:[%s13505_s3 + $0x140] sm:$0xff] }
 0x45a   :  { %13578 = vst [vmem:[#allocation38_spill] sm:$0xff] %v12007_v55  ;;  %3279 = vrot.lane.b32.xlu1 %v10622_v15, %s9380_s28  ;;  %4853 = vmatprep.mubr.f32.mxu1 %v13561_v63  ;;  %v7836_v15 = vld [vmem:[%s13505_s3 + $0x850] sm:$0xff]  ;;  %v7526_v55 = vld [vmem:[%s13505_s3 + $0x160] sm:$0xff] }
 0x45b   :  { %6961 = vrot.lane.b32.xlu0 %v11546_v28, %s9380_s28  ;;  %v8482_v14 = vpack.c.bf16 %v7836_v15, %v7834_v62  ;;  %v7840_v62 = vld [vmem:[%s13505_s3 + $0x870] sm:$0xff]  ;;  %v7529_v15 = vld [vmem:[%s13505_s3 + $0x178] sm:$0xff] }
 0x45c   :  { %v12022_v33 = vpop.permute.xlu1 %6041 }
 0x45d   :  { %v12024_v27 = vpop.permute.xlu0 %6051  ;;  %7822 = vmatmul.mubr.msk.f32.vlgmr.msra.gmra.mrb[14].mxu1 %vm2556_vm11, %v11491_v56  ;;  %v7841_v56 = vld [vmem:[%s13505_s3 + $0x878] sm:$0xff] }
 0x45e   :  { %13579 = vst [vmem:[#allocation39_spill] sm:$0xff] %v12024_v27  ;;  %8479 = vmatpush1.bf16.msra.mxu1 %v8478_v29  ;;  %3281 = vrot.lane.b32.xlu1 %v10682_v35, %s9380_s28  ;;  %v7838_v35 = vld [vmem:[%s13505_s3 + $0x860] sm:$0xff]  ;;  %v7524_v29 = vld [vmem:[%s13505_s3 + $0x150] sm:$0xff] }
 0x45f   :  { %6963 = vrot.lane.b32.xlu0 %v11574_v52, %s9380_s28  ;;  %4859 = vmatprep.mubr.f32.mxu1 %v13561_v63  ;;  %v8484_v52 = vpack.c.bf16 %v7841_v56, %v7839_v21  ;;  %v7845_v21 = vld [vmem:[%s13505_s3 + $0x898] sm:$0xff]  ;;  %v8258_v56 = vpack.c.bf16 %v7524_v29, %v7522_v60  ;;  %v7531_v60 = vld [vmem:[%s13505_s3 + $0x188] sm:$0xff] }
 0x460   :  { %v12045_v17 = vpop.permute.xlu1 %6045  ;;  %8481 = vmatprep.subr.bf16.mxu1 %v8480_v3  ;;  %v7527_v3 = vld [vmem:[%s13505_s3 + $0x168] sm:$0xff]  ;;  %v7533_v29 = vld [vmem:[%s13505_s3 + $0x198] sm:$0xff] }
 0x461   :  { %v2732_v28 = vpop.permute.xlu0 %2731  ;;  %7823 = vmatmul.mubr.msk.f32.gmra.mrb[0].mxu1 %vm2556_vm11, %v11554_v7  ;;  %v7843_v7 = vld [vmem:[%s13505_s3 + $0x888] sm:$0xff]  ;;  %v8260_v27 = vpack.c.bf16 %v7529_v15, %v7527_v3  ;;  %v7849_v15 = vld [vmem:[%s13505_s3 + $0x8b8] sm:$0xff] }
 0x462   :  { %7514 = vmatmul.mubr.msk.f32.vlgmr.msra.gmra.mrb[48].mxu0 %vm2556_vm11, %v2732_v28  ;;  %3283 = vrot.lane.b32.xlu1 %v10742_v1, %s9380_s28  ;;  %v8486_v28 = vpack.c.bf16 %v7840_v62, %v7838_v35  ;;  %v7842_v1 = vld [vmem:[%s13505_s3 + $0x880] sm:$0xff]  ;;  %v7844_v35 = vld [vmem:[%s13505_s3 + $0x890] sm:$0xff]  ;;  %v7847_v3 = vld [vmem:[%s13505_s3 + $0x8a8] sm:$0xff] }
 0x463   :  { %6965 = vrot.lane.b32.xlu0 %v11602_v48, %s9380_s28  ;;  %4865 = vmatprep.mubr.f32.mxu1 %v13561_v63  ;;  %v7528_v48 = vld [vmem:[%s13505_s3 + $0x170] sm:$0xff]  ;;  %v8490_v62 = vpack.c.bf16 %v7844_v35, %v7842_v1  ;;  %v7861_v1 = vld [vmem:[%s13505_s3 + $0x8d8] sm:$0xff] }
 0x464   :  { %v12079_v54 = vpop.permute.xlu1 %6049  ;;  %8483 = vmatpush1.bf16.msra.mxu1 %v8482_v14  ;;  %2833 = vmatprep.mubr.f32.mxu0 %v13561_v63  ;;  %v8488_v14 = vpack.c.bf16 %v7845_v21, %v7843_v7  ;;  %v8264_v7 = vpack.c.bf16 %v7533_v29, %v7531_v60  ;;  %v7532_v21 = vld [vmem:[%s13505_s3 + $0x190] sm:$0xff]  ;;  %v7537_v35 = vld [vmem:[%s13505_s3 + $0x1b8] sm:$0xff] }
 0x465   :  { %7824 = vmatmul.mubr.msk.f32.gmra.mrb[2].mxu1 %vm2556_vm11, %v11507_v31  ;;  %8485 = vmatprep.subr.bf16.mxu1 %v8484_v52  ;;  %v8262_v31 = vpack.c.bf16 %v7528_v48, %v7526_v55  ;;  %v7848_v48 = vld [vmem:[%s13505_s3 + $0x8b0] sm:$0xff]  ;;  %v7530_v55 = vld [vmem:[%s13505_s3 + $0x180] sm:$0xff] }
 0x466   :  { %3285 = vrot.lane.b32.xlu1 %v10772_v59, %s9380_s28  ;;  %4871 = vmatprep.mubr.f32.mxu1 %v13561_v63  ;;  %v7846_v59 = vld [vmem:[%s13505_s3 + $0x8a0] sm:$0xff] }
 0x467   :  { %6967 = vrot.lane.b32.xlu0 %v11630_v4, %s9380_s28  ;;  %8259 = vmatpush1.bf16.msra.mxu0 %v8258_v56  ;;  %v8494_v56 = vpack.c.bf16 %v7848_v48, %v7846_v59  ;;  %v7540_v48 = vld [vmem:[%s13505_s3 + $0x1d0] sm:$0xff] }
 0x468   :  { %v12107_v52 = vpop.permute.xlu1 %6053  ;;  %8487 = vmatpush1.bf16.msra.mxu1 %v8486_v28  ;;  %8261 = vmatprep.subr.bf16.mxu0 %v8260_v27  ;;  %v7859_v28 = vld [vmem:[%s13505_s3 + $0x8c8] sm:$0xff] }
 0x469   :  { %7825 = vmatmul.mubr.msk.f32.gmra.mrb[4].mxu1 %vm2556_vm11, %v11582_v9  ;;  %8489 = vmatprep.subr.bf16.mxu1 %v8488_v14  ;;  %v8492_v9 = vpack.c.bf16 %v7849_v15, %v7847_v3  ;;  %v7535_v14 = vld [vmem:[%s13505_s3 + $0x1a8] sm:$0xff]  ;;  %v8496_v60 = vpack.c.bf16 %v7861_v1, %v7859_v28  ;;  %v7541_v3 = vld [vmem:[%s13505_s3 + $0x1d8] sm:$0xff] }
 0x46a   :  { %3287 = vrot.lane.b32.xlu1 %v10814_v8, %s9380_s28  ;;  %4877 = vmatprep.mubr.f32.mxu1 %v13561_v63  ;;  %v8266_v8 = vpack.c.bf16 %v7532_v21, %v7530_v55  ;;  %v7553_v55 = vld [vmem:[%s13505_s3 + $0x1f8] sm:$0xff]  ;;  %v7858_v21 = vld [vmem:[%s13505_s3 + $0x8c0] sm:$0xff] }
 0x46b   :  { %6969 = vrot.lane.b32.xlu0 %v11658_v16, %s9380_s28  ;;  %8263 = vmatpush1.bf16.msra.mxu0 %v8262_v31  ;;  %v7534_v31 = vld [vmem:[%s13505_s3 + $0x1a0] sm:$0xff]  ;;  %v7865_v28 = vld [vmem:[%s13505_s3 + $0x8f8] sm:$0xff] }
 0x46c   :  { %v2734_v27 = vpop.permute.xlu1 %2733  ;;  %8491 = vmatpush1.bf16.msra.mxu1 %v8490_v62  ;;  %8265 = vmatprep.subr.bf16.mxu0 %v8264_v7  ;;  %v7536_v62 = vld [vmem:[%s13505_s3 + $0x1b0] sm:$0xff]  ;;  %v7538_v7 = vld [vmem:[%s13505_s3 + $0x1c0] sm:$0xff] }
 0x46d   :  { %7515 = vmatmul.mubr.msk.f32.gmra.mrb[50].mxu0 %vm2556_vm11, %v2734_v27  ;;  %7826 = vmatmul.mubr.msk.f32.gmra.mrb[6].mxu1 %vm2556_vm11, %v11535_v41  ;;  %v8268_v41 = vpack.c.bf16 %v7537_v35, %v7535_v14  ;;  %v8270_v15 = vpack.c.bf16 %v7536_v62, %v7534_v31 }
 0x46e   :  { %3289 = vrot.lane.b32.xlu1 %v10844_v49, %s9380_s28  ;;  %2839 = vmatprep.mubr.f32.mxu0 %v13561_v63  ;;  %v7539_v49 = vld [vmem:[%s13505_s3 + $0x1c8] sm:$0xff] }
 0x46f   :  { %4883 = vmatprep.mubr.f32.mxu1 %v13561_v63  ;;  %8493 = vmatprep.subr.bf16.mxu1 %v8492_v9  ;;  %v8274_v9 = vpack.c.bf16 %v7540_v48, %v7538_v7  ;;  %v7870_v7 = vld [vmem:[%s13505_s3 + $0x920] sm:$0xff] }
 0x470   :  { %v2736_v29 = vpop.permute.xlu1 %2735  ;;  %8495 = vmatpush1.bf16.msra.mxu1 %v8494_v56  ;;  %8267 = vmatpush1.bf16.msra.mxu0 %v8266_v8  ;;  %v7863_v56 = vld [vmem:[%s13505_s3 + $0x8e8] sm:$0xff] }
 0x471   :  { %7516 = vmatmul.mubr.msk.f32.gmra.mrb[52].mxu0 %vm2556_vm11, %v2736_v29  ;;  %7827 = vmatmul.mubr.msk.f32.gmra.mrb[8].mxu1 %vm2556_vm11, %v11610_v39  ;;  %v8272_v39 = vpack.c.bf16 %v7541_v3, %v7539_v49  ;;  %v8500_v14 = vpack.c.bf16 %v7865_v28, %v7863_v56  ;;  %v7864_v29 = vld [vmem:[%s13505_s3 + $0x8f0] sm:$0xff]  ;;  %v7557_v56 = vld [vmem:[%s13505_s3 + $0x218] sm:$0xff] }
 0x472   :  { %3291 = vrot.lane.b32.xlu1 %v10876_v34, %s9380_s28  ;;  %2845 = vmatprep.mubr.f32.mxu0 %v13561_v63  ;;  %v7551_v34 = vld [vmem:[%s13505_s3 + $0x1e8] sm:$0xff]  ;;  %v7868_v3 = vld [vmem:[%s13505_s3 + $0x910] sm:$0xff] }
 0x473   :  { %4889 = vmatprep.mubr.f32.mxu1 %v13561_v63  ;;  %8497 = vmatprep.subr.bf16.mxu1 %v8496_v60  ;;  %v8276_v1 = vpack.c.bf16 %v7553_v55, %v7551_v34  ;;  %v7862_v60 = vld [vmem:[%s13505_s3 + $0x8e0] sm:$0xff] }
 0x474   :  { %v2738_v59 = vpop.permute.xlu1 %2737  ;;  %8269 = vmatprep.subr.bf16.mxu0 %v8268_v41  ;;  %v7869_v41 = vld [vmem:[%s13505_s3 + $0x918] sm:$0xff]  ;;  %v8502_v31 = vpack.c.bf16 %v7864_v29, %v7862_v60  ;;  %v7550_v55 = vld [vmem:[%s13505_s3 + $0x1e0] sm:$0xff] }
 0x475   :  { %7517 = vmatmul.mubr.msk.f32.gmra.mrb[54].mxu0 %vm2556_vm11, %v2738_v59  ;;  %7828 = vmatmul.mubr.msk.f32.gmra.mrb[10].mxu1 %vm2556_vm11, %v11563_v2  ;;  %v7860_v2 = vld [vmem:[%s13505_s3 + $0x8d0] sm:$0xff]  ;;  %v7873_v59 = vld [vmem:[%s13505_s3 + $0x938] sm:$0xff]  ;;  %v7554_v29 = vld [vmem:[%s13505_s3 + $0x200] sm:$0xff] }
 0x476   :  { %6971 = vrot.lane.b32.xlu1 %v11674_v23, %s9380_s28  ;;  %2851 = vmatprep.mubr.f32.mxu0 %v13561_v63  ;;  %v8498_v8 = vpack.c.bf16 %v7860_v2, %v7858_v21  ;;  %v7552_v21 = vld [vmem:[%s13505_s3 + $0x1f0] sm:$0xff]  ;;  %v7875_v2 = vld [vmem:[%s13505_s3 + $0x948] sm:$0xff] }
 0x477   :  { %4895 = vmatprep.mubr.f32.mxu1 %v13561_v63  ;;  %8271 = vmatpush1.bf16.msra.mxu0 %v8270_v15  ;;  %v7871_v15 = vld [vmem:[%s13505_s3 + $0x928] sm:$0xff] }
 0x478   :  { %v2740_v27 = vpop.permute.xlu1 %2739  ;;  %8273 = vmatprep.subr.bf16.mxu0 %v8272_v39  ;;  %v8508_v34 = vpack.c.bf16 %v7873_v59, %v7871_v15 }
 0x479   :  { %7518 = vmatmul.mubr.msk.f32.gmra.mrb[56].mxu0 %vm2556_vm11, %v2740_v27  ;;  %7829 = vmatmul.mubr.msk.f32.gmra.mrb[12].mxu1 %vm2556_vm11, %v11638_v36  ;;  %v7867_v36 = vld [vmem:[%s13505_s3 + $0x908] sm:$0xff] }
 0x47a   :  { %2857 = vmatprep.mubr.f32.mxu0 %v13561_v63  ;;  %5035 = vmatprep.mubr.f32.mxu1 %v13561_v63  ;;  %v8504_v49 = vpack.c.bf16 %v7869_v41, %v7867_v36  ;;  %v7555_v27 = vld [vmem:[%s13505_s3 + $0x208] sm:$0xff]  ;;  %v7556_v36 = vld [vmem:[%s13505_s3 + $0x210] sm:$0xff] }
 0x47b   :  { %8275 = vmatpush1.bf16.msra.mxu0 %v8274_v9  ;;  %v7877_v9 = vld [vmem:[%s13505_s3 + $0x958] sm:$0xff]  ;;  %v8280_v60 = vpack.c.bf16 %v7557_v56, %v7555_v27  ;;  %v7559_v41 = vld [vmem:[%s13505_s3 + $0x228] sm:$0xff] }
 0x47c   :  { %v2742_v35 = vpop.permute.xlu1 %2741  ;;  %8277 = vmatprep.subr.bf16.mxu0 %v8276_v1  ;;  %v8278_v1 = vpack.c.bf16 %v7552_v21, %v7550_v55  ;;  %v7569_v27 = vld [vmem:[%s13505_s3 + $0x278] sm:$0xff] }
 0x47d   :  { %7519 = vmatmul.mubr.msk.f32.gmra.mrb[58].mxu0 %vm2556_vm11, %v2742_v35  ;;  %7850 = vmatmul.mubr.msk.f32.vlgmr.msra.gmra.mrb[14].mxu1 %vm2556_vm11, %v11591_v47  ;;  %v7866_v47 = vld [vmem:[%s13505_s3 + $0x900] sm:$0xff]  ;;  %v8512_v35 = vpack.c.bf16 %v7877_v9, %v7875_v2  ;;  %v7564_v2 = vld [vmem:[%s13505_s3 + $0x250] sm:$0xff]  ;;  %v7567_v9 = vld [vmem:[%s13505_s3 + $0x268] sm:$0xff] }
 0x47e   :  { %8499 = vmatpush1.bf16.msra.mxu1 %v8498_v8  ;;  %2863 = vmatprep.mubr.f32.mxu0 %v13561_v63  ;;  %v8506_v39 = vpack.c.bf16 %v7868_v3, %v7866_v47  ;;  %v7876_v8 = vld [vmem:[%s13505_s3 + $0x950] sm:$0xff] }
 0x47f   :  { %5041 = vmatprep.mubr.f32.mxu1 %v13561_v63  ;;  %8501 = vmatprep.subr.bf16.mxu1 %v8500_v14 }
 0x480   :  { %v2744_v62 = vpop.permute.xlu1 %2743 }
 0x481   :  { %7520 = vmatmul.mubr.msk.f32.gmra.mrb[60].mxu0 %vm2556_vm11, %v2744_v62  ;;  %7851 = vmatmul.mubr.msk.f32.gmra.mrb[0].mxu1 %vm2556_vm11, %v11666_v11  ;;  %v7872_v11 = vld [vmem:[%s13505_s3 + $0x930] sm:$0xff]  ;;  %v7887_v62 = vld [vmem:[%s13505_s3 + $0x968] sm:$0xff] }
 0x482   :  { %2869 = vmatprep.mubr.f32.mxu0 %v13561_v63  ;;  %5047 = vmatprep.mubr.f32.mxu1 %v13561_v63  ;;  %v8510_v28 = vpack.c.bf16 %v7872_v11, %v7870_v7  ;;  %v7560_v7 = vld [vmem:[%s13505_s3 + $0x230] sm:$0xff]  ;;  %v7563_v11 = vld [vmem:[%s13505_s3 + $0x248] sm:$0xff] }
 0x483   :  { %8503 = vmatpush1.bf16.msra.mxu1 %v8502_v31  ;;  %v7561_v31 = vld [vmem:[%s13505_s3 + $0x238] sm:$0xff] }
 0x484   :  { %v2746_v48 = vpop.permute.xlu1 %2745  ;;  %8505 = vmatprep.subr.bf16.mxu1 %v8504_v49  ;;  %v7889_v49 = vld [vmem:[%s13505_s3 + $0x978] sm:$0xff]  ;;  %v8284_v15 = vpack.c.bf16 %v7561_v31, %v7559_v41 }
 0x485   :  { %7521 = vmatmul.mubr.msk.f32.gmra.mrb[62].mxu0 %vm2556_vm11, %v2746_v48  ;;  %7852 = vmatmul.mubr.msk.f32.gmra.mrb[2].mxu1 %vm2556_vm11, %v11619_v12  ;;  %v7874_v12 = vld [vmem:[%s13505_s3 + $0x940] sm:$0xff]  ;;  %v8516_v59 = vpack.c.bf16 %v7889_v49, %v7887_v62  ;;  %v7565_v48 = vld [vmem:[%s13505_s3 + $0x258] sm:$0xff] }
 0x486   :  { %3009 = vmatprep.mubr.f32.mxu0 %v13561_v63  ;;  %5053 = vmatprep.mubr.f32.mxu1 %v13561_v63  ;;  %v8514_v47 = vpack.c.bf16 %v7876_v8, %v7874_v12  ;;  %v8288_v21 = vpack.c.bf16 %v7565_v48, %v7563_v11  ;;  %v7568_v12 = vld [vmem:[%s13505_s3 + $0x270] sm:$0xff]  ;;  %v7579_v8 = vld [vmem:[%s13505_s3 + $0x288] sm:$0xff]  ;;  %v7893_v41 = vld [vmem:[%s13505_s3 + $0x998] sm:$0xff] }
 0x487   :  { %8507 = vmatpush1.bf16.msra.mxu1 %v8506_v39  ;;  %v7558_v39 = vld [vmem:[%s13505_s3 + $0x220] sm:$0xff]  ;;  %v7896_v11 = vld [vmem:[%s13505_s3 + $0x9b0] sm:$0xff]  ;;  %v7899_v48 = vld [vmem:[%s13505_s3 + $0x9c8] sm:$0xff] }
 0x488   :  { %v2914_v14 = vpop.permute.xlu1 %2913  ;;  %8509 = vmatprep.subr.bf16.mxu1 %v8508_v34  ;;  %v8286_v34 = vpack.c.bf16 %v7560_v7, %v7558_v39 }
 0x489   :  { %7542 = vmatmul.mubr.msk.f32.vlgmr.msra.gmra.mrb[48].mxu0 %vm2556_vm11, %v2914_v14  ;;  %7853 = vmatmul.mubr.msk.f32.gmra.mrb[4].mxu1 %vm2556_vm11, %v11681_v0  ;;  %v8282_v0 = vpack.c.bf16 %v7556_v36, %v7554_v29  ;;  %v7581_v14 = vld [vmem:[%s13505_s3 + $0x298] sm:$0xff]  ;;  %v7891_v36 = vld [vmem:[%s13505_s3 + $0x988] sm:$0xff] }
 0x48a   :  { %3015 = vmatprep.mubr.f32.mxu0 %v13561_v63  ;;  %5059 = vmatprep.mubr.f32.mxu1 %v13561_v63  ;;  %v8296_v31 = vpack.c.bf16 %v7581_v14, %v7579_v8  ;;  %v8520_v49 = vpack.c.bf16 %v7893_v41, %v7891_v36  ;;  %v7904_v14 = vld [vmem:[%s13505_s3 + $0x9f0] sm:$0xff]  ;;  %v7587_v41 = vld [vmem:[%s13505_s3 + $0x2c8] sm:$0xff] }
 0x48b   :  { %8511 = vmatpush1.bf16.msra.mxu1 %v8510_v28  ;;  %8279 = vmatpush1.bf16.msra.mxu0 %v8278_v1  ;;  %v8292_v1 = vpack.c.bf16 %v7569_v27, %v7567_v9  ;;  %v7578_v9 = vld [vmem:[%s13505_s3 + $0x280] sm:$0xff]  ;;  %v7580_v27 = vld [vmem:[%s13505_s3 + $0x290] sm:$0xff] }
 0x48c   :  { %v2916_v3 = vpop.permute.xlu1 %2915  ;;  %8513 = vmatprep.subr.bf16.mxu1 %v8512_v35  ;;  %8281 = vmatprep.subr.bf16.mxu0 %v8280_v60  ;;  %v7886_v35 = vld [vmem:[%s13505_s3 + $0x960] sm:$0xff]  ;;  %v8298_v8 = vpack.c.bf16 %v7580_v27, %v7578_v9  ;;  %v7584_v36 = vld [vmem:[%s13505_s3 + $0x2b0] sm:$0xff]  ;;  %v13580_v27 = vld [vmem:[#allocation27_spill] sm:$0xff] }
 0x48d   :  { %7543 = vmatmul.mubr.msk.f32.gmra.mrb[50].mxu0 %vm2556_vm11, %v2916_v3  ;;  %7854 = vmatmul.mubr.msk.f32.gmra.mrb[6].mxu1 %vm2556_vm11, %v11647_v53  ;;  %v7562_v53 = vld [vmem:[%s13505_s3 + $0x240] sm:$0xff]  ;;  %v7892_v3 = vld [vmem:[%s13505_s3 + $0x990] sm:$0xff] }
 0x48e   :  { %3021 = vmatprep.mubr.f32.mxu0 %v13561_v63  ;;  %5065 = vmatprep.mubr.f32.mxu1 %v13561_v63  ;;  %v8290_v56 = vpack.c.bf16 %v7564_v2, %v7562_v53  ;;  %v7596_v9 = vld [vmem:[%s13505_s3 + $0x310] sm:$0xff] }
 0x48f   :  { %8515 = vmatpush1.bf16.msra.mxu1 %v8514_v47  ;;  %8283 = vmatpush1.bf16.msra.mxu0 %v8282_v0  ;;  %v7890_v0 = vld [vmem:[%s13505_s3 + $0x980] sm:$0xff] }
 0x490   :  { %v2918_v55 = vpop.permute.xlu1 %2917  ;;  %8285 = vmatprep.subr.bf16.mxu0 %v8284_v15  ;;  %8517 = vmatprep.subr.bf16.mxu1 %v8516_v59  ;;  %v7897_v15 = vld [vmem:[%s13505_s3 + $0x9b8] sm:$0xff]  ;;  %v8522_v59 = vpack.c.bf16 %v7892_v3, %v7890_v0 }
 0x491   :  { %7544 = vmatmul.mubr.msk.f32.gmra.mrb[52].mxu0 %vm2556_vm11, %v2918_v55  ;;  %7855 = vmatmul.mubr.msk.f32.gmra.mrb[8].mxu1 %vm2556_vm11, %v11692_v38  ;;  %v7566_v38 = vld [vmem:[%s13505_s3 + $0x260] sm:$0xff] }
 0x492   :  { %3027 = vmatprep.mubr.f32.mxu0 %v13561_v63  ;;  %5071 = vmatprep.mubr.f32.mxu1 %v13561_v63  ;;  %v8294_v60 = vpack.c.bf16 %v7568_v12, %v7566_v38  ;;  %v7585_v38 = vld [vmem:[%s13505_s3 + $0x2b8] sm:$0xff] }
 0x493   :  { %8287 = vmatpush1.bf16.msra.mxu0 %v8286_v34  ;;  %v7901_v34 = vld [vmem:[%s13505_s3 + $0x9d8] sm:$0xff] }
 0x494   :  { %v2920_v28 = vpop.permute.xlu1 %2919  ;;  %8289 = vmatprep.subr.bf16.mxu0 %v8288_v21  ;;  %v7898_v21 = vld [vmem:[%s13505_s3 + $0x9c0] sm:$0xff]  ;;  %v8528_v2 = vpack.c.bf16 %v7901_v34, %v7899_v48  ;;  %v7592_v34 = vld [vmem:[%s13505_s3 + $0x2f0] sm:$0xff] }
 0x495   :  { %7545 = vmatmul.mubr.msk.f32.gmra.mrb[54].mxu0 %vm2556_vm11, %v2920_v28  ;;  %7856 = vmatmul.mubr.msk.f32.gmra.mrb[10].mxu1 %vm2556_vm11, %v11669_v32  ;;  %v7888_v32 = vld [vmem:[%s13505_s3 + $0x970] sm:$0xff]  ;;  %v7905_v28 = vld [vmem:[%s13505_s3 + $0x9f8] sm:$0xff] }
 0x496   :  { %3033 = vmatprep.mubr.f32.mxu0 %v13561_v63  ;;  %5077 = vmatprep.mubr.f32.mxu1 %v13561_v63  ;;  %v8518_v62 = vpack.c.bf16 %v7888_v32, %v7886_v35 }
 0x497   :  { %8291 = vmatpush1.bf16.msra.mxu0 %v8290_v56  ;;  %v7903_v56 = vld [vmem:[%s13505_s3 + $0x9e8] sm:$0xff] }
 0x498   :  { %v2922_v29 = vpop.permute.xlu1 %2921  ;;  %8293 = vmatprep.subr.bf16.mxu0 %v8292_v1  ;;  %v7583_v1 = vld [vmem:[%s13505_s3 + $0x2a8] sm:$0xff]  ;;  %v8532_v32 = vpack.c.bf16 %v7905_v28, %v7903_v56  ;;  %v7914_v56 = vld [vmem:[%s13505_s3 + $0xa00] sm:$0xff]  ;;  %v7916_v28 = vld [vmem:[%s13505_s3 + $0xa10] sm:$0xff] }
 0x499   :  { %7546 = vmatmul.mubr.msk.f32.gmra.mrb[56].mxu0 %vm2556_vm11, %v2922_v29  ;;  %7857 = vmatmul.mubr.msk.f32.gmra.mrb[12].mxu1 %vm2556_vm11, %v11709_v25  ;;  %v7895_v25 = vld [vmem:[%s13505_s3 + $0x9a8] sm:$0xff]  ;;  %v7582_v29 = vld [vmem:[%s13505_s3 + $0x2a0] sm:$0xff] }
 0x49a   :  { %3039 = vmatprep.mubr.f32.mxu0 %v13561_v63  ;;  %5217 = vmatprep.mubr.f32.mxu1 %v13561_v63  ;;  %v8524_v7 = vpack.c.bf16 %v7897_v15, %v7895_v25  ;;  %v7586_v15 = vld [vmem:[%s13505_s3 + $0x2c0] sm:$0xff] }
 0x49b   :  { %8295 = vmatpush1.bf16.msra.mxu0 %v8294_v60  ;;  %v8300_v60 = vpack.c.bf16 %v7585_v38, %v7583_v1 }
 0x49c   :  { %v2924_v47 = vpop.permute.xlu1 %2923  ;;  %8297 = vmatprep.subr.bf16.mxu0 %v8296_v31  ;;  %v7589_v31 = vld [vmem:[%s13505_s3 + $0x2d8] sm:$0xff] }
 0x49d   :  { %7547 = vmatmul.mubr.msk.f32.gmra.mrb[58].mxu0 %vm2556_vm11, %v2924_v47  ;;  %7878 = vmatmul.mubr.msk.f32.vlgmr.msra.gmra.mrb[14].mxu1 %vm2556_vm11, %v11683_v22  ;;  %v7894_v22 = vld [vmem:[%s13505_s3 + $0x9a0] sm:$0xff]  ;;  %v8304_v3 = vpack.c.bf16 %v7589_v31, %v7587_v41  ;;  %v7925_v41 = vld [vmem:[%s13505_s3 + $0xa58] sm:$0xff] }
 0x49e   :  { %8519 = vmatpush1.bf16.msra.mxu1 %v8518_v62  ;;  %3045 = vmatprep.mubr.f32.mxu0 %v13561_v63  ;;  %v8526_v55 = vpack.c.bf16 %v7896_v11, %v7894_v22  ;;  %v7915_v62 = vld [vmem:[%s13505_s3 + $0xa08] sm:$0xff] }
 0x49f   :  { %5223 = vmatprep.mubr.f32.mxu1 %v13561_v63  ;;  %8521 = vmatprep.subr.bf16.mxu1 %v8520_v49  ;;  %v7917_v49 = vld [vmem:[%s13505_s3 + $0xa18] sm:$0xff] }
 0x4a0   :  { %v2926_v39 = vpop.permute.xlu1 %2925  ;;  %v8536_v25 = vpack.c.bf16 %v7917_v49, %v7915_v62 }
 0x4a1   :  { %7548 = vmatmul.mubr.msk.f32.gmra.mrb[60].mxu0 %vm2556_vm11, %v2926_v39  ;;  %7879 = vmatmul.mubr.msk.f32.gmra.mrb[0].mxu1 %vm2556_vm11, %v11726_v50  ;;  %v7900_v50 = vld [vmem:[%s13505_s3 + $0x9d0] sm:$0xff]  ;;  %v7591_v39 = vld [vmem:[%s13505_s3 + $0x2e8] sm:$0xff] }
 0x4a2   :  { %3051 = vmatprep.mubr.f32.mxu0 %v13561_v63  ;;  %5229 = vmatprep.mubr.f32.mxu1 %v13561_v63  ;;  %v8530_v12 = vpack.c.bf16 %v7900_v50, %v7898_v21  ;;  %v7597_v21 = vld [vmem:[%s13505_s3 + $0x318] sm:$0xff] }
 0x4a3   :  { %8523 = vmatpush1.bf16.msra.mxu1 %v8522_v59  ;;  %v7588_v59 = vld [vmem:[%s13505_s3 + $0x2d0] sm:$0xff] }
 0x4a4   :  { %v2928_v53 = vpop.permute.xlu1 %2927  ;;  %8525 = vmatprep.subr.bf16.mxu1 %v8524_v7  ;;  %v7593_v7 = vld [vmem:[%s13505_s3 + $0x2f8] sm:$0xff]  ;;  %v8306_v22 = vpack.c.bf16 %v7588_v59, %v7586_v15 }
 0x4a5   :  { %7549 = vmatmul.mubr.msk.f32.gmra.mrb[62].mxu0 %vm2556_vm11, %v2928_v53  ;;  %7880 = vmatmul.mubr.msk.f32.gmra.mrb[2].mxu1 %vm2556_vm11, %v11694_v45  ;;  %v7902_v45 = vld [vmem:[%s13505_s3 + $0x9e0] sm:$0xff]  ;;  %v8308_v48 = vpack.c.bf16 %v7593_v7, %v7591_v39 }
 0x4a6   :  { %3191 = vmatprep.mubr.f32.mxu0 %v13561_v63  ;;  %5235 = vmatprep.mubr.f32.mxu1 %v13561_v63  ;;  %v8534_v47 = vpack.c.bf16 %v7904_v14, %v7902_v45  ;;  %v8538_v45 = vpack.c.bf16 %v7916_v28, %v7914_v56  ;;  %v7926_v7 = vld [vmem:[%s13505_s3 + $0xa60] sm:$0xff] }
 0x4a7   :  { %8527 = vmatpush1.bf16.msra.mxu1 %v8526_v55  ;;  %v7595_v55 = vld [vmem:[%s13505_s3 + $0x308] sm:$0xff] }
 0x4a8   :  { %v3096_v35 = vpop.permute.xlu1 %3095  ;;  %8529 = vmatprep.subr.bf16.mxu1 %v8528_v2  ;;  %v8312_v2 = vpack.c.bf16 %v7597_v21, %v7595_v55 }
 0x4a9   :  { %7570 = vmatmul.mubr.msk.f32.vlgmr.msra.gmra.mrb[48].mxu0 %vm2556_vm11, %v3096_v35  ;;  %7881 = vmatmul.mubr.msk.f32.gmra.mrb[4].mxu1 %vm2556_vm11, %v11749_v43  ;;  %v8302_v43 = vpack.c.bf16 %v7584_v36, %v7582_v29  ;;  %v13581_v29 = vld [vmem:[#allocation3_spill] sm:$0xff] }
 0x4aa   :  { %3197 = vmatprep.mubr.f32.mxu0 %v13561_v63  ;;  %5241 = vmatprep.mubr.f32.mxu1 %v13561_v63  ;;  %v7923_v36 = vld [vmem:[%s13505_s3 + $0xa48] sm:$0xff] }
 0x4ab   :  { %8531 = vmatpush1.bf16.msra.mxu1 %v8530_v12  ;;  %8299 = vmatpush1.bf16.msra.mxu0 %v8298_v8  ;;  %v7919_v12 = vld [vmem:[%s13505_s3 + $0xa28] sm:$0xff]  ;;  %v7921_v8 = vld [vmem:[%s13505_s3 + $0xa38] sm:$0xff]  ;;  %v8544_v49 = vpack.c.bf16 %v7925_v41, %v7923_v36  ;;  %v7942_v36 = vld [vmem:[%s13505_s3 + $0xaa0] sm:$0xff] }
 0x4ac   :  { %v3098_v0 = vpop.permute.xlu1 %3097  ;;  %8533 = vmatprep.subr.bf16.mxu1 %v8532_v32  ;;  %8301 = vmatprep.subr.bf16.mxu0 %v8300_v60  ;;  %v8540_v14 = vpack.c.bf16 %v7921_v8, %v7919_v12  ;;  %v7918_v32 = vld [vmem:[%s13505_s3 + $0xa20] sm:$0xff]  ;;  %v7920_v60 = vld [vmem:[%s13505_s3 + $0xa30] sm:$0xff] }
 0x4ad   :  { %7571 = vmatmul.mubr.msk.f32.gmra.mrb[50].mxu0 %vm2556_vm11, %v3098_v0  ;;  %7882 = vmatmul.mubr.msk.f32.gmra.mrb[6].mxu1 %vm2556_vm11, %v11711_v26  ;;  %v7590_v26 = vld [vmem:[%s13505_s3 + $0x2e0] sm:$0xff]  ;;  %v8542_v31 = vpack.c.bf16 %v7920_v60, %v7918_v32  ;;  %v13583_v0 = vld [vmem:[#allocation17_spill] sm:$0xff]  ;;  %v13588_v12 = vld [vmem:[#allocation16_spill] sm:$0xff] }
 0x4ae   :  { %3203 = vmatprep.mubr.f32.mxu0 %v13561_v63  ;;  %5247 = vmatprep.mubr.f32.mxu1 %v13561_v63  ;;  %v8310_v50 = vpack.c.bf16 %v7592_v34, %v7590_v26  ;;  %v7933_v26 = vld [vmem:[%s13505_s3 + $0xa98] sm:$0xff]  ;;  %v13589_v8 = vld [vmem:[#allocation6_spill] sm:$0xff]  ;;  %v13592_v32 = vld [vmem:[#allocation8_spill] sm:$0xff] }
 0x4af   :  { %8535 = vmatpush1.bf16.msra.mxu1 %v8534_v47  ;;  %8303 = vmatpush1.bf16.msra.mxu0 %v8302_v43  ;;  %v7922_v47 = vld [vmem:[%s13505_s3 + $0xa40] sm:$0xff]  ;;  %v7924_v43 = vld [vmem:[%s13505_s3 + $0xa50] sm:$0xff] }
 0x4b0   :  { %v3100_v11 = vpop.permute.xlu1 %3099  ;;  %8305 = vmatprep.subr.bf16.mxu0 %v8304_v3  ;;  %8537 = vmatprep.subr.bf16.mxu1 %v8536_v25  ;;  %v7927_v3 = vld [vmem:[%s13505_s3 + $0xa68] sm:$0xff]  ;;  %v7929_v25 = vld [vmem:[%s13505_s3 + $0xa78] sm:$0xff]  ;;  %v8546_v15 = vpack.c.bf16 %v7924_v43, %v7922_v47  ;;  %v7944_v41 = vld [vmem:[%s13505_s3 + $0xab0] sm:$0xff] }
 0x4b1   :  { %7572 = vmatmul.mubr.msk.f32.gmra.mrb[52].mxu0 %vm2556_vm11, %v3100_v11  ;;  %7883 = vmatmul.mubr.msk.f32.gmra.mrb[8].mxu1 %vm2556_vm11, %v11772_v30  ;;  %v7594_v30 = vld [vmem:[%s13505_s3 + $0x300] sm:$0xff]  ;;  %v8548_v39 = vpack.c.bf16 %v7929_v25, %v7927_v3  ;;  %v13584_v11 = vld [vmem:[#allocation15_spill] sm:$0xff]  ;;  %v7949_v47 = vld [vmem:[%s13505_s3 + $0xad8] sm:$0xff]  ;;  %v8558_v3 = vpack.c.bf16 %v7944_v41, %v7942_v36 }
 0x4b2   :  { %3209 = vmatprep.mubr.f32.mxu0 %v13561_v63  ;;  %5253 = vmatprep.mubr.f32.mxu1 %v13561_v63  ;;  %v8314_v1 = vpack.c.bf16 %v7596_v9, %v7594_v30  ;;  %v7943_v30 = vld [vmem:[%s13505_s3 + $0xaa8] sm:$0xff]  ;;  %v7945_v9 = vld [vmem:[%s13505_s3 + $0xab8] sm:$0xff] }
 0x4b3   :  { %8307 = vmatpush1.bf16.msra.mxu0 %v8306_v22  ;;  %v7928_v22 = vld [vmem:[%s13505_s3 + $0xa70] sm:$0xff]  ;;  %v13596_v43 = vld [vmem:[#allocation11_spill] sm:$0xff] }
 0x4b4   :  { %v3102_v53 = vpop.permute.xlu1 %3101  ;;  %8309 = vmatprep.subr.bf16.mxu0 %v8308_v48  ;;  %v7931_v48 = vld [vmem:[%s13505_s3 + $0xa88] sm:$0xff]  ;;  %v8550_v34 = vpack.c.bf16 %v7928_v22, %v7926_v7  ;;  %v7948_v7 = vld [vmem:[%s13505_s3 + $0xad0] sm:$0xff] }
 0x4b5   :  { %7573 = vmatmul.mubr.msk.f32.gmra.mrb[54].mxu0 %vm2556_vm11, %v3102_v53  ;;  %7884 = vmatmul.mubr.msk.f32.gmra.mrb[10].mxu1 %vm2556_vm11, %v13580_v27  ;;  %v8552_v21 = vpack.c.bf16 %v7933_v26, %v7931_v48  ;;  %v7932_v53 = vld [vmem:[%s13505_s3 + $0xa90] sm:$0xff]  ;;  %v7953_v48 = vld [vmem:[%s13505_s3 + $0xaf8] sm:$0xff]  ;;  %v7975_v36 = vld [vmem:[%s13505_s3 + $0xb68] sm:$0xff] }
 0x4b6   :  { %3215 = vmatprep.mubr.f32.mxu0 %v13561_v63  ;;  %5259 = vmatprep.mubr.f32.mxu1 %v13561_v63  ;;  %v13586_v27 = vld [vmem:[#allocation4_spill] sm:$0xff] }
 0x4b7   :  { %8311 = vmatpush1.bf16.msra.mxu0 %v8310_v50  ;;  %v7930_v50 = vld [vmem:[%s13505_s3 + $0xa80] sm:$0xff]  ;;  %v13599_v22 = vld [vmem:[#allocation28_spill] sm:$0xff] }
 0x4b8   :  { %v3104_v38 = vpop.permute.xlu1 %3103  ;;  %8313 = vmatprep.subr.bf16.mxu0 %v8312_v2  ;;  %v13585_v2 = vld [vmem:[#allocation19_spill] sm:$0xff]  ;;  %v8554_v56 = vpack.c.bf16 %v7932_v53, %v7930_v50  ;;  %v7952_v50 = vld [vmem:[%s13505_s3 + $0xaf0] sm:$0xff] }
 0x4b9   :  { %7574 = vmatmul.mubr.msk.f32.gmra.mrb[56].mxu0 %vm2556_vm11, %v3104_v38  ;;  %7885 = vmatmul.mubr.msk.f32.gmra.mrb[12].mxu1 %vm2556_vm11, %v11795_v61  ;;  %v13582_v61 = vld [vmem:[#allocation14_spill] sm:$0xff]  ;;  %v8556_v38 = vpack.c.bf16 %v7945_v9, %v7943_v30  ;;  %v7955_v53 = vld [vmem:[%s13505_s3 + $0xb08] sm:$0xff] }
 0x4ba   :  { %3221 = vmatprep.mubr.f32.mxu0 %v13561_v63  ;;  %5407 = vmatprep.mubr.f32.mxu1 %v13561_v63 }
 0x4bb   :  { %8315 = vmatpush1.bf16.msra.mxu0 %v8314_v1  ;;  %v13587_v1 = vld [vmem:[#allocation5_spill] sm:$0xff] }
 0x4bc   :  { %v3106_v35 = vpop.permute.xlu1 %3105  ;;  %8317 = vmatprep.subr.bf16.mxu0 %v13581_v29  ;;  %v13593_v29 = vld [vmem:[#allocation9_spill] sm:$0xff] }
 0x4bd   :  { %7575 = vmatmul.mubr.msk.f32.gmra.mrb[58].mxu0 %vm2556_vm11, %v3106_v35  ;;  %7906 = vmatmul.mubr.msk.f32.vlgmr.msra.gmra.mrb[14].mxu1 %vm2556_vm11, %v13582_v61  ;;  %v13591_v35 = vld [vmem:[#allocation20_spill] sm:$0xff]  ;;  %v13594_v61 = vld [vmem:[#allocation18_spill] sm:$0xff] }
 0x4be   :  { %8539 = vmatpush1.bf16.msra.mxu1 %v8538_v45  ;;  %3227 = vmatprep.mubr.f32.mxu0 %v13561_v63 }
 0x4bf   :  { %5413 = vmatprep.mubr.f32.mxu1 %v13561_v63  ;;  %8541 = vmatprep.subr.bf16.mxu1 %v8540_v14  ;;  %v13590_v14 = vld [vmem:[#allocation7_spill] sm:$0xff] }
 0x4c0   :  { %v3108_v62 = vpop.permute.xlu1 %3107 }
 0x4c1   :  { %7576 = vmatmul.mubr.msk.f32.gmra.mrb[60].mxu0 %vm2556_vm11, %v3108_v62  ;;  %7907 = vmatmul.mubr.msk.f32.gmra.mrb[0].mxu1 %vm2556_vm11, %v13583_v0  ;;  %v13597_v0 = vld [vmem:[#allocation21_spill] sm:$0xff] }
 0x4c2   :  { %3233 = vmatprep.mubr.f32.mxu0 %v13561_v63  ;;  %5419 = vmatprep.mubr.f32.mxu1 %v13561_v63 }
 0x4c3   :  { %8543 = vmatpush1.bf16.msra.mxu1 %v8542_v31  ;;  %v13595_v31 = vld [vmem:[#allocation10_spill] sm:$0xff] }
 0x4c4   :  { %v3110_v59 = vpop.permute.xlu1 %3109  ;;  %8545 = vmatprep.subr.bf16.mxu1 %v8544_v49  ;;  %v7947_v49 = vld [vmem:[%s13505_s3 + $0xac8] sm:$0xff] }
 0x4c5   :  { %7577 = vmatmul.mubr.msk.f32.gmra.mrb[62].mxu0 %vm2556_vm11, %v3110_v59  ;;  %7908 = vmatmul.mubr.msk.f32.gmra.mrb[2].mxu1 %vm2556_vm11, %v13584_v11  ;;  %v8560_v25 = vpack.c.bf16 %v7949_v47, %v7947_v49  ;;  %v7951_v11 = vld [vmem:[%s13505_s3 + $0xae8] sm:$0xff]  ;;  %v13602_v47 = vld [vmem:[#allocation30_spill] sm:$0xff] }
 0x4c6   :  { %3373 = vmatprep.mubr.f32.mxu0 %v13561_v63  ;;  %5425 = vmatprep.mubr.f32.mxu1 %v13561_v63  ;;  %v7979_v49 = vld [vmem:[%s13505_s3 + $0xb88] sm:$0xff] }
 0x4c7   :  { %8547 = vmatpush1.bf16.msra.mxu1 %v8546_v15  ;;  %v13598_v15 = vld [vmem:[#allocation12_spill] sm:$0xff] }
 0x4c8   :  { %v3278_v55 = vpop.permute.xlu1 %3277  ;;  %8549 = vmatprep.subr.bf16.mxu1 %v8548_v39  ;;  %v7946_v39 = vld [vmem:[%s13505_s3 + $0xac0] sm:$0xff] }
 0x4c9   :  { %7598 = vmatmul.mubr.msk.f32.vlgmr.msra.gmra.mrb[48].mxu0 %vm2556_vm11, %v3278_v55  ;;  %7909 = vmatmul.mubr.msk.f32.gmra.mrb[4].mxu1 %vm2556_vm11, %v13585_v2  ;;  %v8562_v26 = vpack.c.bf16 %v7948_v7, %v7946_v39  ;;  %v8564_v55 = vpack.c.bf16 %v7953_v48, %v7951_v11  ;;  %v7957_v2 = vld [vmem:[%s13505_s3 + $0xb18] sm:$0xff]  ;;  %v7982_v11 = vld [vmem:[%s13505_s3 + $0xba0] sm:$0xff]  ;;  %v7984_v48 = vld [vmem:[%s13505_s3 + $0xbb0] sm:$0xff] }
 0x4ca   :  { %3379 = vmatprep.mubr.f32.mxu0 %v13561_v63  ;;  %5431 = vmatprep.mubr.f32.mxu1 %v13561_v63  ;;  %v13603_v39 = vld [vmem:[#allocation33_spill] sm:$0xff] }
 0x4cb   :  { %8551 = vmatpush1.bf16.msra.mxu1 %v8550_v34  ;;  %8319 = vmatpush1.bf16.msra.mxu0 %v13586_v27  ;;  %v8568_v27 = vpack.c.bf16 %v7957_v2, %v7955_v53  ;;  %v7986_v53 = vld [vmem:[%s13505_s3 + $0xbc0] sm:$0xff]  ;;  %v7988_v2 = vld [vmem:[%s13505_s3 + $0xbd0] sm:$0xff] }
 0x4cc   :  { %v3280_v28 = vpop.permute.xlu1 %3279  ;;  %8553 = vmatprep.subr.bf16.mxu1 %v8552_v21  ;;  %8321 = vmatprep.subr.bf16.mxu0 %v13587_v1  ;;  %v7950_v21 = vld [vmem:[%s13505_s3 + $0xae0] sm:$0xff]  ;;  %v7959_v1 = vld [vmem:[%s13505_s3 + $0xb28] sm:$0xff] }
 0x4cd   :  { %7599 = vmatmul.mubr.msk.f32.gmra.mrb[50].mxu0 %vm2556_vm11, %v3280_v28  ;;  %7910 = vmatmul.mubr.msk.f32.gmra.mrb[6].mxu1 %vm2556_vm11, %v13588_v12  ;;  %v8566_v30 = vpack.c.bf16 %v7952_v50, %v7950_v21  ;;  %v13600_v28 = vld [vmem:[#allocation29_spill] sm:$0xff]  ;;  %v8590_v21 = vpack.c.bf16 %v7984_v48, %v7982_v11  ;;  %v8030_v48 = vld [vmem:[%s13505_s3 + $0xca0] sm:$0xff] }
 0x4ce   :  { %3385 = vmatprep.mubr.f32.mxu0 %v13561_v63  ;;  %5437 = vmatprep.mubr.f32.mxu1 %v13561_v63 }
 0x4cf   :  { %8555 = vmatpush1.bf16.msra.mxu1 %v8554_v56  ;;  %8323 = vmatpush1.bf16.msra.mxu0 %v13589_v8  ;;  %v7956_v56 = vld [vmem:[%s13505_s3 + $0xb10] sm:$0xff] }
 0x4d0   :  { %v3282_v45 = vpop.permute.xlu1 %3281  ;;  %8325 = vmatprep.subr.bf16.mxu0 %v13590_v14  ;;  %8557 = vmatprep.subr.bf16.mxu1 %v8556_v38  ;;  %v7961_v38 = vld [vmem:[%s13505_s3 + $0xb38] sm:$0xff]  ;;  %v7960_v14 = vld [vmem:[%s13505_s3 + $0xb30] sm:$0xff] }
 0x4d1   :  { %7600 = vmatmul.mubr.msk.f32.gmra.mrb[52].mxu0 %vm2556_vm11, %v3282_v45  ;;  %7911 = vmatmul.mubr.msk.f32.gmra.mrb[8].mxu1 %vm2556_vm11, %v13591_v35  ;;  %v8572_v8 = vpack.c.bf16 %v7961_v38, %v7959_v1  ;;  %v7958_v45 = vld [vmem:[%s13505_s3 + $0xb20] sm:$0xff]  ;;  %v13601_v35 = vld [vmem:[#allocation13_spill] sm:$0xff] }
 0x4d2   :  { %3391 = vmatprep.mubr.f32.mxu0 %v13561_v63  ;;  %5443 = vmatprep.mubr.f32.mxu1 %v13561_v63  ;;  %v13607_v1 = vld [vmem:[#allocation34_spill] sm:$0xff] }
 0x4d3   :  { %8327 = vmatpush1.bf16.msra.mxu0 %v13592_v32  ;;  %v7971_v32 = vld [vmem:[%s13505_s3 + $0xb48] sm:$0xff]  ;;  %v7998_v38 = vld [vmem:[%s13505_s3 + $0xbe0] sm:$0xff] }
 0x4d4   :  { %v3284_v60 = vpop.permute.xlu1 %3283  ;;  %8329 = vmatprep.subr.bf16.mxu0 %v13593_v29  ;;  %v8574_v29 = vpack.c.bf16 %v7960_v14, %v7958_v45 }
 0x4d5   :  { %7601 = vmatmul.mubr.msk.f32.gmra.mrb[54].mxu0 %vm2556_vm11, %v3284_v60  ;;  %7912 = vmatmul.mubr.msk.f32.gmra.mrb[10].mxu1 %vm2556_vm11, %v13594_v61  ;;  %v7973_v60 = vld [vmem:[%s13505_s3 + $0xb58] sm:$0xff] }
 0x4d6   :  { %3397 = vmatprep.mubr.f32.mxu0 %v13561_v63  ;;  %5449 = vmatprep.mubr.f32.mxu1 %v13561_v63  ;;  %v8576_v61 = vpack.c.bf16 %v7973_v60, %v7971_v32  ;;  %v8004_v32 = vld [vmem:[%s13505_s3 + $0xc10] sm:$0xff]  ;;  %v8007_v60 = vld [vmem:[%s13505_s3 + $0xc28] sm:$0xff] }
 0x4d7   :  { %8331 = vmatpush1.bf16.msra.mxu0 %v13595_v31  ;;  %v7974_v31 = vld [vmem:[%s13505_s3 + $0xb60] sm:$0xff] }
 0x4d8   :  { %v3286_v62 = vpop.permute.xlu1 %3285  ;;  %8333 = vmatprep.subr.bf16.mxu0 %v13596_v43 }
 0x4d9   :  { %7602 = vmatmul.mubr.msk.f32.gmra.mrb[56].mxu0 %vm2556_vm11, %v3286_v62  ;;  %7913 = vmatmul.mubr.msk.f32.gmra.mrb[12].mxu1 %vm2556_vm11, %v13597_v0  ;;  %v7976_v62 = vld [vmem:[%s13505_s3 + $0xb70] sm:$0xff] }
 0x4da   :  { %3403 = vmatprep.mubr.f32.mxu0 %v13561_v63  ;;  %5589 = vmatprep.mubr.f32.mxu1 %v13561_v63  ;;  %v8582_v43 = vpack.c.bf16 %v7976_v62, %v7974_v31  ;;  %v8010_v62 = vld [vmem:[%s13505_s3 + $0xc40] sm:$0xff] }
 0x4db   :  { %8335 = vmatpush1.bf16.msra.mxu0 %v13598_v15  ;;  %v7983_v15 = vld [vmem:[%s13505_s3 + $0xba8] sm:$0xff] }
 0x4dc   :  { %v3288_v59 = vpop.permute.xlu1 %3287 }
 0x4dd   :  { %7603 = vmatmul.mubr.msk.f32.gmra.mrb[58].mxu0 %vm2556_vm11, %v3288_v59  ;;  %7934 = vmatmul.mubr.msk.f32.vlgmr.msra.gmra.mrb[14].mxu1 %vm2556_vm11, %v13599_v22  ;;  %v7985_v59 = vld [vmem:[%s13505_s3 + $0xbb8] sm:$0xff] }
 0x4de   :  { %8559 = vmatpush1.bf16.msra.mxu1 %v8558_v3  ;;  %3409 = vmatprep.mubr.f32.mxu0 %v13561_v63  ;;  %v7978_v3 = vld [vmem:[%s13505_s3 + $0xb80] sm:$0xff]  ;;  %v8588_v22 = vpack.c.bf16 %v7985_v59, %v7983_v15  ;;  %v8027_v15 = vld [vmem:[%s13505_s3 + $0xc88] sm:$0xff]  ;;  %v8029_v59 = vld [vmem:[%s13505_s3 + $0xc98] sm:$0xff] }
 0x4df   :  { %5595 = vmatprep.mubr.f32.mxu1 %v13561_v63  ;;  %8561 = vmatprep.subr.bf16.mxu1 %v8560_v25  ;;  %v7980_v25 = vld [vmem:[%s13505_s3 + $0xb90] sm:$0xff] }
 0x4e0   :  { %v3290_v34 = vpop.permute.xlu1 %3289  ;;  %v8586_v7 = vpack.c.bf16 %v7980_v25, %v7978_v3  ;;  %v8014_v3 = vld [vmem:[%s13505_s3 + $0xc60] sm:$0xff]  ;;  %v8016_v25 = vld [vmem:[%s13505_s3 + $0xc70] sm:$0xff] }
 0x4e1   :  { %7604 = vmatmul.mubr.msk.f32.gmra.mrb[60].mxu0 %vm2556_vm11, %v3290_v34  ;;  %7935 = vmatmul.mubr.msk.f32.gmra.mrb[0].mxu1 %vm2556_vm11, %v11818_v44  ;;  %v7954_v44 = vld [vmem:[%s13505_s3 + $0xb00] sm:$0xff]  ;;  %v7989_v34 = vld [vmem:[%s13505_s3 + $0xbd8] sm:$0xff] }
 0x4e2   :  { %3415 = vmatprep.mubr.f32.mxu0 %v13561_v63  ;;  %5601 = vmatprep.mubr.f32.mxu1 %v13561_v63  ;;  %v8570_v12 = vpack.c.bf16 %v7956_v56, %v7954_v44  ;;  %v8594_v44 = vpack.c.bf16 %v7988_v2, %v7986_v53  ;;  %v8036_v53 = vld [vmem:[%s13505_s3 + $0xcd0] sm:$0xff]  ;;  %v12913_v2 = vpop.permute.xlu0 %6411 }
 0x4e3   :  { %8563 = vmatpush1.bf16.msra.mxu1 %v8562_v26  ;;  %v7987_v26 = vld [vmem:[%s13505_s3 + $0xbc8] sm:$0xff] }
 0x4e4   :  { %v3292_v9 = vpop.permute.xlu1 %3291  ;;  %8565 = vmatprep.subr.bf16.mxu1 %v8564_v55  ;;  %v13604_v55 = vld [vmem:[#allocation31_spill] sm:$0xff]  ;;  %v8592_v50 = vpack.c.bf16 %v7989_v34, %v7987_v26  ;;  %v8032_v26 = vld [vmem:[%s13505_s3 + $0xcb0] sm:$0xff] }
 0x4e5   :  { %7605 = vmatmul.mubr.msk.f32.gmra.mrb[62].mxu0 %vm2556_vm11, %v3292_v9  ;;  %7936 = vmatmul.mubr.msk.f32.gmra.mrb[2].mxu1 %vm2556_vm11, %v13600_v28  ;;  %v8001_v9 = vld [vmem:[%s13505_s3 + $0xbf8] sm:$0xff]  ;;  %v13606_v28 = vld [vmem:[#allocation32_spill] sm:$0xff]  ;;  %v8035_v34 = vld [vmem:[%s13505_s3 + $0xcc8] sm:$0xff] }
 0x4e6   :  { %3571 = vmatprep.mubr.f32.mxu0 %v13561_v63  ;;  %5607 = vmatprep.mubr.f32.mxu1 %v13561_v63 }
 0x4e7   :  { %8567 = vmatpush1.bf16.msra.mxu1 %v8566_v30  ;;  %v7999_v30 = vld [vmem:[%s13505_s3 + $0xbe8] sm:$0xff] }
 0x4e8   :  { %8569 = vmatprep.subr.bf16.mxu1 %v8568_v27  ;;  %v13605_v27 = vld [vmem:[#allocation35_spill] sm:$0xff]  ;;  %v8596_v56 = vpack.c.bf16 %v8001_v9, %v7999_v30  ;;  %v8041_v30 = vld [vmem:[%s13505_s3 + $0xcf8] sm:$0xff] }
 0x4e9   :  { %7626 = vmatmul.mubr.msk.f32.vlgmr.msra.gmra.mrb[48].mxu0 %vm2556_vm11, %v13601_v35  ;;  %7937 = vmatmul.mubr.msk.f32.gmra.mrb[4].mxu1 %vm2556_vm11, %v11829_v5  ;;  %v7970_v5 = vld [vmem:[%s13505_s3 + $0xb40] sm:$0xff] }
 0x4ea   :  { %5613 = vmatprep.mubr.f32.mxu1 %v13561_v63  ;;  %v8002_v35 = vld [vmem:[%s13505_s3 + $0xc00] sm:$0xff] }
 0x4eb   :  { %8571 = vmatpush1.bf16.msra.mxu1 %v8570_v12  ;;  %v8000_v12 = vld [vmem:[%s13505_s3 + $0xbf0] sm:$0xff] }
 0x4ec   :  { %8573 = vmatprep.subr.bf16.mxu1 %v8572_v8  ;;  %v8003_v8 = vld [vmem:[%s13505_s3 + $0xc08] sm:$0xff]  ;;  %v8598_v45 = vpack.c.bf16 %v8000_v12, %v7998_v38 }
 0x4ed   :  { %7938 = vmatmul.mubr.msk.f32.gmra.mrb[6].mxu1 %vm2556_vm11, %v11803_v19  ;;  %v7972_v19 = vld [vmem:[%s13505_s3 + $0xb50] sm:$0xff] }
 0x4ee   :  { %5619 = vmatprep.mubr.f32.mxu1 %v13561_v63 }
 0x4ef   :  { %8575 = vmatpush1.bf16.msra.mxu1 %v8574_v29  ;;  %v13608_v29 = vld [vmem:[#allocation36_spill] sm:$0xff] }
 0x4f0   :  { %8577 = vmatprep.subr.bf16.mxu1 %v8576_v61  ;;  %v8602_v61 = vpack.c.bf16 %v8004_v32, %v8002_v35 }
 0x4f1   :  { %7939 = vmatmul.mubr.msk.f32.gmra.mrb[8].mxu1 %vm2556_vm11, %v11840_v42  ;;  %v7977_v42 = vld [vmem:[%s13505_s3 + $0xb78] sm:$0xff] }
 0x4f2   :  { %5625 = vmatprep.mubr.f32.mxu1 %v13561_v63  ;;  %v8580_v41 = vpack.c.bf16 %v7977_v42, %v7975_v36  ;;  %v8008_v36 = vld [vmem:[%s13505_s3 + $0xc30] sm:$0xff]  ;;  %v8011_v42 = vld [vmem:[%s13505_s3 + $0xc48] sm:$0xff] }
 0x4f5   :  { %7940 = vmatmul.mubr.msk.f32.gmra.mrb[10].mxu1 %vm2556_vm11, %v11820_v10  ;;  %v8578_v10 = vpack.c.bf16 %v7972_v19, %v7970_v5  ;;  %v8006_v19 = vld [vmem:[%s13505_s3 + $0xc20] sm:$0xff] }
 0x4f6   :  { %5631 = vmatprep.mubr.f32.mxu1 %v13561_v63 }
 0x4f9   :  { %7941 = vmatmul.mubr.msk.f32.gmra.mrb[12].mxu1 %vm2556_vm11, %v11857_v46  ;;  %v7981_v46 = vld [vmem:[%s13505_s3 + $0xb98] sm:$0xff] }
 0x4fa   :  { %5771 = vmatprep.mubr.f32.mxu1 %v13561_v63  ;;  %v8584_v0 = vpack.c.bf16 %v7981_v46, %v7979_v49  ;;  %v8012_v49 = vld [vmem:[%s13505_s3 + $0xc50] sm:$0xff]  ;;  %v8015_v46 = vld [vmem:[%s13505_s3 + $0xc68] sm:$0xff] }
 0x4fd   :  { %7962 = vmatmul.mubr.msk.f32.vlgmr.msra.gmra.mrb[14].mxu1 %vm2556_vm11, %v13602_v47  ;;  %v13609_v47 = vld [vmem:[#allocation37_spill] sm:$0xff] }
 0x4fe   :  { %8579 = vmatpush1.bf16.msra.mxu1 %v8578_v10  ;;  %5777 = vmatprep.mubr.f32.mxu1 %v13561_v63  ;;  %v8013_v10 = vld [vmem:[%s13505_s3 + $0xc58] sm:$0xff] }
 0x4ff   :  { %8581 = vmatprep.subr.bf16.mxu1 %v8580_v41  ;;  %v8606_v41 = vpack.c.bf16 %v8008_v36, %v8006_v19  ;;  %v8608_v31 = vpack.c.bf16 %v8013_v10, %v8011_v42  ;;  %v8061_v19 = vld [vmem:[%s13505_s3 + $0xd58] sm:$0xff]  ;;  %v8058_v10 = vld [vmem:[%s13505_s3 + $0xd40] sm:$0xff] }
 0x501   :  { %7963 = vmatmul.mubr.msk.f32.gmra.mrb[0].mxu1 %vm2556_vm11, %v13603_v39  ;;  %v8614_v39 = vpack.c.bf16 %v8016_v25, %v8014_v3  ;;  %v8069_v3 = vld [vmem:[%s13505_s3 + $0xd98] sm:$0xff]  ;;  %v13613_v25 = vld [vmem:[#allocation23_spill] sm:$0xff] }
 0x502   :  { %5783 = vmatprep.mubr.f32.mxu1 %v13561_v63  ;;  %8583 = vmatpush1.bf16.msra.mxu1 %v8582_v43  ;;  %v8610_v43 = vpack.c.bf16 %v8012_v49, %v8010_v62  ;;  %v13612_v62 = vld [vmem:[#allocation22_spill] sm:$0xff] }
 0x503   :  { %8585 = vmatprep.subr.bf16.mxu1 %v8584_v0 }
 0x505   :  { %7964 = vmatmul.mubr.msk.f32.gmra.mrb[2].mxu1 %vm2556_vm11, %v13604_v55  ;;  %v8622_v55 = vpack.c.bf16 %v8032_v26, %v8030_v48  ;;  %v8070_v48 = vld [vmem:[%s13505_s3 + $0xda0] sm:$0xff]  ;;  %v8072_v26 = vld [vmem:[%s13505_s3 + $0xdb0] sm:$0xff] }
 0x506   :  { %5789 = vmatprep.mubr.f32.mxu1 %v13561_v63  ;;  %8587 = vmatpush1.bf16.msra.mxu1 %v8586_v7  ;;  %v8616_v7 = vpack.c.bf16 %v8029_v59, %v8027_v15 }
 0x507   :  { %8589 = vmatprep.subr.bf16.mxu1 %v8588_v22  ;;  %v8031_v22 = vld [vmem:[%s13505_s3 + $0xca8] sm:$0xff] }
 0x509   :  { %7965 = vmatmul.mubr.msk.f32.gmra.mrb[4].mxu1 %vm2556_vm11, %v13605_v27 }
 0x50a   :  { %5795 = vmatprep.mubr.f32.mxu1 %v13561_v63  ;;  %8591 = vmatpush1.bf16.msra.mxu1 %v8590_v21 }
 0x50b   :  { %8593 = vmatprep.subr.bf16.mxu1 %v8592_v50  ;;  %v8034_v50 = vld [vmem:[%s13505_s3 + $0xcc0] sm:$0xff] }
 0x50c   :  { %v8626_v9 = vpack.c.bf16 %v8036_v53, %v8034_v50  ;;  %v8654_v50 = vpack.c.bf16 %v8072_v26, %v8070_v48  ;;  %v8123_v48 = vld [vmem:[%s13505_s3 + $0xec8] sm:$0xff]  ;;  %v8125_v26 = vld [vmem:[%s13505_s3 + $0xed8] sm:$0xff] }
 0x50d   :  { %7966 = vmatmul.mubr.msk.f32.gmra.mrb[6].mxu1 %vm2556_vm11, %v13606_v28  ;;  %v8043_v28 = vld [vmem:[%s13505_s3 + $0xd08] sm:$0xff] }
 0x50e   :  { %5801 = vmatprep.mubr.f32.mxu1 %v13561_v63  ;;  %8595 = vmatpush1.bf16.msra.mxu1 %v8594_v44  ;;  %v8038_v44 = vld [vmem:[%s13505_s3 + $0xce0] sm:$0xff] }
 0x50f   :  { %8597 = vmatprep.subr.bf16.mxu1 %v8596_v56  ;;  %v8040_v56 = vld [vmem:[%s13505_s3 + $0xcf0] sm:$0xff] }
 0x510   :  { %v8630_v38 = vpack.c.bf16 %v8040_v56, %v8038_v44  ;;  %v8084_v44 = vld [vmem:[%s13505_s3 + $0xdd0] sm:$0xff] }
 0x511   :  { %7967 = vmatmul.mubr.msk.f32.gmra.mrb[8].mxu1 %vm2556_vm11, %v11920_v40  ;;  %v8005_v40 = vld [vmem:[%s13505_s3 + $0xc18] sm:$0xff] }
 0x512   :  { %5807 = vmatprep.mubr.f32.mxu1 %v13561_v63  ;;  %v8600_v14 = vpack.c.bf16 %v8005_v40, %v8003_v8  ;;  %v8042_v8 = vld [vmem:[%s13505_s3 + $0xd00] sm:$0xff]  ;;  %v8044_v40 = vld [vmem:[%s13505_s3 + $0xd10] sm:$0xff] }
 0x515   :  { %7968 = vmatmul.mubr.msk.f32.gmra.mrb[10].mxu1 %vm2556_vm11, %v13607_v1  ;;  %v12938_v1 = vpop.permute.xlu0 %6413 }
 0x516   :  { %5813 = vmatprep.mubr.f32.mxu1 %v13561_v63 }
 0x519   :  { %7969 = vmatmul.mubr.msk.f32.gmra.mrb[12].mxu1 %vm2556_vm11, %v11943_v6  ;;  %v8009_v6 = vld [vmem:[%s13505_s3 + $0xc38] sm:$0xff]  ;;  %v12956_v32 = vpop.permute.xlu0 %6415 }
 0x51a   :  { %5953 = vmatprep.mubr.f32.mxu1 %v13561_v63  ;;  %v8604_v5 = vpack.c.bf16 %v8009_v6, %v8007_v60  ;;  %v13610_v60 = vld [vmem:[#allocation38_spill] sm:$0xff] }
 0x51d   :  { %7990 = vmatmul.mubr.msk.f32.vlgmr.msra.gmra.mrb[14].mxu1 %vm2556_vm11, %v13608_v29  ;;  %v12963_v6 = vpop.permute.xlu0 %6417  ;;  %v8054_v29 = vld [vmem:[%s13505_s3 + $0xd20] sm:$0xff] }
 0x51e   :  { %8599 = vmatpush1.bf16.msra.mxu1 %v8598_v45  ;;  %5959 = vmatprep.mubr.f32.mxu1 %v13561_v63  ;;  %v8057_v45 = vld [vmem:[%s13505_s3 + $0xd38] sm:$0xff] }
 0x51f   :  { %8601 = vmatprep.subr.bf16.mxu1 %v8600_v14  ;;  %v8634_v14 = vpack.c.bf16 %v8044_v40, %v8042_v8  ;;  %v8091_v8 = vld [vmem:[%s13505_s3 + $0xe08] sm:$0xff] }
 0x521   :  { %7991 = vmatmul.mubr.msk.f32.gmra.mrb[0].mxu1 %vm2556_vm11, %v11966_v18  ;;  %v8017_v18 = vld [vmem:[%s13505_s3 + $0xc78] sm:$0xff] }
 0x522   :  { %5965 = vmatprep.mubr.f32.mxu1 %v13561_v63  ;;  %8603 = vmatpush1.bf16.msra.mxu1 %v8602_v61  ;;  %v8612_v0 = vpack.c.bf16 %v8017_v18, %v8015_v46  ;;  %v8056_v61 = vld [vmem:[%s13505_s3 + $0xd30] sm:$0xff] }
 0x523   :  { %8605 = vmatprep.subr.bf16.mxu1 %v8604_v5  ;;  %v12975_v5 = vpop.permute.xlu0 %6419  ;;  %v8638_v36 = vpack.c.bf16 %v8056_v61, %v8054_v29  ;;  %v8094_v61 = vld [vmem:[%s13505_s3 + $0xe20] sm:$0xff] }
 0x525   :  { %7992 = vmatmul.mubr.msk.f32.gmra.mrb[2].mxu1 %vm2556_vm11, %v13609_v47  ;;  %v8062_v47 = vld [vmem:[%s13505_s3 + $0xd60] sm:$0xff] }
 0x526   :  { %5971 = vmatprep.mubr.f32.mxu1 %v13561_v63  ;;  %8607 = vmatpush1.bf16.msra.mxu1 %v8606_v41  ;;  %v8060_v41 = vld [vmem:[%s13505_s3 + $0xd50] sm:$0xff] }
 0x527   :  { %8609 = vmatprep.subr.bf16.mxu1 %v8608_v31  ;;  %v8063_v31 = vld [vmem:[%s13505_s3 + $0xd68] sm:$0xff]  ;;  %v13000_v49 = vpop.permute.xlu0 %6421  ;;  %v8642_v46 = vpack.c.bf16 %v8060_v41, %v8058_v10  ;;  %v8098_v10 = vld [vmem:[%s13505_s3 + $0xe40] sm:$0xff]  ;;  %v8100_v41 = vld [vmem:[%s13505_s3 + $0xe50] sm:$0xff] }
 0x529   :  { %7993 = vmatmul.mubr.msk.f32.gmra.mrb[4].mxu1 %vm2556_vm11, %v11977_v37  ;;  %v8026_v37 = vld [vmem:[%s13505_s3 + $0xc80] sm:$0xff] }
 0x52a   :  { %5977 = vmatprep.mubr.f32.mxu1 %v13561_v63  ;;  %8611 = vmatpush1.bf16.msra.mxu1 %v8610_v43  ;;  %v8064_v43 = vld [vmem:[%s13505_s3 + $0xd70] sm:$0xff] }
 0x52b   :  { %8613 = vmatprep.subr.bf16.mxu1 %v8612_v0  ;;  %v8067_v0 = vld [vmem:[%s13505_s3 + $0xd88] sm:$0xff]  ;;  %v8646_v15 = vpack.c.bf16 %v8064_v43, %v8062_v47  ;;  %v8112_v47 = vld [vmem:[%s13505_s3 + $0xe70] sm:$0xff]  ;;  %v8117_v43 = vld [vmem:[%s13505_s3 + $0xe98] sm:$0xff] }
 0x52c   :  { %v8648_v59 = vpack.c.bf16 %v8069_v3, %v8067_v0 }
 0x52d   :  { %7994 = vmatmul.mubr.msk.f32.gmra.mrb[6].mxu1 %vm2556_vm11, %v11951_v20  ;;  %v8028_v20 = vld [vmem:[%s13505_s3 + $0xc90] sm:$0xff] }
 0x52e   :  { %5983 = vmatprep.mubr.f32.mxu1 %v13561_v63  ;;  %8615 = vmatpush1.bf16.msra.mxu1 %v8614_v39  ;;  %v8066_v39 = vld [vmem:[%s13505_s3 + $0xd80] sm:$0xff] }
 0x52f   :  { %8617 = vmatprep.subr.bf16.mxu1 %v8616_v7  ;;  %v8068_v7 = vld [vmem:[%s13505_s3 + $0xd90] sm:$0xff] }
 0x531   :  { %7995 = vmatmul.mubr.msk.f32.gmra.mrb[8].mxu1 %vm2556_vm11, %v11988_v24  ;;  %v8033_v24 = vld [vmem:[%s13505_s3 + $0xcb8] sm:$0xff] }
 0x532   :  { %5989 = vmatprep.mubr.f32.mxu1 %v13561_v63  ;;  %v8620_v11 = vpack.c.bf16 %v8033_v24, %v8031_v22  ;;  %v8073_v22 = vld [vmem:[%s13505_s3 + $0xdb8] sm:$0xff]  ;;  %v13614_v24 = vld [vmem:[#allocation24_spill] sm:$0xff] }
 0x535   :  { %7996 = vmatmul.mubr.msk.f32.gmra.mrb[10].mxu1 %vm2556_vm11, %v11968_v51  ;;  %v8618_v51 = vpack.c.bf16 %v8028_v20, %v8026_v37  ;;  %v13024_v37 = vpop.permute.xlu0 %6423  ;;  %v8071_v20 = vld [vmem:[%s13505_s3 + $0xda8] sm:$0xff] }
 0x536   :  { %5995 = vmatprep.mubr.f32.mxu1 %v13561_v63 }
 0x539   :  { %7997 = vmatmul.mubr.msk.f32.gmra.mrb[12].mxu1 %vm2556_vm11, %v12005_v13  ;;  %v8037_v13 = vld [vmem:[%s13505_s3 + $0xcd8] sm:$0xff] }
 0x53a   :  { %6135 = vmatprep.mubr.f32.mxu1 %v13561_v63  ;;  %v8624_v21 = vpack.c.bf16 %v8037_v13, %v8035_v34  ;;  %v8083_v34 = vld [vmem:[%s13505_s3 + $0xdc8] sm:$0xff]  ;;  %v8085_v13 = vld [vmem:[%s13505_s3 + $0xdd8] sm:$0xff] }
 0x53b   :  { %v8656_v53 = vpack.c.bf16 %v8085_v13, %v8083_v34 }
 0x53d   :  { %8018 = vmatmul.mubr.msk.f32.vlgmr.msra.gmra.mrb[14].mxu1 %vm2556_vm11, %v11979_v57  ;;  %v8039_v57 = vld [vmem:[%s13505_s3 + $0xce8] sm:$0xff] }
 0x53e   :  { %8619 = vmatpush1.bf16.msra.mxu1 %v8618_v51  ;;  %6141 = vmatprep.mubr.f32.mxu1 %v13561_v63  ;;  %v8628_v27 = vpack.c.bf16 %v8041_v30, %v8039_v57  ;;  %v8650_v51 = vpack.c.bf16 %v8068_v7, %v8066_v39  ;;  %v13616_v57 = vld [vmem:[#allocation26_spill] sm:$0xff]  ;;  %v8119_v39 = vld [vmem:[%s13505_s3 + $0xea8] sm:$0xff]  ;;  %v8121_v7 = vld [vmem:[%s13505_s3 + $0xeb8] sm:$0xff] }
 0x53f   :  { %8621 = vmatprep.subr.bf16.mxu1 %v8620_v11  ;;  %v8652_v11 = vpack.c.bf16 %v8073_v22, %v8071_v20  ;;  %v8684_v20 = vpack.c.bf16 %v8121_v7, %v8119_v39  ;;  %v8118_v22 = vld [vmem:[%s13505_s3 + $0xea0] sm:$0xff]  ;;  %v8152_v39 = vld [vmem:[%s13505_s3 + $0xf70] sm:$0xff] }
 0x541   :  { %8019 = vmatmul.mubr.msk.f32.gmra.mrb[0].mxu1 %vm2556_vm11, %v12022_v33  ;;  %v8045_v33 = vld [vmem:[%s13505_s3 + $0xd18] sm:$0xff] }
 0x542   :  { %6147 = vmatprep.mubr.f32.mxu1 %v13561_v63  ;;  %8623 = vmatpush1.bf16.msra.mxu1 %v8622_v55  ;;  %v8632_v12 = vpack.c.bf16 %v8045_v33, %v8043_v28  ;;  %v13615_v55 = vld [vmem:[#allocation25_spill] sm:$0xff]  ;;  %v8086_v33 = vld [vmem:[%s13505_s3 + $0xde0] sm:$0xff] }
 0x543   :  { %8625 = vmatprep.subr.bf16.mxu1 %v8624_v21  ;;  %v13049_v21 = vpop.permute.xlu0 %6425 }
 0x545   :  { %8020 = vmatmul.mubr.msk.f32.gmra.mrb[2].mxu1 %vm2556_vm11, %v11990_v58  ;;  %v8055_v58 = vld [vmem:[%s13505_s3 + $0xd28] sm:$0xff] }
 0x546   :  { %6153 = vmatprep.mubr.f32.mxu1 %v13561_v63  ;;  %8627 = vmatpush1.bf16.msra.mxu1 %v8626_v9  ;;  %v8636_v35 = vpack.c.bf16 %v8057_v45, %v8055_v58  ;;  %v8090_v45 = vld [vmem:[%s13505_s3 + $0xe00] sm:$0xff] }
 0x547   :  { %8629 = vmatprep.subr.bf16.mxu1 %v8628_v27  ;;  %v13055_v30 = vpop.permute.xlu0 %6593  ;;  %v8082_v27 = vld [vmem:[%s13505_s3 + $0xdc0] sm:$0xff] }
 0x548   :  { %v8658_v56 = vpack.c.bf16 %v8084_v44, %v8082_v27 }
 0x549   :  { %8021 = vmatmul.mubr.msk.f32.gmra.mrb[4].mxu1 %vm2556_vm11, %v12045_v17  ;;  %v13611_v17 = vld [vmem:[#allocation39_spill] sm:$0xff] }
 0x54a   :  { %6159 = vmatprep.mubr.f32.mxu1 %v13561_v63  ;;  %8631 = vmatpush1.bf16.msra.mxu1 %v8630_v38  ;;  %v8088_v38 = vld [vmem:[%s13505_s3 + $0xdf0] sm:$0xff] }
 0x54b   :  { %8633 = vmatprep.subr.bf16.mxu1 %v8632_v12  ;;  %v13062_v9 = vpop.permute.xlu0 %6595  ;;  %v8662_v40 = vpack.c.bf16 %v8088_v38, %v8086_v33  ;;  %v8139_v33 = vld [vmem:[%s13505_s3 + $0xf08] sm:$0xff]  ;;  %v8141_v38 = vld [vmem:[%s13505_s3 + $0xf18] sm:$0xff] }
 0x54d   :  { %8022 = vmatmul.mubr.msk.f32.gmra.mrb[6].mxu1 %vm2556_vm11, %v13610_v60 }
 0x54e   :  { %6165 = vmatprep.mubr.f32.mxu1 %v13561_v63  ;;  %8635 = vmatpush1.bf16.msra.mxu1 %v8634_v14  ;;  %v8092_v14 = vld [vmem:[%s13505_s3 + $0xe10] sm:$0xff] }
 0x54f   :  { %8637 = vmatprep.subr.bf16.mxu1 %v8636_v35  ;;  %v13086_v12 = vpop.permute.xlu0 %6597  ;;  %v8095_v35 = vld [vmem:[%s13505_s3 + $0xe28] sm:$0xff] }
 0x551   :  { %8023 = vmatmul.mubr.msk.f32.gmra.mrb[8].mxu1 %vm2556_vm11, %v12079_v54  ;;  %v8059_v54 = vld [vmem:[%s13505_s3 + $0xd48] sm:$0xff] }
 0x552   :  { %6171 = vmatprep.mubr.f32.mxu1 %v13561_v63  ;;  %v8640_v42 = vpack.c.bf16 %v8061_v19, %v8059_v54  ;;  %v8096_v54 = vld [vmem:[%s13505_s3 + $0xe30] sm:$0xff]  ;;  %v8101_v19 = vld [vmem:[%s13505_s3 + $0xe58] sm:$0xff] }
 0x553   :  { %v13111_v60 = vpop.permute.xlu0 %6599 }
 0x555   :  { %8024 = vmatmul.mubr.msk.f32.gmra.mrb[10].mxu1 %vm2556_vm11, %v13611_v17  ;;  %v8666_v17 = vpack.c.bf16 %v8092_v14, %v8090_v45 }
 0x556   :  { %6177 = vmatprep.mubr.f32.mxu1 %v13561_v63 }
 0x559   :  { %8025 = vmatmul.mubr.msk.f32.gmra.mrb[12].mxu1 %vm2556_vm11, %v12107_v52  ;;  %v8065_v52 = vld [vmem:[%s13505_s3 + $0xd78] sm:$0xff] }
 0x55a   :  { %6325 = vmatprep.mubr.f32.mxu1 %v13561_v63  ;;  %v8644_v18 = vpack.c.bf16 %v8065_v52, %v8063_v31  ;;  %v13135_v31 = vpop.permute.xlu0 %6601  ;;  %v8113_v52 = vld [vmem:[%s13505_s3 + $0xe78] sm:$0xff] }
 0x55d   :  { %8046 = vmatmul.mubr.msk.f32.vlgmr.msra.gmra.mrb[14].mxu1 %vm2556_vm11, %v13612_v62  ;;  %v8674_v62 = vpack.c.bf16 %v8100_v41, %v8098_v10 }
 0x55e   :  { %8639 = vmatpush1.bf16.msra.mxu1 %v8638_v36  ;;  %6331 = vmatprep.mubr.f32.mxu1 %v13561_v63  ;;  %v8670_v36 = vpack.c.bf16 %v8096_v54, %v8094_v61  ;;  %v8140_v61 = vld [vmem:[%s13505_s3 + $0xf10] sm:$0xff] }
 0x55f   :  { %8641 = vmatprep.subr.bf16.mxu1 %v8640_v42 }
 0x561   :  { %8047 = vmatmul.mubr.msk.f32.gmra.mrb[0].mxu1 %vm2556_vm11, %v13613_v25 }
 0x562   :  { %6337 = vmatprep.mubr.f32.mxu1 %v13561_v63  ;;  %8643 = vmatpush1.bf16.msra.mxu1 %v8642_v46 }
 0x563   :  { %8645 = vmatprep.subr.bf16.mxu1 %v8644_v18  ;;  %v13148_v18 = vpop.permute.xlu0 %6603 }
 0x565   :  { %8048 = vmatmul.mubr.msk.f32.gmra.mrb[2].mxu1 %vm2556_vm11, %v13614_v24  ;;  %v8120_v24 = vld [vmem:[%s13505_s3 + $0xeb0] sm:$0xff] }
 0x566   :  { %6343 = vmatprep.mubr.f32.mxu1 %v13561_v63  ;;  %8647 = vmatpush1.bf16.msra.mxu1 %v8646_v15  ;;  %v8114_v15 = vld [vmem:[%s13505_s3 + $0xe80] sm:$0xff]  ;;  %v8686_v13 = vpack.c.bf16 %v8120_v24, %v8118_v22 }
 0x567   :  { %8649 = vmatprep.subr.bf16.mxu1 %v8648_v59  ;;  %v8116_v59 = vld [vmem:[%s13505_s3 + $0xe90] sm:$0xff] }
 0x569   :  { %8049 = vmatmul.mubr.msk.f32.gmra.mrb[4].mxu1 %vm2556_vm11, %v13615_v55  ;;  %v8688_v55 = vpack.c.bf16 %v8125_v26, %v8123_v48  ;;  %v8156_v48 = vld [vmem:[%s13505_s3 + $0xf90] sm:$0xff] }
 0x56a   :  { %6349 = vmatprep.mubr.f32.mxu1 %v13561_v63  ;;  %8651 = vmatpush1.bf16.msra.mxu1 %v8650_v51 }
 0x56b   :  { %8653 = vmatprep.subr.bf16.mxu1 %v8652_v11 }
 0x56d   :  { %8050 = vmatmul.mubr.msk.f32.gmra.mrb[6].mxu1 %vm2556_vm11, %v13616_v57  ;;  %v8127_v57 = vld [vmem:[%s13505_s3 + $0xee8] sm:$0xff] }
 0x56e   :  { %6355 = vmatprep.mubr.f32.mxu1 %v13561_v63  ;;  %8655 = vmatpush1.bf16.msra.mxu1 %v8654_v50  ;;  %v8124_v50 = vld [vmem:[%s13505_s3 + $0xed0] sm:$0xff] }
 0x56f   :  { %8657 = vmatprep.subr.bf16.mxu1 %v8656_v53 }
 0x571   :  { %8051 = vmatmul.mubr.msk.f32.gmra.mrb[8].mxu1 %vm2556_vm11, %v11630_v4  ;;  %v8087_v4 = vld [vmem:[%s13505_s3 + $0xde8] sm:$0xff] }
 0x572   :  { %6361 = vmatprep.mubr.f32.mxu1 %v13561_v63 }
 0x575   :  { %8052 = vmatmul.mubr.msk.f32.gmra.mrb[10].mxu1 %vm2556_vm11, %v11658_v16  ;;  %v8089_v16 = vld [vmem:[%s13505_s3 + $0xdf8] sm:$0xff] }
 0x576   :  { %6367 = vmatprep.mubr.f32.mxu1 %v13561_v63  ;;  %v8660_v28 = vpack.c.bf16 %v8089_v16, %v8087_v4  ;;  %v8126_v16 = vld [vmem:[%s13505_s3 + $0xee0] sm:$0xff] }
 0x579   :  { %8053 = vmatmul.mubr.msk.f32.gmra.mrb[12].mxu1 %vm2556_vm11, %v11674_v23  ;;  %v8093_v23 = vld [vmem:[%s13505_s3 + $0xe18] sm:$0xff] }
 0x57a   :  { %6507 = vmatprep.mubr.f32.mxu1 %v13561_v63  ;;  %v8664_v58 = vpack.c.bf16 %v8093_v23, %v8091_v8  ;;  %v8696_v23 = vpack.c.bf16 %v8141_v38, %v8139_v33 }
 0x57d   :  { %8074 = vmatmul.mubr.msk.f32.vlgmr.msra.gmra.mrb[14].mxu1 %vm2556_vm11, %v12913_v2  ;;  %v8097_v2 = vld [vmem:[%s13505_s3 + $0xe38] sm:$0xff] }
 0x57e   :  { %8659 = vmatpush1.bf16.msra.mxu1 %v8658_v56  ;;  %6513 = vmatprep.mubr.f32.mxu1 %v13561_v63  ;;  %v8668_v29 = vpack.c.bf16 %v8097_v2, %v8095_v35  ;;  %v8128_v56 = vld [vmem:[%s13505_s3 + $0xef0] sm:$0xff] }
 0x57f   :  { %8661 = vmatprep.subr.bf16.mxu1 %v8660_v28  ;;  %v8694_v8 = vpack.c.bf16 %v8128_v56, %v8126_v16  ;;  %v2522_v16 = vld [vmem:[%s13507_s4] sm:$0x3] }
 0x580   :  { %v13617_v56 = vld [vmem:[#allocation2_spill] sm:$0xff] }
 0x581   :  { %8075 = vmatmul.mubr.msk.f32.gmra.mrb[0].mxu1 %vm2556_vm11, %v12938_v1  ;;  %v8099_v1 = vld [vmem:[%s13505_s3 + $0xe48] sm:$0xff]  ;;  %v13618_v33 = vsub.s32 0, %v13617_v56 }
 0x582   :  { %6519 = vmatprep.mubr.f32.mxu1 %v13561_v63  ;;  %8663 = vmatpush1.bf16.msra.mxu1 %v8662_v40  ;;  %v8672_v42 = vpack.c.bf16 %v8101_v19, %v8099_v1  ;;  %v8143_v19 = vld [vmem:[%s13505_s3 + $0xf28] sm:$0xff] }
 0x583   :  { %8665 = vmatprep.subr.bf16.mxu1 %v8664_v58  ;;  %v2527_v38 = vrot.slane %v2522_v16, %v13618_v33 }
 0x585   :  { %8076 = vmatmul.mubr.msk.f32.gmra.mrb[2].mxu1 %vm2556_vm11, %v12956_v32  ;;  %v8111_v32 = vld [vmem:[%s13505_s3 + $0xe68] sm:$0xff] }
 0x586   :  { %6525 = vmatprep.mubr.f32.mxu1 %v13561_v63  ;;  %8667 = vmatpush1.bf16.msra.mxu1 %v8666_v17  ;;  %v8676_v46 = vpack.c.bf16 %v8113_v52, %v8111_v32  ;;  %v8144_v32 = vld [vmem:[%s13505_s3 + $0xf30] sm:$0xff] }
 0x587   :  { %8669 = vmatprep.subr.bf16.mxu1 %v8668_v29  ;;  %v8138_v29 = vld [vmem:[%s13505_s3 + $0xf00] sm:$0xff] }
 0x588   :  { %v8698_v10 = vpack.c.bf16 %v8140_v61, %v8138_v29 }
 0x589   :  { %8077 = vmatmul.mubr.msk.f32.gmra.mrb[4].mxu1 %vm2556_vm11, %v12963_v6  ;;  %v13154_v6 = vpop.permute.xlu0 %6605 }
 0x58a   :  { %6531 = vmatprep.mubr.f32.mxu1 %v13561_v63  ;;  %8671 = vmatpush1.bf16.msra.mxu1 %v8670_v36  ;;  %v8145_v36 = vld [vmem:[%s13505_s3 + $0xf38] sm:$0xff] }
 0x58b   :  { %8673 = vmatprep.subr.bf16.mxu1 %v8672_v42  ;;  %v8700_v41 = vpack.c.bf16 %v8145_v36, %v8143_v19 }
 0x58d   :  { %8078 = vmatmul.mubr.msk.f32.gmra.mrb[6].mxu1 %vm2556_vm11, %v12975_v5  ;;  %v8110_v5 = vld [vmem:[%s13505_s3 + $0xe60] sm:$0xff]  ;;  %v13173_v0 = vpop.permute.xlu0 %6607 }
 0x58e   :  { %6537 = vmatprep.mubr.f32.mxu1 %v13561_v63  ;;  %8675 = vmatpush1.bf16.msra.mxu1 %v8674_v62  ;;  %v8678_v3 = vpack.c.bf16 %v8112_v47, %v8110_v5  ;;  %v8147_v62 = vld [vmem:[%s13505_s3 + $0xf48] sm:$0xff] }
 0x58f   :  { %8677 = vmatprep.subr.bf16.mxu1 %v8676_v46  ;;  %v8149_v46 = vld [vmem:[%s13505_s3 + $0xf58] sm:$0xff] }
 0x590   :  { %v8704_v47 = vpack.c.bf16 %v8149_v46, %v8147_v62 }
 0x591   :  { %8079 = vmatmul.mubr.msk.f32.gmra.mrb[8].mxu1 %vm2556_vm11, %v13000_v49  ;;  %v8115_v49 = vld [vmem:[%s13505_s3 + $0xe88] sm:$0xff]  ;;  %v13197_v51 = vpop.permute.xlu0 %6775 }
 0x592   :  { %6543 = vmatprep.mubr.f32.mxu1 %v13561_v63  ;;  %v8680_v25 = vpack.c.bf16 %v8117_v43, %v8115_v49  ;;  %v8146_v49 = vld [vmem:[%s13505_s3 + $0xf40] sm:$0xff]  ;;  %v8148_v43 = vld [vmem:[%s13505_s3 + $0xf50] sm:$0xff] }
 0x595   :  { %8080 = vmatmul.mubr.msk.f32.gmra.mrb[10].mxu1 %vm2556_vm11, %v13024_v37  ;;  %v8682_v37 = vpack.c.bf16 %v8116_v59, %v8114_v15  ;;  %v6778_v27 = vpop.permute.xlu0 %6777  ;;  %v8150_v59 = vld [vmem:[%s13505_s3 + $0xf60] sm:$0xff] }
 0x596   :  { %6549 = vmatprep.mubr.f32.mxu1 %v13561_v63  ;;  %v8710_v22 = vpack.c.bf16 %v8152_v39, %v8150_v59 }
 0x599   :  { %8081 = vmatmul.mubr.msk.f32.gmra.mrb[12].mxu1 %vm2556_vm11, %v13049_v21  ;;  %v8122_v21 = vld [vmem:[%s13505_s3 + $0xec0] sm:$0xff]  ;;  %v6780_v40 = vpop.permute.xlu0 %6779 }
 0x59a   :  { %6689 = vmatprep.mubr.f32.mxu1 %v13561_v63  ;;  %v8690_v44 = vpack.c.bf16 %v8124_v50, %v8122_v21 }
 0x59d   :  { %8102 = vmatmul.mubr.msk.f32.vlgmr.msra.gmra.mrb[14].mxu1 %vm2556_vm11, %v13055_v30  ;;  %v8129_v30 = vld [vmem:[%s13505_s3 + $0xef8] sm:$0xff]  ;;  %v6782_v2 = vpop.permute.xlu0 %6781 }
 0x59e   :  { %8679 = vmatpush1.bf16.msra.mxu1 %v8678_v3  ;;  %6695 = vmatprep.mubr.f32.mxu1 %v13561_v63  ;;  %v8692_v4 = vpack.c.bf16 %v8129_v30, %v8127_v57  ;;  %v8153_v3 = vld [vmem:[%s13505_s3 + $0xf78] sm:$0xff] }
 0x59f   :  { %8681 = vmatprep.subr.bf16.mxu1 %v8680_v25  ;;  %v8706_v25 = vpack.c.bf16 %v8148_v43, %v8146_v49 }
 0x5a0   :  { %v13199_v11 = vpop.f32.mrb[50].mxu0 }
 0x5a1   :  { %v13207_v34 = vpop.f32.mrb[51].mxu0  ;;  %8103 = vmatmul.mubr.msk.f32.gmra.mrb[0].mxu1 %vm2556_vm11, %v13062_v9  ;;  %v6784_v54 = vpop.permute.xlu0 %6783  ;;  %v8778_v19 = vadd.f32 %v13199_v11, %v2527_v38 }
 0x5a2   :  { %6701 = vmatprep.mubr.f32.mxu1 %v13561_v63  ;;  %8683 = vmatpush1.bf16.msra.mxu1 %v8682_v37  ;;  %v8155_v37 = vld [vmem:[%s13505_s3 + $0xf88] sm:$0xff] }
 0x5a3   :  { %8685 = vmatprep.subr.bf16.mxu1 %v8684_v20  ;;  %v8157_v20 = vld [vmem:[%s13505_s3 + $0xf98] sm:$0xff] }
 0x5a4   :  { %v13218_v53 = vpop.f32.mrb[52].mxu0  ;;  %v8712_v24 = vpack.c.bf16 %v8157_v20, %v8155_v37 }
 0x5a5   :  { %v13226_v9 = vpop.f32.mrb[53].mxu0  ;;  %8104 = vmatmul.mubr.msk.f32.gmra.mrb[2].mxu1 %vm2556_vm11, %v13086_v12 }
 0x5a6   :  { %6707 = vmatprep.mubr.f32.mxu1 %v13561_v63  ;;  %8687 = vmatpush1.bf16.msra.mxu1 %v8686_v13 }
 0x5a7   :  { %8689 = vmatprep.subr.bf16.mxu1 %v8688_v55 }
 0x5a8   :  { %v13237_v28 = vpop.f32.mrb[54].mxu0 }
 0x5a9   :  { %v13245_v12 = vpop.f32.mrb[55].mxu0  ;;  %8105 = vmatmul.mubr.msk.f32.gmra.mrb[4].mxu1 %vm2556_vm11, %v13111_v60 }
 0x5aa   :  { %6713 = vmatprep.mubr.f32.mxu1 %v13561_v63  ;;  %8691 = vmatpush1.bf16.msra.mxu1 %v8690_v44 }
 0x5ab   :  { %8693 = vmatprep.subr.bf16.mxu1 %v8692_v4  ;;  %v6972_v4 = vpop.permute.xlu1 %6971 }
 0x5ac   :  { %v13250_v58 = vpop.f32.mrb[56].mxu0 }
 0x5ad   :  { %v13252_v45 = vpop.f32.mrb[57].mxu0  ;;  %8106 = vmatmul.mubr.msk.f32.gmra.mrb[6].mxu1 %vm2556_vm11, %v13135_v31  ;;  %v8142_v31 = vld [vmem:[%s13505_s3 + $0xf20] sm:$0xff]  ;;  %v8790_v43 = vadd.f32 %v13250_v58, %v2527_v38 }
 0x5ae   :  { %6719 = vmatprep.mubr.f32.mxu1 %v13561_v63  ;;  %8695 = vmatpush1.bf16.msra.mxu1 %v8694_v8  ;;  %v8702_v5 = vpack.c.bf16 %v8144_v32, %v8142_v31  ;;  %v13619_v8 = vsub.s32 1, %v13617_v56 }
 0x5af   :  { %8697 = vmatprep.subr.bf16.mxu1 %v8696_v23 }
 0x5b0   :  { %v13257_v14 = vpop.f32.mrb[58].mxu0  ;;  %v2531_v23 = vrot.slane %v2522_v16, %v13619_v8 }
 0x5b1   :  { %v13259_v35 = vpop.f32.mrb[59].mxu0  ;;  %8107 = vmatmul.mubr.msk.f32.gmra.mrb[8].mxu1 %vm2556_vm11, %v13148_v18 }
 0x5b2   :  { %6725 = vmatprep.mubr.f32.mxu1 %v13561_v63  ;;  %v8780_v36 = vadd.f32 %v13207_v34, %v2531_v23  ;;  %v8784_v11 = vadd.f32 %v13226_v9, %v2531_v23  ;;  %v8796_v59 = vadd.f32 %v13259_v35, %v2531_v23 }
 0x5b4   :  { %v13264_v60 = vpop.f32.mrb[60].mxu0 }
 0x5b5   :  { %v13266_v17 = vpop.f32.mrb[61].mxu0  ;;  %8108 = vmatmul.mubr.msk.f32.gmra.mrb[10].mxu1 %vm2556_vm11, %v13154_v6  ;;  %v6786_v6 = vpop.permute.xlu0 %6785  ;;  %v8798_v37 = vadd.f32 %v13264_v60, %v2527_v38 }
 0x5b6   :  { %6731 = vmatprep.mubr.f32.mxu1 %v13561_v63  ;;  %v8800_v20 = vadd.f32 %v13266_v17, %v2531_v23 }
 0x5b8   :  { %v13277_v1 = vpop.f32.mrb[62].mxu0 }
 0x5b9   :  { %v13285_v42 = vpop.f32.mrb[63].mxu0  ;;  %8109 = vmatmul.mubr.msk.f32.gmra.mrb[12].mxu1 %vm2556_vm11, %v13173_v0  ;;  %v8151_v0 = vld [vmem:[%s13505_s3 + $0xf68] sm:$0xff]  ;;  %v6788_v7 = vpop.permute.xlu0 %6787 }
 0x5ba   :  { %6871 = vmatprep.mubr.f32.mxu1 %v13561_v63  ;;  %v8708_v15 = vpack.c.bf16 %v8153_v3, %v8151_v0  ;;  %v8792_v0 = vadd.f32 %v13252_v45, %v2531_v23 }
 0x5bc   :  { %v13296_v52 = vpop.f32.mrb[48].mxu0 }
 0x5bd   :  { %v13304_v18 = vpop.f32.mrb[49].mxu0  ;;  %8130 = vmatmul.mubr.msk.f32.vlgmr.msra.gmra.mrb[14].mxu1 %vm2556_vm11, %v13197_v51  ;;  %v8154_v51 = vld [vmem:[%s13505_s3 + $0xf80] sm:$0xff]  ;;  %v6790_v26 = vpop.permute.xlu0 %6789 }
 0x5be   :  { %8699 = vmatpush1.bf16.msra.mxu1 %v8698_v10  ;;  %6877 = vmatprep.mubr.f32.mxu1 %v13561_v63  ;;  %v8714_v13 = vpack.c.bf16 %v8156_v48, %v8154_v51  ;;  %v8802_v51 = vadd.f32 %v13277_v1, %v2527_v38  ;;  %v8804_v48 = vadd.f32 %v13285_v42, %v2531_v23 }
 0x5bf   :  { %8701 = vmatprep.subr.bf16.mxu1 %v8700_v41 }
 0x5c1   :  { %8131 = vmatmul.mubr.msk.f32.gmra.mrb[0].mxu1 %vm2556_vm11, %v6778_v27  ;;  %v6958_v55 = vpop.permute.xlu0 %6957 }
 0x5c2   :  { %6883 = vmatprep.mubr.f32.mxu1 %v13561_v63  ;;  %8703 = vmatpush1.bf16.msra.mxu1 %v8702_v5  ;;  %v8788_v5 = vadd.f32 %v13245_v12, %v2531_v23 }
 0x5c3   :  { %8705 = vmatprep.subr.bf16.mxu1 %v8704_v47 }
 0x5c5   :  { %8132 = vmatmul.mubr.msk.f32.gmra.mrb[2].mxu1 %vm2556_vm11, %v6780_v40  ;;  %v6960_v21 = vpop.permute.xlu0 %6959  ;;  %v8774_v40 = vadd.f32 %v13296_v52, %v2527_v38  ;;  %v8782_v52 = vadd.f32 %v13218_v53, %v2527_v38 }
 0x5c6   :  { %6889 = vmatprep.mubr.f32.mxu1 %v13561_v63  ;;  %8707 = vmatpush1.bf16.msra.mxu1 %v8706_v25 }
 0x5c7   :  { %8709 = vmatprep.subr.bf16.mxu1 %v8708_v15  ;;  %v8794_v15 = vadd.f32 %v13257_v14, %v2527_v38 }
 0x5c9   :  { %8133 = vmatmul.mubr.msk.f32.gmra.mrb[4].mxu1 %vm2556_vm11, %v6782_v2  ;;  %v6962_v50 = vpop.permute.xlu0 %6961  ;;  %v8776_v2 = vadd.f32 %v13304_v18, %v2531_v23 }
 0x5ca   :  { %6895 = vmatprep.mubr.f32.mxu1 %v13561_v63  ;;  %8711 = vmatpush1.bf16.msra.mxu1 %v8710_v22 }
 0x5cb   :  { %8713 = vmatprep.subr.bf16.mxu1 %v8712_v24 }
 0x5cd   :  { %8134 = vmatmul.mubr.msk.f32.gmra.mrb[6].mxu1 %vm2556_vm11, %v6784_v54  ;;  %v6964_v57 = vpop.permute.xlu0 %6963 }
 0x5ce   :  { %6901 = vmatprep.mubr.f32.mxu1 %v13561_v63  ;;  %8715 = vmatpush1.bf16.msra.mxu1 %v8714_v13 }
 0x5d1   :  { %8135 = vmatmul.mubr.msk.f32.gmra.mrb[8].mxu1 %vm2556_vm11, %v6786_v6  ;;  %v6966_v30 = vpop.permute.xlu0 %6965  ;;  %v8786_v6 = vadd.f32 %v13237_v28, %v2527_v38 }
 0x5d2   :  { %6907 = vmatprep.mubr.f32.mxu1 %v13561_v63 }
 0x5d5   :  { %8136 = vmatmul.mubr.msk.f32.gmra.mrb[10].mxu1 %vm2556_vm11, %v6788_v7  ;;  %v6968_v27 = vpop.permute.xlu0 %6967 }
 0x5d6   :  { %6913 = vmatprep.mubr.f32.mxu1 %v13561_v63 }
 0x5d9   :  { %8137 = vmatmul.mubr.msk.f32.gmra.mrb[12].mxu1 %vm2556_vm11, %v6790_v26  ;;  %v6970_v44 = vpop.permute.xlu0 %6969 }
 0x5da   :  { %7053 = vmatprep.mubr.f32.mxu1 %v13561_v63 }
 0x5dd   :  { %8158 = vmatmul.mubr.msk.f32.vlgmr.msra.gmra.mrb[14].mxu1 %vm2556_vm11, %v6958_v55 }
 0x5de   :  { %7059 = vmatprep.mubr.f32.mxu1 %v13561_v63 }
 0x5e1   :  { %8159 = vmatmul.mubr.msk.f32.gmra.mrb[0].mxu1 %vm2556_vm11, %v6960_v21 }
 0x5e2   :  { %7065 = vmatprep.mubr.f32.mxu1 %v13561_v63 }
 0x5e5   :  { %8160 = vmatmul.mubr.msk.f32.gmra.mrb[2].mxu1 %vm2556_vm11, %v6962_v50 }
 0x5e6   :  { %7071 = vmatprep.mubr.f32.mxu1 %v13561_v63 }
 0x5e9   :  { %8161 = vmatmul.mubr.msk.f32.gmra.mrb[4].mxu1 %vm2556_vm11, %v6964_v57 }
 0x5ea   :  { %7077 = vmatprep.mubr.f32.mxu1 %v13561_v63 }
 0x5ed   :  { %8162 = vmatmul.mubr.msk.f32.gmra.mrb[6].mxu1 %vm2556_vm11, %v6966_v30 }
 0x5ee   :  { %7083 = vmatprep.mubr.f32.mxu1 %v13561_v63 }
 0x5f1   :  { %8163 = vmatmul.mubr.msk.f32.gmra.mrb[8].mxu1 %vm2556_vm11, %v6968_v27 }
 0x5f2   :  { %7089 = vmatprep.mubr.f32.mxu1 %v13561_v63 }
 0x5f5   :  { %8164 = vmatmul.mubr.msk.f32.gmra.mrb[10].mxu1 %vm2556_vm11, %v6970_v44 }
 0x5f6   :  { %7095 = vmatprep.mubr.f32.mxu1 %v13561_v63 }
 0x5f9   :  { %8165 = vmatmul.mubr.msk.f32.gmra.mrb[12].mxu1 %vm2556_vm11, %v6972_v4 }
 0x6b0   :  { %v7055_v29 = vpop.f32.mrb[14].mxu1 }
 0x6b1   :  { %v13377_v61 = vadd.f32 %v8774_v40, %v7055_v29  ;;  %v7057_v63 = vpop.f32.mrb[15].mxu1 }
 0x6b2   :  { %v8777_v54 = vadd.f32 %v8776_v2, %v7057_v63 }
 0x6b3   :  { %7134 = vrot.lane.b32.xlu0 %v13377_v61, %s9381_s23 }
 0x6b4   :  { %v7061_v10 = vpop.f32.mrb[0].mxu1  ;;  %7136 = vrot.lane.b32.xlu1 %v8777_v54, %s9381_s23 }
 0x6b5   :  { %v13384_v41 = vadd.f32 %v8778_v19, %v7061_v10  ;;  %v7063_v31 = vpop.f32.mrb[1].mxu1 }
 0x6b6   :  { %v8781_v32 = vadd.f32 %v8780_v36, %v7063_v31 }
 0x6b7   :  { %7138 = vrot.lane.b32.xlu0 %v13384_v41, %s9381_s23 }
 0x6b8   :  { %v7067_v62 = vpop.f32.mrb[2].mxu1  ;;  %7140 = vrot.lane.b32.xlu1 %v8781_v32, %s9381_s23 }
 0x6b9   :  { %v13391_v46 = vadd.f32 %v8782_v52, %v7067_v62  ;;  %v7069_v34 = vpop.f32.mrb[3].mxu1 }
 0x6ba   :  { %v8785_v18 = vadd.f32 %v8784_v11, %v7069_v34 }
 0x6bb   :  { %7142 = vrot.lane.b32.xlu0 %v13391_v46, %s9381_s23 }
 0x6bc   :  { %v7073_v53 = vpop.f32.mrb[4].mxu1  ;;  %7144 = vrot.lane.b32.xlu1 %v8785_v18, %s9381_s23 }
 0x6bd   :  { %v13398_v47 = vadd.f32 %v8786_v6, %v7073_v53  ;;  %v7075_v9 = vpop.f32.mrb[5].mxu1 }
 0x6be   :  { %v8789_v49 = vadd.f32 %v8788_v5, %v7075_v9 }
 0x6bf   :  { %7146 = vrot.lane.b32.xlu0 %v13398_v47, %s9381_s23 }
 0x6c0   :  { %v7079_v28 = vpop.f32.mrb[6].mxu1  ;;  %7148 = vrot.lane.b32.xlu1 %v8789_v49, %s9381_s23 }
 0x6c1   :  { %v13405_v3 = vadd.f32 %v8790_v43, %v7079_v28  ;;  %v7081_v12 = vpop.f32.mrb[7].mxu1 }
 0x6c2   :  { %v8793_v25 = vadd.f32 %v8792_v0, %v7081_v12 }
 0x6c3   :  { %7150 = vrot.lane.b32.xlu0 %v13405_v3, %s9381_s23 }
 0x6c4   :  { %v7085_v58 = vpop.f32.mrb[8].mxu1  ;;  %7152 = vrot.lane.b32.xlu1 %v8793_v25, %s9381_s23 }
 0x6c5   :  { %v13412_v39 = vadd.f32 %v8794_v15, %v7085_v58  ;;  %v7087_v45 = vpop.f32.mrb[9].mxu1 }
 0x6c6   :  { %v8797_v7 = vadd.f32 %v8796_v59, %v7087_v45 }
 0x6c7   :  { %7154 = vrot.lane.b32.xlu0 %v13412_v39, %s9381_s23 }
 0x6c8   :  { %v7091_v14 = vpop.f32.mrb[10].mxu1  ;;  %7156 = vrot.lane.b32.xlu1 %v8797_v7, %s9381_s23 }
 0x6c9   :  { %v13419_v22 = vadd.f32 %v8798_v37, %v7091_v14  ;;  %v7093_v35 = vpop.f32.mrb[11].mxu1 }
 0x6ca   :  { %v8801_v24 = vadd.f32 %v8800_v20, %v7093_v35 }
 0x6cb   :  { %7158 = vrot.lane.b32.xlu0 %v13419_v22, %s9381_s23 }
 0x6cc   :  { %7160 = vrot.lane.b32.xlu1 %v8801_v24, %s9381_s23  ;;  %v7097_v60 = vpop.f32.mrb[12].mxu1 }
 0x6cd   :  { %v13426_v26 = vadd.f32 %v8802_v51, %v7097_v60  ;;  %v7099_v17 = vpop.f32.mrb[13].mxu1 }
 0x6ce   :  { %v8805_v13 = vadd.f32 %v8804_v48, %v7099_v17 }
 0x6cf   :  { %7162 = vrot.lane.b32.xlu0 %v13426_v26, %s9381_s23 }
 0x6d0   :  { %7164 = vrot.lane.b32.xlu1 %v8805_v13, %s9381_s23 }
 0x725   :  { %v7135_v55 = vpop.permute.xlu0 %7134 }
 0x726   :  { %v7137_v1 = vpop.permute.xlu1 %7136 }
 0x727   :  { %v7167_v21 = vsel %vm7166_vm12, %v7135_v55, %v7137_v1 }
 0x728   :  { %v7183_v50 = vmax.f32 %v13377_v61, %v7167_v21 }
 0x729   :  { %v7139_v42 = vpop.permute.xlu0 %7138 }
 0x72a   :  { %v7199_v57 = vrot.slane %v7183_v50, 1  ;;  %v7141_v30 = vpop.permute.xlu1 %7140 }
 0x72b   :  { %v7168_v27 = vsel %vm7166_vm12, %v7139_v42, %v7141_v30 }
 0x72c   :  { %v7215_v44 = vmax.f32 %v7183_v50, %v7199_v57  ;;  %v7184_v4 = vmax.f32 %v13384_v41, %v7168_v27 }
 0x72d   :  { %v7143_v16 = vpop.permute.xlu0 %7142 }
 0x72e   :  { %v7231_v56 = vrot.slane %v7215_v44, 1  ;;  %v7247_v33 = vrot.slane %v7215_v44, 2  ;;  %v7200_v38 = vrot.slane %v7184_v4, 1  ;;  %v7145_v8 = vpop.permute.xlu1 %7144  ;;  %v7263_v40 = vrot.slane %v7215_v44, 3 }
 0x72f   :  { %v7169_v23 = vsel %vm7166_vm12, %v7143_v16, %v7145_v8 }
 0x730   :  { %v7279_v2 = vsel %vm2423_vm8, %v7215_v44, %v7231_v56  ;;  %v7216_v29 = vmax.f32 %v7184_v4, %v7200_v38  ;;  %v7185_v61 = vmax.f32 %v13391_v46, %v7169_v23 }
 0x731   :  { %v7287_v63 = vsel %vm2432_vm9, %v7279_v2, %v7247_v33  ;;  %v7147_v54 = vpop.permute.xlu0 %7146 }
 0x732   :  { %v7295_v19 = vsel %vm2441_vm10, %v7287_v63, %v7263_v40  ;;  %v7232_v36 = vrot.slane %v7216_v29, 1  ;;  %v7248_v10 = vrot.slane %v7216_v29, 2  ;;  %v7149_v41 = vpop.permute.xlu1 %7148  ;;  %v7201_v32 = vrot.slane %v7185_v61, 1 }
 0x733   :  { %v7303_v31 = vmax.f32 %v7295_v19, 0.0  ;;  %v7170_v52 = vsel %vm7166_vm12, %v7147_v54, %v7149_v41  ;;  %v7264_v11 = vrot.slane %v7216_v29, 3 }
 0x734   :  { %v7280_v62 = vsel %vm2423_vm8, %v7216_v29, %v7232_v36  ;;  %v7186_v34 = vmax.f32 %v13398_v47, %v7170_v52  ;;  %v7217_v18 = vmax.f32 %v7185_v61, %v7201_v32 }
 0x735   :  { %7312 = vst.msk [vmem:[%s13508_s5] sm:$0xf] %vm7311_vm13, %v7303_v31  ;;  %v7288_v46 = vsel %vm2432_vm9, %v7280_v62, %v7248_v10  ;;  %v7151_v6 = vpop.permute.xlu0 %7150 }
 0x736   :  { %v7296_v5 = vsel %vm2441_vm10, %v7288_v46, %v7264_v11  ;;  %v7202_v53 = vrot.slane %v7186_v34, 1  ;;  %v7153_v9 = vpop.permute.xlu1 %7152  ;;  %v7233_v43 = vrot.slane %v7217_v18, 1  ;;  %v7249_v0 = vrot.slane %v7217_v18, 2 }
 0x737   :  { %v7304_v49 = vmax.f32 %v7296_v5, 0.0  ;;  %v7171_v12 = vsel %vm7166_vm12, %v7151_v6, %v7153_v9  ;;  %v7265_v47 = vrot.slane %v7217_v18, 3 }
 0x738   :  { %v7218_v28 = vmax.f32 %v7186_v34, %v7202_v53  ;;  %v7281_v25 = vsel %vm2423_vm8, %v7217_v18, %v7233_v43  ;;  %v7187_v15 = vmax.f32 %v13405_v3, %v7171_v12 }
 0x739   :  { %7313 = vst.msk [vmem:[%s13508_s5 + $0x4] sm:$0xf] %vm7311_vm13, %v7304_v49  ;;  %v7155_v59 = vpop.permute.xlu0 %7154  ;;  %v7289_v58 = vsel %vm2432_vm9, %v7281_v25, %v7249_v0 }
 0x73a   :  { %v7234_v45 = vrot.slane %v7218_v28, 1  ;;  %v7250_v7 = vrot.slane %v7218_v28, 2  ;;  %v7157_v37 = vpop.permute.xlu1 %7156  ;;  %v7297_v20 = vsel %vm2441_vm10, %v7289_v58, %v7265_v47  ;;  %v7203_v14 = vrot.slane %v7187_v15, 1 }
 0x73b   :  { %v7172_v35 = vsel %vm7166_vm12, %v7155_v59, %v7157_v37  ;;  %v7305_v24 = vmax.f32 %v7297_v20, 0.0  ;;  %v7266_v51 = vrot.slane %v7218_v28, 3 }
 0x73c   :  { %v7282_v48 = vsel %vm2423_vm8, %v7218_v28, %v7234_v45  ;;  %v7188_v60 = vmax.f32 %v13412_v39, %v7172_v35  ;;  %v7219_v3 = vmax.f32 %v7187_v15, %v7203_v14 }
 0x73d   :  { %v7290_v17 = vsel %vm2432_vm9, %v7282_v48, %v7250_v7  ;;  %v7159_v13 = vpop.permute.xlu0 %7158  ;;  %7314 = vst.msk [vmem:[%s13508_s5 + $0x8] sm:$0xf] %vm7311_vm13, %v7305_v24 }
 0x73e   :  { %v7298_v55 = vsel %vm2441_vm10, %v7290_v17, %v7266_v51  ;;  %v7204_v1 = vrot.slane %v7188_v60, 1  ;;  %v7161_v21 = vpop.permute.xlu1 %7160  ;;  %v7235_v42 = vrot.slane %v7219_v3, 1  ;;  %v7251_v57 = vrot.slane %v7219_v3, 2 }
 0x73f   :  { %v7306_v50 = vmax.f32 %v7298_v55, 0.0  ;;  %v7173_v27 = vsel %vm7166_vm12, %v7159_v13, %v7161_v21  ;;  %v7267_v39 = vrot.slane %v7219_v3, 3 }
 0x740   :  { %v7220_v30 = vmax.f32 %v7188_v60, %v7204_v1  ;;  %v7283_v44 = vsel %vm2423_vm8, %v7219_v3, %v7235_v42  ;;  %v7189_v4 = vmax.f32 %v13419_v22, %v7173_v27 }
 0x741   :  { %7315 = vst.msk [vmem:[%s13508_s5 + $0xc] sm:$0xf] %vm7311_vm13, %v7306_v50  ;;  %v7163_v16 = vpop.permute.xlu0 %7162  ;;  %v7291_v56 = vsel %vm2432_vm9, %v7283_v44, %v7251_v57 }
 0x742   :  { %v7236_v33 = vrot.slane %v7220_v30, 1  ;;  %v7252_v38 = vrot.slane %v7220_v30, 2  ;;  %v7165_v8 = vpop.permute.xlu1 %7164  ;;  %v7299_v23 = vsel %vm2441_vm10, %v7291_v56, %v7267_v39  ;;  %v7205_v40 = vrot.slane %v7189_v4, 1 }
 0x743   :  { %v7174_v2 = vsel %vm7166_vm12, %v7163_v16, %v7165_v8  ;;  %v7307_v29 = vmax.f32 %v7299_v23, 0.0  ;;  %v7268_v61 = vrot.slane %v7220_v30, 3 }
 0x744   :  { %v7284_v63 = vsel %vm2423_vm8, %v7220_v30, %v7236_v33  ;;  %v7190_v54 = vmax.f32 %v13426_v26, %v7174_v2  ;;  %v7221_v22 = vmax.f32 %v7189_v4, %v7205_v40 }
 0x745   :  { %v7292_v19 = vsel %vm2432_vm9, %v7284_v63, %v7252_v38  ;;  %7316 = vst.msk [vmem:[%s13508_s5 + $0x10] sm:$0xf] %vm7311_vm13, %v7307_v29 }
 0x746   :  { %v7300_v36 = vsel %vm2441_vm10, %v7292_v19, %v7268_v61  ;;  %v7206_v10 = vrot.slane %v7190_v54, 1  ;;  %v7237_v31 = vrot.slane %v7221_v22, 1  ;;  %v7253_v32 = vrot.slane %v7221_v22, 2 }
 0x747   :  { %v7308_v41 = vmax.f32 %v7300_v36, 0.0  ;;  %v7269_v26 = vrot.slane %v7221_v22, 3 }
 0x748   :  { %v7222_v52 = vmax.f32 %v7190_v54, %v7206_v10  ;;  %v7285_v11 = vsel %vm2423_vm8, %v7221_v22, %v7237_v31 }
 0x749   :  { %7317 = vst.msk [vmem:[%s13508_s5 + $0x14] sm:$0xf] %vm7311_vm13, %v7308_v41  ;;  %v7293_v62 = vsel %vm2432_vm9, %v7285_v11, %v7253_v32 }
 0x74a   :  { %v7238_v34 = vrot.slane %v7222_v52, 1  ;;  %v7254_v46 = vrot.slane %v7222_v52, 2  ;;  %v7301_v18 = vsel %vm2441_vm10, %v7293_v62, %v7269_v26  ;;  %v7270_v5 = vrot.slane %v7222_v52, 3 }
 0x74b   :  { %v7309_v6 = vmax.f32 %v7301_v18, 0.0 }
 0x74c   :  { %v7286_v53 = vsel %vm2423_vm8, %v7222_v52, %v7238_v34 }
 0x74d   :  { %v7294_v9 = vsel %vm2432_vm9, %v7286_v53, %v7254_v46  ;;  %7318 = vst.msk [vmem:[%s13508_s5 + $0x18] sm:$0xf] %vm7311_vm13, %v7309_v6 }
 0x74e   :  { %v7302_v49 = vsel %vm2441_vm10, %v7294_v9, %v7270_v5 }
 0x74f   :  { %v7310_v43 = vmax.f32 %v7302_v49, 0.0 }
 0x751   :  { %7319 = vst.msk [vmem:[%s13508_s5 + $0x1c] sm:$0xf] %vm7311_vm13, %v7310_v43 }

</bundles_post_ra>
